<compile_context>
chip_gen: v7x
topology: tpu7x:2x2x1
jax: 0.10.0
libtpu: 0.0.40
codegen_flags: <defaults>
</compile_context>

<pallas_src>
import functools

import numpy as np
import jax
import jax.numpy as jnp
from jax.experimental import pallas as pl
from jax.experimental.pallas import tpu as pltpu

BETA = 1.0 / 9.0
HALF_OVER_BETA = 0.5 / BETA          # = 4.5 (mul instead of div on the VPU)
LANE_GROUPS = 128                    # anchors packed per lane row (G)


# --------------------------------------------------------------------------
# Kernel bodies
# --------------------------------------------------------------------------
def _weighted_smooth_l1(x_ref, t_ref, w_ref, cw_ref, *, C):
    """Weighted smooth-L1 block, f32, shape (TR, G*C).

    x/t: (TR, G*C), w: (TR, G), cw: (1, G*C); lane j holds anchor j//C,
    code j%C of the row-major (N, C) layout (pure bitcast, lane-dense).
    """
    x = x_ref[...].astype(jnp.float32)
    t = t_ref[...].astype(jnp.float32)
    t = jnp.where(jnp.isnan(t), x, t)                  # ignore NaN targets
    diff = (x - t) * cw_ref[...]                       # per-code weighting
    n = jnp.abs(diff)
    loss = jnp.where(n < BETA, HALF_OVER_BETA * n * n, n - 0.5 * BETA)

    # Expand anchor weights to lanes: w_exp[r, g*C + c] = w[r, g], done on the
    # otherwise-idle MXU with a 0/1 selection matrix built from iota (no HBM
    # input, no double buffer).  w is split into three bf16 terms whose sum
    # reconstructs the f32 value exactly, so three single-pass bf16 matmuls
    # replace the previous ~6-pass HIGHEST f32 matmul while staying exact to
    # f32 rounding (the selection matrix has a single 1 per column).
    g = w_ref.shape[-1]
    lc = x.shape[-1]
    lane = jax.lax.broadcasted_iota(jnp.int32, (g, lc), 1)
    grp = jax.lax.broadcasted_iota(jnp.int32, (g, lc), 0)
    sel = ((lane >= grp * C) & (lane < (grp + 1) * C)).astype(jnp.bfloat16)

    w = w_ref[...].astype(jnp.float32)
    w_hi = w.astype(jnp.bfloat16)
    r = w - w_hi.astype(jnp.float32)
    w_mid = r.astype(jnp.bfloat16)
    w_lo = (r - w_mid.astype(jnp.float32)).astype(jnp.bfloat16)
    w_exp = (jnp.dot(w_hi, sel, preferred_element_type=jnp.float32)
             + jnp.dot(w_mid, sel, preferred_element_type=jnp.float32)
             + jnp.dot(w_lo, sel, preferred_element_type=jnp.float32))
    return loss * w_exp


def _merge_loss_kernel(x_ref, t_ref, w_ref, cw_ref, out_ref, *, C):
    out_ref[...] = _weighted_smooth_l1(
        x_ref, t_ref, w_ref, cw_ref, C=C).astype(out_ref.dtype)


def _merge_loss_lane_sum_kernel(x_ref, t_ref, w_ref, cw_ref, out_ref, *,
                                C, total_rows):
    """Accumulates per-lane sums of the weighted loss into a (1, G*C) block."""
    wl = _weighted_smooth_l1(x_ref, t_ref, w_ref, cw_ref, C=C)
    tr = x_ref.shape[0]
    if total_rows % tr:                 # ragged last block: mask garbage rows
        row = jax.lax.broadcasted_iota(jnp.int32, wl.shape, 0)
        wl = jnp.where(row + pl.program_id(0) * tr < total_rows, wl, 0.0)
    part = jnp.sum(wl, axis=0, keepdims=True)           # (1, G*C)

    @pl.when(pl.program_id(0) == 0)
    def _():
        out_ref[...] = jnp.zeros_like(out_ref)

    out_ref[...] += part


# --------------------------------------------------------------------------
# Wrapper helpers
# --------------------------------------------------------------------------
def _device_tuning():
    """Per-TPU-generation (tile_rows, vmem_limit_bytes)."""
    try:
        kind = jax.devices()[0].device_kind.lower()
    except Exception:
        kind = ""
    if "v5" in kind:   # v5e: 16 MiB default scoped VMEM -> small tile, raised limit
        return 256, 64 << 20
    if "v6" in kind:   # v6e: 128 MiB VMEM, 1.4 TB/s -> large tile cuts per-step overhead
        return 1024, 96 << 20
    if "v7" in kind:   # v7x: 64 MiB VMEM, 3.2 TB/s -> large tile, leave headroom
        return 1024, 48 << 20
    return 512, 64 << 20


def _lane_dense_views(inp, target, weights, G):
    """Row-major-preserving (bitcast) lane-dense views; pads only if needed."""
    B, N, C = inp.shape
    rows = B * N
    x = inp.reshape(rows, C)
    t = target.reshape(rows, C)
    w = weights.reshape(rows)
    rows_pad = pl.cdiv(rows, G) * G
    if rows_pad != rows:
        # TODO(synk): handle the <=G-1 row tail inside the kernel instead of
        # these full-array pad copies; only hit when (B*N) % 128 != 0.
        pad = rows_pad - rows
        x = jnp.pad(x, ((0, pad), (0, 0)))
        t = jnp.pad(t, ((0, pad), (0, 0)))
        w = jnp.pad(w, ((0, pad),))
    nr = rows_pad // G
    return (x.reshape(nr, G * C), t.reshape(nr, G * C), w.reshape(nr, G),
            rows, rows_pad, nr)


def _pick_tile(nr, tile_rows):
    """Row-block size: big as allowed, but always >=2 blocks when splittable
    so both v7x TensorCores get work (dimension_semantics='parallel')."""
    tr = min(tile_rows, nr)
    if pl.cdiv(nr, tr) < 2 and nr >= 16:
        tr = ((nr + 1) // 2 + 7) // 8 * 8
    return tr


# --------------------------------------------------------------------------
# Public entry points
# --------------------------------------------------------------------------
def merge_loss_concat(inp, target, weights, code_weights, *,
                      tile_rows=None, out_dtype=jnp.float32):
    """Concatenated weighted smooth-L1 loss, shape (B, N, C).

    Preferred full-tensor entry point: one lane-dense write, no re-reads.
    Inputs may be bf16 (cast in-kernel); `out_dtype=jnp.bfloat16` halves the
    output HBM stream if the consumer tolerates it.
    """
    B, N, C = inp.shape
    G = LANE_GROUPS
    dev_tile, vmem_limit = _device_tuning()
    if tile_rows is None:
        tile_rows = dev_tile

    x, t, w, rows, rows_pad, nr = _lane_dense_views(inp, target, weights, G)
    lc = G * C
    cw = jnp.tile(code_weights.astype(jnp.float32), G).reshape(1, lc)

    tr = _pick_tile(nr, tile_rows)
    grid = (pl.cdiv(nr, tr),)

    bytes_accessed = int(x.size * x.dtype.itemsize + t.size * t.dtype.itemsize
                         + w.size * w.dtype.itemsize
                         + x.size * jnp.dtype(out_dtype).itemsize)
    cost = pl.CostEstimate(flops=int(10 * x.size + 6 * nr * G * lc),
                           transcendentals=0, bytes_accessed=bytes_accessed)

    loss_flat = pl.pallas_call(
        functools.partial(_merge_loss_kernel, C=C),
        out_shape=jax.ShapeDtypeStruct((nr, lc), out_dtype),
        grid_spec=pltpu.PrefetchScalarGridSpec(
            num_scalar_prefetch=0,
            grid=grid,
            in_specs=[
                pl.BlockSpec((tr, lc), lambda r: (r, 0)),    # input
                pl.BlockSpec((tr, lc), lambda r: (r, 0)),    # target
                pl.BlockSpec((tr, G), lambda r: (r, 0)),     # anchor weights
                pl.BlockSpec((1, lc), lambda r: (0, 0)),     # code weights
            ],
            out_specs=pl.BlockSpec((tr, lc), lambda r: (r, 0)),
        ),
        compiler_params=pltpu.CompilerParams(
            dimension_semantics=("parallel",),
            vmem_limit_bytes=vmem_limit),
        cost_estimate=cost,
    )(x, t, w, cw)

    loss = loss_flat.reshape(rows_pad, C)
    if rows_pad != rows:
        loss = loss[:rows]               # pad-fallback path only (extra copy)
    return loss.reshape(B, N, C)


def merge_loss(inp, target, weights, code_weights, splits, *,
               tile_rows=None, out_dtype=jnp.float32):
    """Matches MergeLoss.forward: list of (B, N, Ci) per-split loss tensors.

    The per-split slices below are real XLA copies on top of the kernel's own
    HBM traffic; if the consumer can slice itself use merge_loss_concat(), or
    merge_loss_split_sums() when it immediately sum-reduces each split.
    """
    assert int(np.sum(splits)) == inp.shape[-1]
    loss = merge_loss_concat(inp, target, weights, code_weights,
                             tile_rows=tile_rows, out_dtype=out_dtype)
    offsets = np.cumsum(splits)[:-1].tolist()
    return jnp.split(loss, offsets, axis=-1)


def merge_loss_split_sums(inp, target, weights, code_weights, splits, *,
                          tile_rows=None):
    """Fused reduction: returns [sum over (B, N, Ci) of each split's loss].

    The full-size loss tensor never hits HBM; total traffic is just the two
    input reads plus the (B, N) weights.
    """
    B, N, C = inp.shape
    G = LANE_GROUPS
    dev_tile, vmem_limit = _device_tuning()
    if tile_rows is None:
        tile_rows = dev_tile

    x, t, w, rows, rows_pad, nr = _lane_dense_views(inp, target, weights, G)
    lc = G * C
    cw = jnp.tile(code_weights.astype(jnp.float32), G).reshape(1, lc)

    tr = _pick_tile(nr, tile_rows)
    grid = (pl.cdiv(nr, tr),)

    bytes_accessed = int(x.size * x.dtype.itemsize + t.size * t.dtype.itemsize
                         + w.size * w.dtype.itemsize + lc * 4)
    cost = pl.CostEstimate(flops=int(11 * x.size + 6 * nr * G * lc),
                           transcendentals=0, bytes_accessed=bytes_accessed)

    lane_sums = pl.pallas_call(
        functools.partial(_merge_loss_lane_sum_kernel, C=C, total_rows=nr),
        out_shape=jax.ShapeDtypeStruct((1, lc), jnp.float32),
        grid_spec=pltpu.PrefetchScalarGridSpec(
            num_scalar_prefetch=0,
            grid=grid,
            in_specs=[
                pl.BlockSpec((tr, lc), lambda r: (r, 0)),
                pl.BlockSpec((tr, lc), lambda r: (r, 0)),
                pl.BlockSpec((tr, G), lambda r: (r, 0)),
                pl.BlockSpec((1, lc), lambda r: (0, 0)),
            ],
            out_specs=pl.BlockSpec((1, lc), lambda r: (0, 0)),
        ),
        compiler_params=pltpu.CompilerParams(
            # The (1, G*C) accumulator is revisited every step -> "arbitrary".
            dimension_semantics=("arbitrary",),
            vmem_limit_bytes=vmem_limit),
        cost_estimate=cost,
    )(x, t, w, cw)

    per_code = lane_sums.reshape(G, C).sum(axis=0)      # (C,), tiny
    offsets = np.cumsum(splits)[:-1].tolist()
    return [s.sum() for s in jnp.split(per_code, offsets)]


# --------------------------------------------------------------------------
# Reference + self-test
# --------------------------------------------------------------------------
def _reference(inp, target, weights, code_weights, splits):
    inp = np.asarray(inp, np.float32)
    target = np.asarray(target, np.float32)
    weights = np.asarray(weights, np.float32)
    code_weights = np.asarray(code_weights, np.float32)
    t = np.where(np.isnan(target), inp, target)
    diff = (inp - t) * code_weights.reshape(1, 1, -1)
    n = np.abs(diff)
    loss = np.where(n < BETA, 0.5 * n * n / BETA, n - 0.5 * BETA)
    loss = loss * weights[..., None]
    offs = np.cumsum(splits)[:-1]
    return np.split(loss, offs, axis=-1)


if __name__ == "__main__":
    # module config: splits partition the box-code dimension (C = 9 here)
    splits = [3, 4, 2]
    C = sum(splits)
    code_weights = jnp.asarray(np.linspace(0.5, 2.0, C, dtype=np.float32))

    loss_fn = jax.jit(lambda x, t, w: merge_loss(x, t, w, code_weights, splits))
    sums_fn = jax.jit(
        lambda x, t, w: merge_loss_split_sums(x, t, w, code_weights, splits))

    key = jax.random.PRNGKey(0)
    for (B, N) in [(2, 256), (2, 100)]:     # second case hits the pad fallback
        k1, k2, k3, key = jax.random.split(key, 4)
        x = jax.random.normal(k1, (B, N, C), dtype=jnp.float32)
        t = jax.random.normal(k2, (B, N, C), dtype=jnp.float32)
        # inject NaN targets to exercise the isnan-ignore path
        t = t.at[0, 0, 0].set(jnp.nan)
        t = t.at[1, N - 1, C - 1].set(jnp.nan)
        w = jax.random.uniform(k3, (B, N), dtype=jnp.float32)

        losses = [jax.block_until_ready(l) for l in loss_fn(x, t, w)]
        refs = _reference(np.array(x), np.array(t), np.array(w),
                          np.array(code_weights), splits)
        for got, ref in zip(losses, refs):
            np.testing.assert_allclose(np.array(got), ref,
                                       rtol=1e-5, atol=1e-6)

        ssums = [jax.block_until_ready(s) for s in sums_fn(x, t, w)]
        for got, ref in zip(ssums, refs):
            np.testing.assert_allclose(np.float64(np.array(got)),
                                       ref.astype(np.float64).sum(),
                                       rtol=1e-4, atol=1e-5)

    print("KERNEL_OK")
</pallas_src>

<mosaic_0001>
module attributes {stable_mosaic.version = 11 : i64} {
  func.func @_merge_loss_kernel(%arg0: i32, %arg1: memref<4x1152xf32, #tpu.memory_space<vmem>>, %arg2: memref<4x1152xf32, #tpu.memory_space<vmem>>, %arg3: memref<4x128xf32, #tpu.memory_space<vmem>>, %arg4: memref<1x1152xf32, #tpu.memory_space<vmem>>, %arg5: memref<4x1152xf32, #tpu.memory_space<vmem>>) attributes {dimension_semantics = [#tpu.dimension_semantics<parallel>], iteration_bounds = array<i64: 1>, scalar_prefetch = 0 : i64, scratch_operands = 0 : i64, tpu.core_type = #tpu.core_type<tc>, window_params = [{transform_indices = @transform_0, window_bounds = array<i64: 4, 1152>}, {transform_indices = @transform_1, window_bounds = array<i64: 4, 1152>}, {transform_indices = @transform_2, window_bounds = array<i64: 4, 128>}, {pipeline_mode = #tpu.pipeline_mode<synchronous>, transform_indices = @transform_3, window_bounds = array<i64: 1, 1152>}, {transform_indices = @transform_4, window_bounds = array<i64: 4, 1152>}]} {
    %c0 = arith.constant 0 : index
    %c0_0 = arith.constant 0 : index
    %0 = vector.load %arg1[%c0, %c0_0] : memref<4x1152xf32, #tpu.memory_space<vmem>>, vector<4x1152xf32>
    %c0_1 = arith.constant 0 : index
    %c0_2 = arith.constant 0 : index
    %1 = vector.load %arg2[%c0_1, %c0_2] : memref<4x1152xf32, #tpu.memory_space<vmem>>, vector<4x1152xf32>
    %2 = arith.cmpf one, %1, %1 : vector<4x1152xf32>
    %3 = arith.select %2, %0, %1 : vector<4x1152xi1>, vector<4x1152xf32>
    %4 = arith.subf %0, %3 : vector<4x1152xf32>
    %c0_3 = arith.constant 0 : index
    %c0_4 = arith.constant 0 : index
    %5 = vector.load %arg4[%c0_3, %c0_4] : memref<1x1152xf32, #tpu.memory_space<vmem>>, vector<1x1152xf32>
    %6 = vector.broadcast %5 : vector<1x1152xf32> to vector<4x1152xf32>
    %7 = arith.mulf %4, %6 : vector<4x1152xf32>
    %8 = math.absf %7 : vector<4x1152xf32>
    %cst = arith.constant 0.111111112 : f32
    %9 = vector.broadcast %cst : f32 to vector<4x1152xf32>
    %10 = arith.cmpf olt, %8, %9 : vector<4x1152xf32>
    %cst_5 = arith.constant 4.500000e+00 : f32
    %11 = vector.broadcast %cst_5 : f32 to vector<4x1152xf32>
    %12 = arith.mulf %11, %8 : vector<4x1152xf32>
    %13 = arith.mulf %12, %8 : vector<4x1152xf32>
    %cst_6 = arith.constant 0.055555556 : f32
    %14 = vector.broadcast %cst_6 : f32 to vector<4x1152xf32>
    %15 = arith.subf %8, %14 : vector<4x1152xf32>
    %16 = arith.select %10, %13, %15 : vector<4x1152xi1>, vector<4x1152xf32>
    %17 = tpu.iota {dimensions = array<i32: 1>} : vector<128x1152xi32>
    %18 = tpu.iota {dimensions = array<i32: 0>} : vector<128x1152xi32>
    %c9_i32 = arith.constant 9 : i32
    %19 = vector.broadcast %c9_i32 : i32 to vector<128x1152xi32>
    %20 = arith.muli %18, %19 : vector<128x1152xi32>
    %21 = arith.cmpi sge, %17, %20 : vector<128x1152xi32>
    %c1_i32 = arith.constant 1 : i32
    %22 = vector.broadcast %c1_i32 : i32 to vector<128x1152xi32>
    %23 = arith.addi %18, %22 : vector<128x1152xi32>
    %c9_i32_7 = arith.constant 9 : i32
    %24 = vector.broadcast %c9_i32_7 : i32 to vector<128x1152xi32>
    %25 = arith.muli %23, %24 : vector<128x1152xi32>
    %26 = arith.cmpi slt, %17, %25 : vector<128x1152xi32>
    %27 = arith.andi %21, %26 : vector<128x1152xi1>
    %28 = arith.extui %27 : vector<128x1152xi1> to vector<128x1152xi32>
    %29 = arith.sitofp %28 : vector<128x1152xi32> to vector<128x1152xf32>
    %30 = arith.truncf %29 : vector<128x1152xf32> to vector<128x1152xbf16>
    %c0_8 = arith.constant 0 : index
    %c0_9 = arith.constant 0 : index
    %31 = vector.load %arg3[%c0_8, %c0_9] : memref<4x128xf32, #tpu.memory_space<vmem>>, vector<4x128xf32>
    %32 = arith.truncf %31 : vector<4x128xf32> to vector<4x128xbf16>
    %33 = arith.extf %32 : vector<4x128xbf16> to vector<4x128xf32>
    %34 = arith.subf %31, %33 : vector<4x128xf32>
    %35 = arith.truncf %34 : vector<4x128xf32> to vector<4x128xbf16>
    %36 = arith.extf %35 : vector<4x128xbf16> to vector<4x128xf32>
    %37 = arith.subf %34, %36 : vector<4x128xf32>
    %38 = arith.truncf %37 : vector<4x128xf32> to vector<4x128xbf16>
    %cst_10 = arith.constant dense<0.000000e+00> : vector<4x1152xf32>
    %39 = tpu.matmul %32, %30, %cst_10 {dimension_numbers = #tpu.dot_dimension_numbers<[1], [0], [0], [1], [0, 0, 1, 1], [], []>} : vector<4x128xbf16>, vector<128x1152xbf16>, vector<4x1152xf32> -> vector<4x1152xf32>
    %cst_11 = arith.constant dense<0.000000e+00> : vector<4x1152xf32>
    %40 = tpu.matmul %35, %30, %cst_11 {dimension_numbers = #tpu.dot_dimension_numbers<[1], [0], [0], [1], [0, 0, 1, 1], [], []>} : vector<4x128xbf16>, vector<128x1152xbf16>, vector<4x1152xf32> -> vector<4x1152xf32>
    %41 = arith.addf %39, %40 : vector<4x1152xf32>
    %cst_12 = arith.constant dense<0.000000e+00> : vector<4x1152xf32>
    %42 = tpu.matmul %38, %30, %cst_12 {dimension_numbers = #tpu.dot_dimension_numbers<[1], [0], [0], [1], [0, 0, 1, 1], [], []>} : vector<4x128xbf16>, vector<128x1152xbf16>, vector<4x1152xf32> -> vector<4x1152xf32>
    %43 = arith.addf %41, %42 : vector<4x1152xf32>
    %44 = arith.mulf %16, %43 : vector<4x1152xf32>
    %c0_13 = arith.constant 0 : index
    %c0_14 = arith.constant 0 : index
    %45 = vector.load %arg5[%c0_13, %c0_14] : memref<4x1152xf32, #tpu.memory_space<vmem>>, vector<4x1152xf32>
    tpu.vector_store %arg5[%c0_13, %c0_14], %44 {strides = array<i32>} : memref<4x1152xf32, #tpu.memory_space<vmem>>, vector<4x1152xf32>,
    return
  }
  func.func @transform_0(%arg0: i32) -> (i32, i32) {
    %c0_i32 = arith.constant 0 : i32
    %c0_i32_0 = arith.constant 0 : i32
    return %arg0, %c0_i32 : i32, i32
  }
  func.func @transform_1(%arg0: i32) -> (i32, i32) {
    %c0_i32 = arith.constant 0 : i32
    %c0_i32_0 = arith.constant 0 : i32
    return %arg0, %c0_i32 : i32, i32
  }
  func.func @transform_2(%arg0: i32) -> (i32, i32) {
    %c0_i32 = arith.constant 0 : i32
    %c0_i32_0 = arith.constant 0 : i32
    return %arg0, %c0_i32 : i32, i32
  }
  func.func @transform_3(%arg0: i32) -> (i32, i32) {
    %c0_i32 = arith.constant 0 : i32
    %c0_i32_0 = arith.constant 0 : i32
    %c0_i32_1 = arith.constant 0 : i32
    return %c0_i32, %c0_i32_0 : i32, i32
  }
  func.func @transform_4(%arg0: i32) -> (i32, i32) {
    %c0_i32 = arith.constant 0 : i32
    %c0_i32_0 = arith.constant 0 : i32
    return %arg0, %c0_i32 : i32, i32
  }
}

</mosaic_0001>

<bundles_post_ra>
// kernel: tile.6
= control target key start
LH: loop header
LB: loop body
LE: loop exit
PB: predicated region body
PF: predicated region fallthrough
CT: control target
= control target key end

     0   :  { %s112_s0 = inlined_call_operand.vmem [shape: f32[9], index: 0, kind: input, shape index: {}]   ;;  %s113_s1 = inlined_call_operand.vmem [shape: f32[128,9], index: 1, kind: output, shape index: {}]  }
   0x1   :  { %v4_v0 = vld [vmem:[%s112_s0] ss:$0 sm:$0xff] }
   0x2   :  { %5 = vst [vmem:[%s113_s1] sm:$0xff] %v4_v0  ;;  %36 = vst [vmem:[%s113_s1 + $0x8] sm:$0xff] %v4_v0 }
   0x3   :  { %37 = vst [vmem:[%s113_s1 + $0x10] sm:$0xff] %v4_v0  ;;  %38 = vst [vmem:[%s113_s1 + $0x18] sm:$0xff] %v4_v0 }
   0x4   :  { %39 = vst [vmem:[%s113_s1 + $0x20] sm:$0xff] %v4_v0  ;;  %40 = vst [vmem:[%s113_s1 + $0x28] sm:$0xff] %v4_v0 }
   0x5   :  { %41 = vst [vmem:[%s113_s1 + $0x30] sm:$0xff] %v4_v0  ;;  %42 = vst [vmem:[%s113_s1 + $0x38] sm:$0xff] %v4_v0 }
   0x6   :  { %43 = vst [vmem:[%s113_s1 + $0x40] sm:$0xff] %v4_v0  ;;  %44 = vst [vmem:[%s113_s1 + $0x48] sm:$0xff] %v4_v0 }
   0x7   :  { %45 = vst [vmem:[%s113_s1 + $0x50] sm:$0xff] %v4_v0  ;;  %46 = vst [vmem:[%s113_s1 + $0x58] sm:$0xff] %v4_v0 }
   0x8   :  { %47 = vst [vmem:[%s113_s1 + $0x60] sm:$0xff] %v4_v0  ;;  %48 = vst [vmem:[%s113_s1 + $0x68] sm:$0xff] %v4_v0 }
   0x9   :  { %49 = vst [vmem:[%s113_s1 + $0x70] sm:$0xff] %v4_v0  ;;  %50 = vst [vmem:[%s113_s1 + $0x78] sm:$0xff] %v4_v0 }

// kernel: tile.7
= control target key start
LH: loop header
LB: loop body
LE: loop exit
PB: predicated region body
PF: predicated region fallthrough
CT: control target
= control target key end

     0   :  { %vm10_vm0 = vcmask 7168   ;;  %vm37_vm1 = vcmask 23552   ;;  %s1294_s14 = smov 127   ;;  %vm24_vm2 = vcmask 15360   ;;  %s1295_s19 = smov 125   ;;  %vm51_vm3 = vcmask 31744   ;;  %s1868_s0 = inlined_call_operand.vmem [shape: f32[128,9], index: 0, kind: input, shape index: {}]   ;;  %s1869_s1 = inlined_call_operand.hbm [shape: f32[1,1152], index: 1, kind: output, shape index: {}]  }
   0x1   :  { %v1007_v0 = vld [vmem:[%s1868_s0 + $0x47] sm:$0x1]   ;;  %v1011_v3 = vld [vmem:[%s1868_s0 + $0x55] sm:$0x1]   ;;  %v1009_v6 = vld [vmem:[%s1868_s0 + $0xe] sm:$0x1]  }
   0x2   :  { %v1008_v1 = vld [vmem:[%s1868_s0 + $0x47] sm:$0x1]   ;;  %v1012_v4 = vld [vmem:[%s1868_s0 + $0x55] sm:$0x1]   ;;  %v1010_v7 = vld [vmem:[%s1868_s0 + $0xe] sm:$0x1]  }
   0x3   :  { %v11_v2 = vsel %vm10_vm0, %v1008_v1, %v1007_v0  ;;  %v38_v5 = vsel %vm37_vm1, %v1012_v4, %v1011_v3  ;;  %v25_v8 = vsel %vm24_vm2, %v1010_v7, %v1009_v6  ;;  %v1013_v9 = vld [vmem:[%s1868_s0 + $0x1c] sm:$0x1]   ;;  %vm55_vm4 = vcmask 39936   ;;  %v1015_v12 = vld [vmem:[%s1868_s0 + $0x63] sm:$0x1]   ;;  %s1296_s3 = smov 126  }
   0x4   :  { %12 = vrot.lane.b32.xlu0 %v11_v2, %s1294_s14  ;;  %39 = vrot.lane.b32.xlu1 %v38_v5, %s1295_s19  ;;  %v1014_v10 = vld [vmem:[%s1868_s0 + $0x1c] sm:$0x1]   ;;  %v1016_v13 = vld [vmem:[%s1868_s0 + $0x63] sm:$0x1]   ;;  %vm41_vm5 = vcmask 48128   ;;  %s1297_s4 = smov 124  }
   0x5   :  { %v52_v11 = vsel %vm51_vm3, %v1014_v10, %v1013_v9  ;;  %v1017_v14 = vld [vmem:[%s1868_s0 + $0x2a] sm:$0x1]   ;;  %v66_v16 = vsel %vm55_vm4, %v1016_v13, %v1015_v12  ;;  %vm28_vm6 = vcmask 56320   ;;  %v1019_v18 = vld [vmem:[%s1868_s0 + $0x71] sm:$0x1]   ;;  %vm14_vm7 = vcmask 64512  }
   0x6   :  { %v1018_v15 = vld [vmem:[%s1868_s0 + $0x2a] sm:$0x1]   ;;  %v1020_v19 = vld [vmem:[%s1868_s0 + $0x71] sm:$0x1]   ;;  %v1021_v20 = vld [vmem:[%s1868_s0 + $0x38] sm:$0x1]  }
   0x7   :  { %v80_v17 = vsel %vm41_vm5, %v1018_v15, %v1017_v14  ;;  %v1022_v21 = vld [vmem:[%s1868_s0 + $0x38] sm:$0x1]   ;;  %s1298_s13 = smov 123   ;;  %s1299_s14 = smov 122   ;;  %v94_v22 = vsel %vm28_vm6, %v1020_v19, %v1019_v18  ;;  %v1023_v24 = vld [vmem:[%s1868_s0 + $0x7f] sm:$0x1]  }
   0x8   :  { %26 = vrot.lane.b32.xlu0 %v25_v8, %s1296_s3  ;;  %53 = vrot.lane.b32.xlu1 %v52_v11, %s1297_s4  ;;  %v108_v23 = vsel %vm14_vm7, %v1022_v21, %v1021_v20  ;;  %s1300_s15 = smov 121   ;;  %s1301_s16 = smov 120   ;;  %v1024_v25 = vld [vmem:[%s1868_s0 + $0x46] sm:$0x1]   ;;  %v1025_v26 = vld [vmem:[%s1868_s0 + $0xd] sm:$0x1]  }
   0x9   :  { %s1302_s21 = smov 119   ;;  %s1303_s22 = smov 118   ;;  %v1026_v27 = vld [vmem:[%s1868_s0 + $0x54] sm:$0x1]   ;;  %v1027_v28 = vld [vmem:[%s1868_s0 + $0x1b] sm:$0x1]  }
   0xa   :  { %s1304_s27 = smov 117   ;;  %s1305_s28 = smov 116   ;;  %v1028_v29 = vld [vmem:[%s1868_s0 + $0x62] sm:$0x1]   ;;  %v1029_v30 = vld [vmem:[%s1868_s0 + $0x29] sm:$0x1]  }
   0xb   :  { %s1306_s4 = smov 115   ;;  %s1307_s5 = smov 114   ;;  %v1030_v31 = vld [vmem:[%s1868_s0 + $0x70] sm:$0x1]   ;;  %v1031_v32 = vld [vmem:[%s1868_s0 + $0x37] sm:$0x1]  }
   0xc   :  { %67 = vrot.lane.b32.xlu0 %v66_v16, %s1298_s13  ;;  %81 = vrot.lane.b32.xlu1 %v80_v17, %s1299_s14  ;;  %s1308_s10 = smov 113   ;;  %s1309_s11 = smov 112   ;;  %v1032_v33 = vld [vmem:[%s1868_s0 + $0x7e] sm:$0x1]   ;;  %v3_v34 = vld [vmem:[%s1868_s0] sm:$0x1]  }
   0xd   :  { %vm4_vm8 = vcmask 72704   ;;  %s1311_s19 = smov 110   ;;  %v1033_v35 = vld [vmem:[%s1868_s0 + $0x45] sm:$0x1]   ;;  %v1034_v36 = vld [vmem:[%s1868_s0 + $0xc] sm:$0x1]  }
   0xe   :  { %5 = vst.msk [vmem:[#allocation2] sm:$0x1] %vm4_vm8, %v3_v34   ;;  %s1312_s24 = smov 109   ;;  %s1313_s25 = smov 108   ;;  %v1035_v37 = vld [vmem:[%s1868_s0 + $0x53] sm:$0x1]  }
   0xf   :  { %v1036_v38 = vld [vmem:[%s1868_s0 + $0x1a] sm:$0x1]   ;;  %s1314_s30 = smov 107   ;;  %s1315_s2 = smov 106   ;;  %v1037_v39 = vld [vmem:[%s1868_s0 + $0x61] sm:$0x1]  }
  0x10   :  { %95 = vrot.lane.b32.xlu0 %v94_v22, %s1300_s15  ;;  %109 = vrot.lane.b32.xlu1 %v108_v23, %s1301_s16  ;;  %s1310_s16 = smov 111   ;;  %v1038_v40 = vld [vmem:[%s1868_s0 + $0x28] sm:$0x1]   ;;  %s1316_s7 = smov 105   ;;  %v1039_v41 = vld [vmem:[%s1868_s0 + $0x6f] sm:$0x1]  }
  0x11   :  { %s1317_s8 = smov 104   ;;  %v1040_v42 = vld [vmem:[%s1868_s0 + $0x36] sm:$0x1]   ;;  %s1318_s13 = smov 103   ;;  %v1041_v43 = vld [vmem:[%s1868_s0 + $0x7d] sm:$0x1]  }
  0x12   :  { %s1319_s14 = smov 102   ;;  %v1042_v44 = vld [vmem:[%s1868_s0 + $0x44] sm:$0x1]   ;;  %s1321_s20 = smov 100   ;;  %v1043_v45 = vld [vmem:[%s1868_s0 + $0xb] sm:$0x1]  }
  0x13   :  { %v1044_v46 = vld [vmem:[%s1868_s0 + $0x52] sm:$0x1]  }
  0x14   :  { %119 = vrot.lane.b32.xlu0 %v1023_v24, %s1302_s21  ;;  %126 = vrot.lane.b32.xlu1 %v1024_v25, %s1303_s22 }
  0x18   :  { %133 = vrot.lane.b32.xlu0 %v1025_v26, %s1304_s27  ;;  %139 = vrot.lane.b32.xlu1 %v1026_v27, %s1305_s28 }
  0x1c   :  { %146 = vrot.lane.b32.xlu0 %v1027_v28, %s1306_s4  ;;  %153 = vrot.lane.b32.xlu1 %v1028_v29, %s1307_s5 }
  0x20   :  { %160 = vrot.lane.b32.xlu0 %v1029_v30, %s1308_s10  ;;  %167 = vrot.lane.b32.xlu1 %v1030_v31, %s1309_s11 }
  0x24   :  { %174 = vrot.lane.b32.xlu0 %v1031_v32, %s1310_s16  ;;  %181 = vrot.lane.b32.xlu1 %v1032_v33, %s1311_s19  ;;  %s1320_s19 = smov 101  }
  0x28   :  { %188 = vrot.lane.b32.xlu0 %v1033_v35, %s1312_s24  ;;  %195 = vrot.lane.b32.xlu1 %v1034_v36, %s1313_s25 }
  0x2c   :  { %201 = vrot.lane.b32.xlu0 %v1035_v37, %s1314_s30  ;;  %208 = vrot.lane.b32.xlu1 %v1036_v38, %s1315_s2 }
  0x30   :  { %215 = vrot.lane.b32.xlu0 %v1037_v39, %s1316_s7  ;;  %222 = vrot.lane.b32.xlu1 %v1038_v40, %s1317_s8 }
  0x34   :  { %229 = vrot.lane.b32.xlu0 %v1039_v41, %s1318_s13  ;;  %236 = vrot.lane.b32.xlu1 %v1040_v42, %s1319_s14 }
  0x38   :  { %243 = vrot.lane.b32.xlu0 %v1041_v43, %s1320_s19  ;;  %250 = vrot.lane.b32.xlu1 %v1042_v44, %s1321_s20 }
  0x39   :  { %2 = vsyncpa [#allocation1], 0  ;;  %s1322_s25 = smov 99   ;;  %s1323_s26 = smov 98   ;;  %v1045_v47 = vld [vmem:[%s1868_s0 + $0x19] sm:$0x1]  }
  0x3a   :  { %v1046_v48 = vld [vmem:[%s1868_s0 + $0x60] sm:$0x1]   ;;  %s1324_s2 = smov 97   ;;  %s1325_s3 = smov 96   ;;  %v1047_v49 = vld [vmem:[%s1868_s0 + $0x27] sm:$0x1]  }
  0x3b   :  { %v1048_v50 = vld [vmem:[%s1868_s0 + $0x6e] sm:$0x1]   ;;  %s1326_s8 = smov 95   ;;  %s1327_s9 = smov 94   ;;  %v1049_v51 = vld [vmem:[%s1868_s0 + $0x35] sm:$0x1]  }
  0x3c   :  { %257 = vrot.lane.b32.xlu0 %v1043_v45, %s1322_s25  ;;  %263 = vrot.lane.b32.xlu1 %v1044_v46, %s1323_s26  ;;  %v1050_v52 = vld [vmem:[%s1868_s0 + $0x7c] sm:$0x1]   ;;  %s1328_s14 = smov 93   ;;  %s1329_s15 = smov 92   ;;  %v1051_v53 = vld [vmem:[%s1868_s0 + $0x43] sm:$0x1]  }
  0x3d   :  { %v1052_v54 = vld [vmem:[%s1868_s0 + $0xa] sm:$0x1]   ;;  %s1330_s20 = smov 91   ;;  %s1331_s21 = smov 90   ;;  %v1053_v55 = vld [vmem:[%s1868_s0 + $0x51] sm:$0x1]  }
  0x3e   :  { %v1054_v56 = vld [vmem:[%s1868_s0 + $0x18] sm:$0x1]   ;;  %s1332_s26 = smov 89   ;;  %s1333_s27 = smov 88   ;;  %v1055_v57 = vld [vmem:[%s1868_s0 + $0x5f] sm:$0x1]  }
  0x3f   :  { %v1056_v58 = vld [vmem:[%s1868_s0 + $0x26] sm:$0x1]   ;;  %s1335_s4 = smov 86   ;;  %v1057_v59 = vld [vmem:[%s1868_s0 + $0x6d] sm:$0x1]   ;;  %s1337_s10 = smov 84  }
  0x40   :  { %270 = vrot.lane.b32.xlu0 %v1045_v47, %s1324_s2  ;;  %277 = vrot.lane.b32.xlu1 %v1046_v48, %s1325_s3  ;;  %s1334_s3 = smov 87   ;;  %v1058_v60 = vld [vmem:[%s1868_s0 + $0x34] sm:$0x1]   ;;  %v1059_v61 = vld [vmem:[%s1868_s0 + $0x7b] sm:$0x1]   ;;  %s1339_s16 = smov 82  }
  0x41   :  { %v1060_v62 = vld [vmem:[%s1868_s0 + $0x42] sm:$0x1]   ;;  %v1061_v63 = vld [vmem:[%s1868_s0 + $0x9] sm:$0x1]   ;;  %v1062_v0 = vld [vmem:[%s1868_s0 + $0x50] sm:$0x1]  }
  0x42   :  { %s1341_s22 = smov 80   ;;  %v1063_v1 = vld [vmem:[%s1868_s0 + $0x17] sm:$0x1]   ;;  %v1064_v2 = vld [vmem:[%s1868_s0 + $0x5e] sm:$0x1]   ;;  %s1343_s28 = smov 78  }
  0x43   :  { %v1065_v3 = vld [vmem:[%s1868_s0 + $0x25] sm:$0x1]   ;;  %v1066_v4 = vld [vmem:[%s1868_s0 + $0x6c] sm:$0x1]   ;;  %s1345_s5 = smov 76   ;;  %s1347_s11 = smov 74  }
  0x44   :  { %284 = vrot.lane.b32.xlu0 %v1047_v49, %s1326_s8  ;;  %291 = vrot.lane.b32.xlu1 %v1048_v50, %s1327_s9  ;;  %s1336_s9 = smov 85   ;;  %v1067_v5 = vld [vmem:[%s1868_s0 + $0x33] sm:$0x1]   ;;  %v1068_v6 = vld [vmem:[%s1868_s0 + $0x7a] sm:$0x1]   ;;  %s1349_s17 = smov 72  }
  0x45   :  { %v1069_v7 = vld [vmem:[%s1868_s0 + $0x41] sm:$0x1]   ;;  %v1070_v8 = vld [vmem:[%s1868_s0 + $0x8] sm:$0x1]   ;;  %v1071_v9 = vld [vmem:[%s1868_s0 + $0x4f] sm:$0x1]  }
  0x46   :  { %v1072_v10 = vld [vmem:[%s1868_s0 + $0x16] sm:$0x1]   ;;  %vm17_vm9 = vcmask 1048568   ;;  %s1351_s23 = smov 70   ;;  %v1073_v11 = vld [vmem:[%s1868_s0 + $0x5d] sm:$0x1]  }
  0x47   :  { %vm44_vm10 = vcmask 1048552   ;;  %v1074_v13 = vld [vmem:[%s1868_s0 + $0x24] sm:$0x1]   ;;  %vm31_vm11 = vcmask 1048560   ;;  %s1353_s29 = smov 68   ;;  %vm58_vm12 = vcmask 1048544  }
  0x48   :  { %298 = vrot.lane.b32.xlu0 %v1049_v51, %s1328_s14  ;;  %305 = vrot.lane.b32.xlu1 %v1050_v52, %s1329_s15  ;;  %s1338_s15 = smov 83   ;;  %v1075_v15 = vld [vmem:[%s1868_s0 + $0x6b] sm:$0x1]   ;;  %v1076_v17 = vld [vmem:[%s1868_s0 + $0x32] sm:$0x1]   ;;  %vm72_vm13 = vcmask 1048536  }
  0x49   :  { %s1355_s6 = smov 66   ;;  %v1077_v19 = vld [vmem:[%s1868_s0 + $0x79] sm:$0x1]   ;;  %vm86_vm14 = vcmask 1048528   ;;  %v1078_v21 = vld [vmem:[%s1868_s0 + $0x40] sm:$0x1]  }
  0x4a   :  { %vm100_vm15 = vcmask 1048520   ;;  %s1357_s12 = smov 64   ;;  %v1079_v23 = vld [vmem:[%s1868_s0 + $0x7] sm:$0x1]   ;;  %v1080_v25 = vld [vmem:[%s1868_s0 + $0x4e] sm:$0x1]  }
  0x4b   :  { %s1359_s18 = smov 62   ;;  %v1081_v27 = vld [vmem:[%s1868_s0 + $0x15] sm:$0x1]   ;;  %v1082_v29 = vld [vmem:[%s1868_s0 + $0x5c] sm:$0x1]   ;;  %s1361_s24 = smov 60  }
  0x4c   :  { %312 = vrot.lane.b32.xlu0 %v1051_v53, %s1330_s20  ;;  %319 = vrot.lane.b32.xlu1 %v1052_v54, %s1331_s21  ;;  %s1340_s21 = smov 81   ;;  %v1083_v31 = vld [vmem:[%s1868_s0 + $0x23] sm:$0x1]   ;;  %v1084_v33 = vld [vmem:[%s1868_s0 + $0x6a] sm:$0x1]   ;;  %s1363_s30 = smov 58  }
  0x4d   :  { %v1085_v35 = vld [vmem:[%s1868_s0 + $0x31] sm:$0x1]   ;;  %v1086_v37 = vld [vmem:[%s1868_s0 + $0x78] sm:$0x1]   ;;  %s1365_s7 = smov 56   ;;  %vm169_vm8 = vcmask 991104  }
  0x4e   :  { %v1087_v39 = vld [vmem:[%s1868_s0 + $0x3f] sm:$0x1]   ;;  %v1088_v41 = vld [vmem:[%s1868_s0 + $0x6] sm:$0x1]   ;;  %s1367_s13 = smov 54   ;;  %s1369_s19 = smov 52  }
  0x4f   :  { %v1089_v43 = vld [vmem:[%s1868_s0 + $0x4d] sm:$0x1]   ;;  %v1090_v45 = vld [vmem:[%s1868_s0 + $0x14] sm:$0x1]   ;;  %v1091_v47 = vld [vmem:[%s1868_s0 + $0x5b] sm:$0x1]  }
  0x50   :  { %325 = vrot.lane.b32.xlu0 %v1053_v55, %s1332_s26  ;;  %332 = vrot.lane.b32.xlu1 %v1054_v56, %s1333_s27  ;;  %s1342_s27 = smov 79   ;;  %v1092_v49 = vld [vmem:[%s1868_s0 + $0x22] sm:$0x1]   ;;  %s1371_s25 = smov 50   ;;  %v1093_v51 = vld [vmem:[%s1868_s0 + $0x69] sm:$0x1]  }
  0x51   :  { %v1094_v53 = vld [vmem:[%s1868_s0 + $0x30] sm:$0x1]   ;;  %s1373_s2 = smov 48   ;;  %v1095_v55 = vld [vmem:[%s1868_s0 + $0x77] sm:$0x1]   ;;  %s1375_s8 = smov 46  }
  0x52   :  { %s1377_s14 = smov 44   ;;  %s1379_s20 = smov 42  }
  0x53   :  { %s1381_s26 = smov 40  }
  0x54   :  { %339 = vrot.lane.b32.xlu0 %v1055_v57, %s1334_s3  ;;  %346 = vrot.lane.b32.xlu1 %v1056_v58, %s1335_s4  ;;  %s1344_s4 = smov 77   ;;  %v1096_v57 = vld [vmem:[%s1868_s0 + $0x3e] sm:$0x1]   ;;  %s1383_s3 = smov 38  }
  0x58   :  { %353 = vrot.lane.b32.xlu0 %v1057_v59, %s1336_s9  ;;  %360 = vrot.lane.b32.xlu1 %v1058_v60, %s1337_s10  ;;  %s1346_s10 = smov 75   ;;  %v1097_v59 = vld [vmem:[%s1868_s0 + $0x5] sm:$0x1]   ;;  %s1385_s9 = smov 36  }
  0x5c   :  { %367 = vrot.lane.b32.xlu0 %v1059_v61, %s1338_s15  ;;  %374 = vrot.lane.b32.xlu1 %v1060_v62, %s1339_s16  ;;  %s1348_s16 = smov 73   ;;  %v1098_v61 = vld [vmem:[%s1868_s0 + $0x4c] sm:$0x1]   ;;  %s1387_s15 = smov 34  }
  0x60   :  { %381 = vrot.lane.b32.xlu0 %v1061_v63, %s1340_s21  ;;  %387 = vrot.lane.b32.xlu1 %v1062_v0, %s1341_s22  ;;  %s1350_s22 = smov 71   ;;  %v1099_v63 = vld [vmem:[%s1868_s0 + $0x13] sm:$0x1]   ;;  %s1389_s21 = smov 32  }
  0x64   :  { %394 = vrot.lane.b32.xlu0 %v1063_v1, %s1342_s27  ;;  %401 = vrot.lane.b32.xlu1 %v1064_v2, %s1343_s28  ;;  %s1352_s28 = smov 69   ;;  %v1100_v1 = vld [vmem:[%s1868_s0 + $0x5a] sm:$0x1]   ;;  %s1391_s27 = smov 30  }
  0x68   :  { %408 = vrot.lane.b32.xlu0 %v1065_v3, %s1344_s4  ;;  %415 = vrot.lane.b32.xlu1 %v1066_v4, %s1345_s5  ;;  %s1354_s5 = smov 67   ;;  %v1101_v3 = vld [vmem:[%s1868_s0 + $0x21] sm:$0x1]   ;;  %s1393_s4 = smov 28  }
  0x6c   :  { %422 = vrot.lane.b32.xlu0 %v1067_v5, %s1346_s10  ;;  %429 = vrot.lane.b32.xlu1 %v1068_v6, %s1347_s11  ;;  %s1356_s11 = smov 65   ;;  %v1102_v5 = vld [vmem:[%s1868_s0 + $0x68] sm:$0x1]   ;;  %s1395_s10 = smov 26  }
  0x70   :  { %436 = vrot.lane.b32.xlu0 %v1069_v7, %s1348_s16  ;;  %443 = vrot.lane.b32.xlu1 %v1070_v8, %s1349_s17  ;;  %s1358_s17 = smov 63   ;;  %v1103_v7 = vld [vmem:[%s1868_s0 + $0x2f] sm:$0x1]   ;;  %s1397_s16 = smov 24  }
  0x74   :  { %449 = vrot.lane.b32.xlu0 %v1071_v9, %s1350_s22  ;;  %456 = vrot.lane.b32.xlu1 %v1072_v10, %s1351_s23  ;;  %s1360_s23 = smov 61   ;;  %v1104_v9 = vld [vmem:[%s1868_s0 + $0x76] sm:$0x1]   ;;  %s1399_s22 = smov 22  }
  0x76   :  { %v13_v12 = vpop.permute.xlu0 %12   ;;  %v40_v14 = vpop.permute.xlu1 %39  }
  0x77   :  { %16 = vst.msk [vmem:[#allocation2 + $0x28] sm:$0x1] %vm14_vm7, %v13_v12   ;;  %vm162_vm7 = vcmask 999304  }
  0x78   :  { %19 = vst.msk [vmem:[#allocation2 + $0x20] sm:$0x1] %vm17_vm9, %v13_v12   ;;  %463 = vrot.lane.b32.xlu0 %v1073_v11, %s1352_s28  ;;  %470 = vrot.lane.b32.xlu1 %v1074_v13, %s1353_s29  ;;  %s1362_s29 = smov 59   ;;  %vm176_vm9 = vcmask 982904   ;;  %v1105_v11 = vld [vmem:[%s1868_s0 + $0x3d] sm:$0x1]  }
  0x79   :  { %43 = vst.msk [vmem:[#allocation2 + $0x30] sm:$0x1] %vm41_vm5, %v40_v14   ;;  %vm148_vm5 = vcmask 1015704   ;;  %v1106_v13 = vld [vmem:[%s1868_s0 + $0x4] sm:$0x1]   ;;  %s1401_s28 = smov 20  }
  0x7a   :  { %46 = vst.msk [vmem:[#allocation2 + $0x28] sm:$0x1] %vm44_vm10, %v40_v14   ;;  %v27_v16 = vpop.permute.xlu0 %26   ;;  %v54_v18 = vpop.permute.xlu1 %53   ;;  %vm183_vm10 = vcmask 974704  }
  0x7b   :  { %30 = vst.msk [vmem:[#allocation2 + $0x8] sm:$0x1] %vm28_vm6, %v27_v16   ;;  %vm155_vm6 = vcmask 1007504  }
  0x7c   :  { %32 = vst.msk [vmem:[#allocation2] sm:$0x1] %vm31_vm11, %v27_v16   ;;  %477 = vrot.lane.b32.xlu0 %v1075_v15, %s1354_s5  ;;  %484 = vrot.lane.b32.xlu1 %v1076_v17, %s1355_s6  ;;  %s1364_s6 = smov 57   ;;  %vm190_vm11 = vcmask 966504   ;;  %v1107_v15 = vld [vmem:[%s1868_s0 + $0x4b] sm:$0x1]  }
  0x7d   :  { %57 = vst.msk [vmem:[#allocation2 + $0x10] sm:$0x1] %vm55_vm4, %v54_v18   ;;  %vm141_vm4 = vcmask 1023904   ;;  %v1108_v17 = vld [vmem:[%s1868_s0 + $0x12] sm:$0x1]   ;;  %s1403_s5 = smov 18  }
  0x7e   :  { %60 = vst.msk [vmem:[#allocation2 + $0x8] sm:$0x1] %vm58_vm12, %v54_v18   ;;  %v68_v20 = vpop.permute.xlu0 %67   ;;  %v82_v22 = vpop.permute.xlu1 %81   ;;  %vm197_vm12 = vcmask 958304  }
  0x7f   :  { %71 = vst.msk [vmem:[#allocation2 + $0x38] sm:$0x1] %vm51_vm3, %v68_v20   ;;  %vm135_vm3 = vcmask 1032104  }
  0x80   :  { %74 = vst.msk [vmem:[#allocation2 + $0x30] sm:$0x1] %vm72_vm13, %v68_v20   ;;  %491 = vrot.lane.b32.xlu0 %v1077_v19, %s1356_s11  ;;  %498 = vrot.lane.b32.xlu1 %v1078_v21, %s1357_s12  ;;  %s1366_s12 = smov 55   ;;  %vm203_vm13 = vcmask 950104   ;;  %v1109_v19 = vld [vmem:[%s1868_s0 + $0x59] sm:$0x1]  }
  0x81   :  { %85 = vst.msk [vmem:[#allocation2 + $0x18] sm:$0x1] %vm37_vm1, %v82_v22   ;;  %vm114_vm1 = vcmask 1048512   ;;  %v1110_v21 = vld [vmem:[%s1868_s0 + $0x20] sm:$0x1]   ;;  %s1405_s11 = smov 16  }
  0x82   :  { %88 = vst.msk [vmem:[#allocation2 + $0x10] sm:$0x1] %vm86_vm14, %v82_v22   ;;  %v96_v24 = vpop.permute.xlu0 %95   ;;  %v110_v26 = vpop.permute.xlu1 %109   ;;  %vm210_vm14 = vcmask 941904  }
  0x83   :  { %99 = vst.msk [vmem:[#allocation2 + $0x40] sm:$0x1] %vm24_vm2, %v96_v24   ;;  %vm128_vm2 = vcmask 1040304  }
  0x84   :  { %102 = vst.msk [vmem:[#allocation2 + $0x38] sm:$0x1] %vm100_vm15, %v96_v24   ;;  %505 = vrot.lane.b32.xlu0 %v1079_v23, %s1358_s17  ;;  %511 = vrot.lane.b32.xlu1 %v1080_v25, %s1359_s18  ;;  %s1368_s18 = smov 53   ;;  %vm217_vm15 = vcmask 933704   ;;  %v1111_v23 = vld [vmem:[%s1868_s0 + $0x67] sm:$0x1]  }
  0x85   :  { %113 = vst.msk [vmem:[#allocation2 + $0x20] sm:$0x1] %vm10_vm0, %v110_v26   ;;  %vm121_vm0 = vcmask 1048504   ;;  %v1112_v25 = vld [vmem:[%s1868_s0 + $0x2e] sm:$0x1]   ;;  %s1407_s17 = smov 14  }
  0x86   :  { %116 = vst.msk [vmem:[#allocation2 + $0x18] sm:$0x1] %vm114_vm1, %v110_v26   ;;  %v120_v28 = vpop.permute.xlu0 %119   ;;  %v127_v30 = vpop.permute.xlu1 %126   ;;  %vm224_vm1 = vcmask 925504  }
  0x87   :  { %123 = vst.msk [vmem:[#allocation2 + $0x40] sm:$0x1] %vm121_vm0, %v120_v28   ;;  %vm231_vm0 = vcmask 917304  }
  0x88   :  { %518 = vrot.lane.b32.xlu0 %v1081_v27, %s1360_s23  ;;  %130 = vst.msk [vmem:[#allocation2 + $0x20] sm:$0x1] %vm128_vm2, %v127_v30   ;;  %525 = vrot.lane.b32.xlu1 %v1082_v29, %s1361_s24  ;;  %s1370_s24 = smov 51   ;;  %vm238_vm2 = vcmask 909104   ;;  %v1113_v27 = vld [vmem:[%s1868_s0 + $0x75] sm:$0x1]  }
  0x89   :  { %v1114_v29 = vld [vmem:[%s1868_s0 + $0x3c] sm:$0x1]   ;;  %s1409_s23 = smov 12  }
  0x8a   :  { %v134_v32 = vpop.permute.xlu0 %133   ;;  %v140_v34 = vpop.permute.xlu1 %139  }
  0x8b   :  { %136 = vst.msk [vmem:[#allocation2] sm:$0x1] %vm135_vm3, %v134_v32   ;;  %vm245_vm3 = vcmask 900904  }
  0x8c   :  { %532 = vrot.lane.b32.xlu0 %v1083_v31, %s1362_s29  ;;  %143 = vst.msk [vmem:[#allocation2 + $0x28] sm:$0x1] %vm141_vm4, %v140_v34   ;;  %539 = vrot.lane.b32.xlu1 %v1084_v33, %s1363_s30  ;;  %s1372_s30 = smov 49   ;;  %vm252_vm4 = vcmask 892704   ;;  %v1115_v31 = vld [vmem:[%s1868_s0 + $0x3] sm:$0x1]  }
  0x8d   :  { %v1116_v33 = vld [vmem:[%s1868_s0 + $0x4a] sm:$0x1]   ;;  %s1411_s29 = smov 10  }
  0x8e   :  { %v147_v36 = vpop.permute.xlu0 %146   ;;  %v154_v38 = vpop.permute.xlu1 %153  }
  0x8f   :  { %150 = vst.msk [vmem:[#allocation2 + $0x8] sm:$0x1] %vm148_vm5, %v147_v36   ;;  %vm259_vm5 = vcmask 884504  }
  0x90   :  { %546 = vrot.lane.b32.xlu0 %v1085_v35, %s1364_s6  ;;  %157 = vst.msk [vmem:[#allocation2 + $0x30] sm:$0x1] %vm155_vm6, %v154_v38   ;;  %553 = vrot.lane.b32.xlu1 %v1086_v37, %s1365_s7  ;;  %s1374_s7 = smov 47   ;;  %vm265_vm6 = vcmask 876304   ;;  %v1117_v35 = vld [vmem:[%s1868_s0 + $0x11] sm:$0x1]  }
  0x91   :  { %v1118_v37 = vld [vmem:[%s1868_s0 + $0x58] sm:$0x1]   ;;  %s1413_s6 = smov 8  }
  0x92   :  { %v161_v40 = vpop.permute.xlu0 %160   ;;  %v168_v42 = vpop.permute.xlu1 %167  }
  0x93   :  { %164 = vst.msk [vmem:[#allocation2 + $0x10] sm:$0x1] %vm162_vm7, %v161_v40   ;;  %vm272_vm7 = vcmask 868104  }
  0x94   :  { %560 = vrot.lane.b32.xlu0 %v1087_v39, %s1366_s12  ;;  %171 = vst.msk [vmem:[#allocation2 + $0x38] sm:$0x1] %vm169_vm8, %v168_v42   ;;  %567 = vrot.lane.b32.xlu1 %v1088_v41, %s1367_s13  ;;  %s1376_s13 = smov 45   ;;  %vm279_vm8 = vcmask 859904   ;;  %v1119_v39 = vld [vmem:[%s1868_s0 + $0x1f] sm:$0x1]  }
  0x95   :  { %v1120_v41 = vld [vmem:[%s1868_s0 + $0x66] sm:$0x1]   ;;  %s1415_s12 = smov 6  }
  0x96   :  { %v175_v44 = vpop.permute.xlu0 %174   ;;  %v182_v46 = vpop.permute.xlu1 %181  }
  0x97   :  { %178 = vst.msk [vmem:[#allocation2 + $0x18] sm:$0x1] %vm176_vm9, %v175_v44   ;;  %vm286_vm9 = vcmask 851704  }
  0x98   :  { %573 = vrot.lane.b32.xlu0 %v1089_v43, %s1368_s18  ;;  %185 = vst.msk [vmem:[#allocation2 + $0x40] sm:$0x1] %vm183_vm10, %v182_v46   ;;  %580 = vrot.lane.b32.xlu1 %v1090_v45, %s1369_s19  ;;  %s1378_s19 = smov 43   ;;  %vm293_vm10 = vcmask 843504   ;;  %v1121_v43 = vld [vmem:[%s1868_s0 + $0x2d] sm:$0x1]  }
  0x99   :  { %v1122_v45 = vld [vmem:[%s1868_s0 + $0x74] sm:$0x1]   ;;  %s1417_s18 = smov 4  }
  0x9a   :  { %v189_v48 = vpop.permute.xlu0 %188   ;;  %v196_v50 = vpop.permute.xlu1 %195  }
  0x9b   :  { %192 = vst.msk [vmem:[#allocation2 + $0x20] sm:$0x1] %vm190_vm11, %v189_v48   ;;  %vm300_vm11 = vcmask 835304  }
  0x9c   :  { %587 = vrot.lane.b32.xlu0 %v1091_v47, %s1370_s24  ;;  %198 = vst.msk [vmem:[#allocation2] sm:$0x1] %vm197_vm12, %v196_v50   ;;  %594 = vrot.lane.b32.xlu1 %v1092_v49, %s1371_s25  ;;  %s1380_s25 = smov 41   ;;  %vm307_vm12 = vcmask 827104   ;;  %v1123_v47 = vld [vmem:[%s1868_s0 + $0x3b] sm:$0x1]  }
  0x9d   :  { %v1124_v49 = vld [vmem:[%s1868_s0 + $0x2] sm:$0x1]   ;;  %s1419_s24 = smov 2  }
  0x9e   :  { %v202_v52 = vpop.permute.xlu0 %201   ;;  %v209_v54 = vpop.permute.xlu1 %208  }
  0x9f   :  { %205 = vst.msk [vmem:[#allocation2 + $0x28] sm:$0x1] %vm203_vm13, %v202_v52   ;;  %vm314_vm13 = vcmask 818904  }
  0xa0   :  { %601 = vrot.lane.b32.xlu0 %v1093_v51, %s1372_s30  ;;  %212 = vst.msk [vmem:[#allocation2 + $0x8] sm:$0x1] %vm210_vm14, %v209_v54   ;;  %608 = vrot.lane.b32.xlu1 %v1094_v53, %s1373_s2  ;;  %s1382_s2 = smov 39   ;;  %vm321_vm14 = vcmask 810704   ;;  %v1125_v51 = vld [vmem:[%s1868_s0 + $0x49] sm:$0x1]  }
  0xa1   :  { %v1126_v53 = vld [vmem:[%s1868_s0 + $0x10] sm:$0x1]  }
  0xa2   :  { %v216_v56 = vpop.permute.xlu0 %215   ;;  %v223_v58 = vpop.permute.xlu1 %222  }
  0xa3   :  { %219 = vst.msk [vmem:[#allocation2 + $0x30] sm:$0x1] %vm217_vm15, %v216_v56   ;;  %vm327_vm15 = vcmask 802504  }
  0xa4   :  { %615 = vrot.lane.b32.xlu0 %v1095_v55, %s1374_s7  ;;  %226 = vst.msk [vmem:[#allocation2 + $0x10] sm:$0x1] %vm224_vm1, %v223_v58   ;;  %622 = vrot.lane.b32.xlu1 %v1096_v57, %s1375_s8  ;;  %s1384_s8 = smov 37   ;;  %vm334_vm1 = vcmask 794304   ;;  %v1127_v55 = vld [vmem:[%s1868_s0 + $0x57] sm:$0x1]  }
  0xa5   :  { %v1128_v57 = vld [vmem:[%s1868_s0 + $0x1e] sm:$0x1]  }
  0xa6   :  { %v230_v60 = vpop.permute.xlu0 %229   ;;  %v237_v62 = vpop.permute.xlu1 %236  }
  0xa7   :  { %233 = vst.msk [vmem:[#allocation2 + $0x38] sm:$0x1] %vm231_vm0, %v230_v60   ;;  %vm341_vm0 = vcmask 786104  }
  0xa8   :  { %629 = vrot.lane.b32.xlu0 %v1097_v59, %s1376_s13  ;;  %240 = vst.msk [vmem:[#allocation2 + $0x18] sm:$0x1] %vm238_vm2, %v237_v62   ;;  %635 = vrot.lane.b32.xlu1 %v1098_v61, %s1377_s14  ;;  %s1386_s14 = smov 35   ;;  %vm348_vm2 = vcmask 777904   ;;  %v1129_v59 = vld [vmem:[%s1868_s0 + $0x65] sm:$0x1]  }
  0xa9   :  { %v1130_v61 = vld [vmem:[%s1868_s0 + $0x2c] sm:$0x1]  }
  0xaa   :  { %v244_v0 = vpop.permute.xlu0 %243   ;;  %v251_v2 = vpop.permute.xlu1 %250  }
  0xab   :  { %247 = vst.msk [vmem:[#allocation2 + $0x40] sm:$0x1] %vm245_vm3, %v244_v0   ;;  %vm355_vm3 = vcmask 769704  }
  0xac   :  { %642 = vrot.lane.b32.xlu0 %v1099_v63, %s1378_s19  ;;  %254 = vst.msk [vmem:[#allocation2 + $0x20] sm:$0x1] %vm252_vm4, %v251_v2   ;;  %649 = vrot.lane.b32.xlu1 %v1100_v1, %s1379_s20  ;;  %s1388_s20 = smov 33   ;;  %vm362_vm4 = vcmask 761504   ;;  %v1131_v63 = vld [vmem:[%s1868_s0 + $0x73] sm:$0x1]  }
  0xad   :  { %v1132_v1 = vld [vmem:[%s1868_s0 + $0x3a] sm:$0x1]  }
  0xae   :  { %v258_v4 = vpop.permute.xlu0 %257   ;;  %v264_v6 = vpop.permute.xlu1 %263  }
  0xaf   :  { %260 = vst.msk [vmem:[#allocation2] sm:$0x1] %vm259_vm5, %v258_v4   ;;  %vm369_vm5 = vcmask 753304  }
  0xb0   :  { %656 = vrot.lane.b32.xlu0 %v1101_v3, %s1380_s25  ;;  %267 = vst.msk [vmem:[#allocation2 + $0x28] sm:$0x1] %vm265_vm6, %v264_v6   ;;  %663 = vrot.lane.b32.xlu1 %v1102_v5, %s1381_s26  ;;  %s1390_s26 = smov 31   ;;  %vm376_vm6 = vcmask 745104   ;;  %v1133_v3 = vld [vmem:[%s1868_s0 + $0x1] sm:$0x1]  }
  0xb1   :  { %v1134_v5 = vld [vmem:[%s1868_s0 + $0x48] sm:$0x1]  }
  0xb2   :  { %v271_v8 = vpop.permute.xlu0 %270   ;;  %v278_v10 = vpop.permute.xlu1 %277  }
  0xb3   :  { %274 = vst.msk [vmem:[#allocation2 + $0x8] sm:$0x1] %vm272_vm7, %v271_v8   ;;  %vm383_vm7 = vcmask 736904  }
  0xb4   :  { %670 = vrot.lane.b32.xlu0 %v1103_v7, %s1382_s2  ;;  %281 = vst.msk [vmem:[#allocation2 + $0x30] sm:$0x1] %vm279_vm8, %v278_v10   ;;  %677 = vrot.lane.b32.xlu1 %v1104_v9, %s1383_s3  ;;  %s1392_s3 = smov 29   ;;  %vm389_vm8 = vcmask 728704   ;;  %v1135_v7 = vld [vmem:[%s1868_s0 + $0xf] sm:$0x1]  }
  0xb5   :  { %v1136_v9 = vld [vmem:[%s1868_s0 + $0x56] sm:$0x1]  }
  0xb6   :  { %v285_v12 = vpop.permute.xlu0 %284   ;;  %v292_v14 = vpop.permute.xlu1 %291  }
  0xb7   :  { %288 = vst.msk [vmem:[#allocation2 + $0x10] sm:$0x1] %vm286_vm9, %v285_v12   ;;  %vm396_vm9 = vcmask 720504  }
  0xb8   :  { %684 = vrot.lane.b32.xlu0 %v1105_v11, %s1384_s8  ;;  %295 = vst.msk [vmem:[#allocation2 + $0x38] sm:$0x1] %vm293_vm10, %v292_v14   ;;  %691 = vrot.lane.b32.xlu1 %v1106_v13, %s1385_s9  ;;  %s1394_s9 = smov 27   ;;  %vm403_vm10 = vcmask 712304   ;;  %v1137_v11 = vld [vmem:[%s1868_s0 + $0x1d] sm:$0x1]  }
  0xb9   :  { %v1138_v13 = vld [vmem:[%s1868_s0 + $0x64] sm:$0x1]  }
  0xba   :  { %v299_v16 = vpop.permute.xlu0 %298   ;;  %v306_v18 = vpop.permute.xlu1 %305  }
  0xbb   :  { %302 = vst.msk [vmem:[#allocation2 + $0x18] sm:$0x1] %vm300_vm11, %v299_v16   ;;  %vm410_vm11 = vcmask 704104  }
  0xbc   :  { %697 = vrot.lane.b32.xlu0 %v1107_v15, %s1386_s14  ;;  %309 = vst.msk [vmem:[#allocation2 + $0x40] sm:$0x1] %vm307_vm12, %v306_v18   ;;  %704 = vrot.lane.b32.xlu1 %v1108_v17, %s1387_s15  ;;  %s1396_s15 = smov 25   ;;  %vm417_vm12 = vcmask 695904   ;;  %v1139_v15 = vld [vmem:[%s1868_s0 + $0x2b] sm:$0x1]  }
  0xbd   :  { %v1140_v17 = vld [vmem:[%s1868_s0 + $0x72] sm:$0x1]  }
  0xbe   :  { %v313_v20 = vpop.permute.xlu0 %312   ;;  %v320_v22 = vpop.permute.xlu1 %319  }
  0xbf   :  { %316 = vst.msk [vmem:[#allocation2 + $0x20] sm:$0x1] %vm314_vm13, %v313_v20   ;;  %vm424_vm13 = vcmask 687704  }
  0xc0   :  { %711 = vrot.lane.b32.xlu0 %v1109_v19, %s1388_s20  ;;  %322 = vst.msk [vmem:[#allocation2] sm:$0x1] %vm321_vm14, %v320_v22   ;;  %718 = vrot.lane.b32.xlu1 %v1110_v21, %s1389_s21  ;;  %s1398_s21 = smov 23   ;;  %vm431_vm14 = vcmask 679504   ;;  %v1141_v19 = vld [vmem:[%s1868_s0 + $0x39] sm:$0x1]  }
  0xc1   :  { %s1420_s0 = smov 1  }
  0xc2   :  { %v326_v24 = vpop.permute.xlu0 %325   ;;  %v333_v26 = vpop.permute.xlu1 %332  }
  0xc3   :  { %329 = vst.msk [vmem:[#allocation2 + $0x28] sm:$0x1] %vm327_vm15, %v326_v24   ;;  %vm438_vm15 = vcmask 671304  }
  0xc4   :  { %725 = vrot.lane.b32.xlu0 %v1111_v23, %s1390_s26  ;;  %336 = vst.msk [vmem:[#allocation2 + $0x8] sm:$0x1] %vm334_vm1, %v333_v26   ;;  %732 = vrot.lane.b32.xlu1 %v1112_v25, %s1391_s27  ;;  %s1400_s27 = smov 21   ;;  %vm445_vm1 = vcmask 663104  }
  0xc6   :  { %v340_v28 = vpop.permute.xlu0 %339   ;;  %v347_v30 = vpop.permute.xlu1 %346  }
  0xc7   :  { %343 = vst.msk [vmem:[#allocation2 + $0x30] sm:$0x1] %vm341_vm0, %v340_v28   ;;  %vm451_vm0 = vcmask 654904  }
  0xc8   :  { %739 = vrot.lane.b32.xlu0 %v1113_v27, %s1392_s3  ;;  %350 = vst.msk [vmem:[#allocation2 + $0x10] sm:$0x1] %vm348_vm2, %v347_v30   ;;  %746 = vrot.lane.b32.xlu1 %v1114_v29, %s1393_s4  ;;  %s1402_s4 = smov 19   ;;  %vm458_vm2 = vcmask 646704  }
  0xca   :  { %v354_v32 = vpop.permute.xlu0 %353   ;;  %v361_v34 = vpop.permute.xlu1 %360  }
  0xcb   :  { %357 = vst.msk [vmem:[#allocation2 + $0x38] sm:$0x1] %vm355_vm3, %v354_v32   ;;  %vm465_vm3 = vcmask 638504  }
  0xcc   :  { %753 = vrot.lane.b32.xlu0 %v1115_v31, %s1394_s9  ;;  %364 = vst.msk [vmem:[#allocation2 + $0x18] sm:$0x1] %vm362_vm4, %v361_v34   ;;  %759 = vrot.lane.b32.xlu1 %v1116_v33, %s1395_s10  ;;  %s1404_s10 = smov 17   ;;  %vm472_vm4 = vcmask 630304  }
  0xce   :  { %v368_v36 = vpop.permute.xlu0 %367   ;;  %v375_v38 = vpop.permute.xlu1 %374  }
  0xcf   :  { %371 = vst.msk [vmem:[#allocation2 + $0x40] sm:$0x1] %vm369_vm5, %v368_v36   ;;  %vm479_vm5 = vcmask 622104  }
  0xd0   :  { %766 = vrot.lane.b32.xlu0 %v1117_v35, %s1396_s15  ;;  %378 = vst.msk [vmem:[#allocation2 + $0x20] sm:$0x1] %vm376_vm6, %v375_v38   ;;  %773 = vrot.lane.b32.xlu1 %v1118_v37, %s1397_s16  ;;  %s1406_s16 = smov 15   ;;  %vm486_vm6 = vcmask 613904  }
  0xd2   :  { %v382_v40 = vpop.permute.xlu0 %381   ;;  %v388_v42 = vpop.permute.xlu1 %387  }
  0xd3   :  { %384 = vst.msk [vmem:[#allocation2] sm:$0x1] %vm383_vm7, %v382_v40   ;;  %vm493_vm7 = vcmask 605704  }
  0xd4   :  { %780 = vrot.lane.b32.xlu0 %v1119_v39, %s1398_s21  ;;  %391 = vst.msk [vmem:[#allocation2 + $0x28] sm:$0x1] %vm389_vm8, %v388_v42   ;;  %787 = vrot.lane.b32.xlu1 %v1120_v41, %s1399_s22  ;;  %s1408_s22 = smov 13   ;;  %vm500_vm8 = vcmask 597504  }
  0xd6   :  { %v395_v44 = vpop.permute.xlu0 %394   ;;  %v402_v46 = vpop.permute.xlu1 %401  }
  0xd7   :  { %398 = vst.msk [vmem:[#allocation2 + $0x8] sm:$0x1] %vm396_vm9, %v395_v44   ;;  %vm507_vm9 = vcmask 589304  }
  0xd8   :  { %794 = vrot.lane.b32.xlu0 %v1121_v43, %s1400_s27  ;;  %405 = vst.msk [vmem:[#allocation2 + $0x30] sm:$0x1] %vm403_vm10, %v402_v46   ;;  %801 = vrot.lane.b32.xlu1 %v1122_v45, %s1401_s28  ;;  %s1410_s28 = smov 11   ;;  %vm513_vm10 = vcmask 581104   ;;  %s1421_s27 = smov [#allocation0]  }
  0xda   :  { %v409_v48 = vpop.permute.xlu0 %408   ;;  %v416_v50 = vpop.permute.xlu1 %415  }
  0xdb   :  { %412 = vst.msk [vmem:[#allocation2 + $0x10] sm:$0x1] %vm410_vm11, %v409_v48   ;;  %vm520_vm11 = vcmask 572904  }
  0xdc   :  { %808 = vrot.lane.b32.xlu0 %v1123_v47, %s1402_s4  ;;  %419 = vst.msk [vmem:[#allocation2 + $0x38] sm:$0x1] %vm417_vm12, %v416_v50   ;;  %815 = vrot.lane.b32.xlu1 %v1124_v49, %s1403_s5  ;;  %s1412_s5 = smov 9   ;;  %vm527_vm12 = vcmask 564704  }
  0xde   :  { %v423_v52 = vpop.permute.xlu0 %422   ;;  %v430_v54 = vpop.permute.xlu1 %429  }
  0xdf   :  { %426 = vst.msk [vmem:[#allocation2 + $0x18] sm:$0x1] %vm424_vm13, %v423_v52   ;;  %vm534_vm13 = vcmask 556504  }
  0xe0   :  { %821 = vrot.lane.b32.xlu0 %v1125_v51, %s1404_s10  ;;  %433 = vst.msk [vmem:[#allocation2 + $0x40] sm:$0x1] %vm431_vm14, %v430_v54   ;;  %828 = vrot.lane.b32.xlu1 %v1126_v53, %s1405_s11  ;;  %s1414_s11 = smov 7   ;;  %vm541_vm14 = vcmask 548304  }
  0xe2   :  { %v437_v56 = vpop.permute.xlu0 %436   ;;  %v444_v58 = vpop.permute.xlu1 %443  }
  0xe3   :  { %440 = vst.msk [vmem:[#allocation2 + $0x20] sm:$0x1] %vm438_vm15, %v437_v56   ;;  %vm548_vm15 = vcmask 540104  }
  0xe4   :  { %835 = vrot.lane.b32.xlu0 %v1127_v55, %s1406_s16  ;;  %446 = vst.msk [vmem:[#allocation2] sm:$0x1] %vm445_vm1, %v444_v58   ;;  %842 = vrot.lane.b32.xlu1 %v1128_v57, %s1407_s17  ;;  %s1416_s17 = smov 5   ;;  %vm555_vm1 = vcmask 531904  }
  0xe6   :  { %v450_v60 = vpop.permute.xlu0 %449   ;;  %v457_v62 = vpop.permute.xlu1 %456  }
  0xe7   :  { %453 = vst.msk [vmem:[#allocation2 + $0x28] sm:$0x1] %vm451_vm0, %v450_v60   ;;  %vm562_vm0 = vcmask 523704  }
  0xe8   :  { %849 = vrot.lane.b32.xlu0 %v1129_v59, %s1408_s22  ;;  %460 = vst.msk [vmem:[#allocation2 + $0x8] sm:$0x1] %vm458_vm2, %v457_v62   ;;  %856 = vrot.lane.b32.xlu1 %v1130_v61, %s1409_s23  ;;  %s1418_s23 = smov 3   ;;  %vm569_vm2 = vcmask 515504  }
  0xea   :  { %v464_v0 = vpop.permute.xlu0 %463   ;;  %v471_v2 = vpop.permute.xlu1 %470  }
  0xeb   :  { %467 = vst.msk [vmem:[#allocation2 + $0x30] sm:$0x1] %vm465_vm3, %v464_v0   ;;  %vm575_vm3 = vcmask 507304  }
  0xec   :  { %863 = vrot.lane.b32.xlu0 %v1131_v63, %s1410_s28  ;;  %474 = vst.msk [vmem:[#allocation2 + $0x10] sm:$0x1] %vm472_vm4, %v471_v2   ;;  %870 = vrot.lane.b32.xlu1 %v1132_v1, %s1411_s29  ;;  %vm582_vm4 = vcmask 499104   ;;  %s994_s28 = sshll.u32 %s1421_s27, 4  ;;  %s995_s28 = int_to_ptr.vmem [resolvable:$true] %s994_s28 }
  0xed   :  { %s1270_s29 = scalar_lea.vmem %s995_s28, 144  ;;  %s1274_s30 = scalar_lea.vmem %s995_s28, 160 }
  0xee   :  { %v478_v4 = vpop.permute.xlu0 %477   ;;  %v485_v6 = vpop.permute.xlu1 %484   ;;  %p1271_p0 = scmp.ne.s32.totalorder %s995_s28, %s1270_s29  ;;  %p1275_p1 = scmp.lt.s32.totalorder %s995_s28, %s995_s28 }
  0xef   :  { %481 = vst.msk [vmem:[#allocation2 + $0x38] sm:$0x1] %vm479_vm5, %v478_v4   ;;  %vm589_vm5 = vcmask 490904   ;;  %p1276_p2 = scmp.lt.s32.totalorder %s1274_s30, %s1270_s29 }
  0xf0   :  { %877 = vrot.lane.b32.xlu0 %v1133_v3, %s1412_s5  ;;  %488 = vst.msk [vmem:[#allocation2 + $0x18] sm:$0x1] %vm486_vm6, %v485_v6   ;;  %883 = vrot.lane.b32.xlu1 %v1134_v5, %s1413_s6  ;;  %vm596_vm6 = vcmask 482704  }
  0xf1   :  { %p1277_p3 = por %p1276_p2, %p1275_p1 }
  0xf2   :  { %v492_v8 = vpop.permute.xlu0 %491   ;;  %v499_v10 = vpop.permute.xlu1 %498  }
  0xf3   :  { %495 = vst.msk [vmem:[#allocation2 + $0x40] sm:$0x1] %vm493_vm7, %v492_v8   ;;  %vm603_vm7 = vcmask 474504   ;;  %p1278_p4 = pnand %p1277_p3, %p1271_p0 }
  0xf4   :  { %890 = vrot.lane.b32.xlu0 %v1135_v7, %s1414_s11  ;;  %502 = vst.msk [vmem:[#allocation2 + $0x20] sm:$0x1] %vm500_vm8, %v499_v10   ;;  %897 = vrot.lane.b32.xlu1 %v1136_v9, %s1415_s12  ;;  %vm610_vm8 = vcmask 466304  }
  0xf6   :  { %v506_v12 = vpop.permute.xlu0 %505   ;;  %v512_v14 = vpop.permute.xlu1 %511  }
  0xf7   :  { %508 = vst.msk [vmem:[#allocation2] sm:$0x1] %vm507_vm9, %v506_v12   ;;  %vm617_vm9 = vcmask 458104  }
  0xf8   :  { %904 = vrot.lane.b32.xlu0 %v1137_v11, %s1416_s17  ;;  %515 = vst.msk [vmem:[#allocation2 + $0x28] sm:$0x1] %vm513_vm10, %v512_v14   ;;  %911 = vrot.lane.b32.xlu1 %v1138_v13, %s1417_s18  ;;  %vm624_vm10 = vcmask 449904  }
  0xfa   :  { %v519_v16 = vpop.permute.xlu0 %518   ;;  %v526_v18 = vpop.permute.xlu1 %525  }
  0xfb   :  { %522 = vst.msk [vmem:[#allocation2 + $0x8] sm:$0x1] %vm520_vm11, %v519_v16   ;;  %vm631_vm11 = vcmask 441704  }
  0xfc   :  { %918 = vrot.lane.b32.xlu0 %v1139_v15, %s1418_s23  ;;  %529 = vst.msk [vmem:[#allocation2 + $0x30] sm:$0x1] %vm527_vm12, %v526_v18   ;;  %925 = vrot.lane.b32.xlu1 %v1140_v17, %s1419_s24  ;;  %vm637_vm12 = vcmask 433504  }
  0xfe   :  { %v533_v20 = vpop.permute.xlu0 %532   ;;  %v540_v21 = vpop.permute.xlu1 %539  }
  0xff   :  { %536 = vst.msk [vmem:[#allocation2 + $0x10] sm:$0x1] %vm534_vm13, %v533_v20   ;;  %vm644_vm13 = vcmask 425304  }
 0x100   :  { %932 = vrot.lane.b32.xlu0 %v1141_v19, %s1420_s0  ;;  %543 = vst.msk [vmem:[#allocation2 + $0x38] sm:$0x1] %vm541_vm14, %v540_v21   ;;  %vm651_vm14 = vcmask 417104  }
 0x102   :  { %v547_v22 = vpop.permute.xlu0 %546   ;;  %v554_v23 = vpop.permute.xlu1 %553  }
 0x103   :  { %550 = vst.msk [vmem:[#allocation2 + $0x18] sm:$0x1] %vm548_vm15, %v547_v22   ;;  %vm658_vm15 = vcmask 408904  }
 0x104   :  { %557 = vst.msk [vmem:[#allocation2 + $0x40] sm:$0x1] %vm555_vm1, %v554_v23   ;;  %vm665_vm1 = vcmask 400704  }
 0x106   :  { %v561_v24 = vpop.permute.xlu0 %560   ;;  %v568_v25 = vpop.permute.xlu1 %567  }
 0x107   :  { %564 = vst.msk [vmem:[#allocation2 + $0x20] sm:$0x1] %vm562_vm0, %v561_v24   ;;  %vm672_vm0 = vcmask 392504  }
 0x108   :  { %570 = vst.msk [vmem:[#allocation2] sm:$0x1] %vm569_vm2, %v568_v25   ;;  %vm679_vm2 = vcmask 384304  }
 0x10a   :  { %v574_v26 = vpop.permute.xlu0 %573   ;;  %v581_v27 = vpop.permute.xlu1 %580  }
 0x10b   :  { %577 = vst.msk [vmem:[#allocation2 + $0x28] sm:$0x1] %vm575_vm3, %v574_v26   ;;  %vm686_vm3 = vcmask 376104  }
 0x10c   :  { %584 = vst.msk [vmem:[#allocation2 + $0x8] sm:$0x1] %vm582_vm4, %v581_v27   ;;  %vm693_vm4 = vcmask 367904  }
 0x10e   :  { %v588_v28 = vpop.permute.xlu0 %587   ;;  %v595_v29 = vpop.permute.xlu1 %594  }
 0x10f   :  { %591 = vst.msk [vmem:[#allocation2 + $0x30] sm:$0x1] %vm589_vm5, %v588_v28   ;;  %vm699_vm5 = vcmask 359704  }
 0x110   :  { %598 = vst.msk [vmem:[#allocation2 + $0x10] sm:$0x1] %vm596_vm6, %v595_v29   ;;  %vm706_vm6 = vcmask 351504  }
 0x112   :  { %v602_v30 = vpop.permute.xlu0 %601   ;;  %v609_v31 = vpop.permute.xlu1 %608  }
 0x113   :  { %605 = vst.msk [vmem:[#allocation2 + $0x38] sm:$0x1] %vm603_vm7, %v602_v30   ;;  %vm713_vm7 = vcmask 343304  }
 0x114   :  { %612 = vst.msk [vmem:[#allocation2 + $0x18] sm:$0x1] %vm610_vm8, %v609_v31   ;;  %vm720_vm8 = vcmask 335104  }
 0x116   :  { %v616_v32 = vpop.permute.xlu0 %615   ;;  %v623_v33 = vpop.permute.xlu1 %622  }
 0x117   :  { %619 = vst.msk [vmem:[#allocation2 + $0x40] sm:$0x1] %vm617_vm9, %v616_v32   ;;  %vm727_vm9 = vcmask 326904  }
 0x118   :  { %626 = vst.msk [vmem:[#allocation2 + $0x20] sm:$0x1] %vm624_vm10, %v623_v33   ;;  %vm734_vm10 = vcmask 318704  }
 0x11a   :  { %v630_v34 = vpop.permute.xlu0 %629   ;;  %v636_v35 = vpop.permute.xlu1 %635  }
 0x11b   :  { %632 = vst.msk [vmem:[#allocation2] sm:$0x1] %vm631_vm11, %v630_v34   ;;  %vm741_vm11 = vcmask 310504  }
 0x11c   :  { %639 = vst.msk [vmem:[#allocation2 + $0x28] sm:$0x1] %vm637_vm12, %v636_v35   ;;  %vm748_vm12 = vcmask 302304  }
 0x11e   :  { %v643_v36 = vpop.permute.xlu0 %642   ;;  %v650_v37 = vpop.permute.xlu1 %649  }
 0x11f   :  { %646 = vst.msk [vmem:[#allocation2 + $0x8] sm:$0x1] %vm644_vm13, %v643_v36   ;;  %vm755_vm13 = vcmask 294104  }
 0x120   :  { %653 = vst.msk [vmem:[#allocation2 + $0x30] sm:$0x1] %vm651_vm14, %v650_v37   ;;  %vm761_vm14 = vcmask 285904  }
 0x122   :  { %v657_v38 = vpop.permute.xlu0 %656   ;;  %v664_v39 = vpop.permute.xlu1 %663  }
 0x123   :  { %660 = vst.msk [vmem:[#allocation2 + $0x10] sm:$0x1] %vm658_vm15, %v657_v38   ;;  %vm768_vm15 = vcmask 277704  }
 0x124   :  { %667 = vst.msk [vmem:[#allocation2 + $0x38] sm:$0x1] %vm665_vm1, %v664_v39   ;;  %vm775_vm1 = vcmask 269504  }
 0x126   :  { %v671_v40 = vpop.permute.xlu0 %670   ;;  %v678_v41 = vpop.permute.xlu1 %677  }
 0x127   :  { %674 = vst.msk [vmem:[#allocation2 + $0x18] sm:$0x1] %vm672_vm0, %v671_v40   ;;  %vm782_vm0 = vcmask 261304  }
 0x128   :  { %681 = vst.msk [vmem:[#allocation2 + $0x40] sm:$0x1] %vm679_vm2, %v678_v41   ;;  %vm789_vm2 = vcmask 253104  }
 0x12a   :  { %v685_v42 = vpop.permute.xlu0 %684   ;;  %v692_v43 = vpop.permute.xlu1 %691  }
 0x12b   :  { %688 = vst.msk [vmem:[#allocation2 + $0x20] sm:$0x1] %vm686_vm3, %v685_v42   ;;  %vm796_vm3 = vcmask 244904  }
 0x12c   :  { %694 = vst.msk [vmem:[#allocation2] sm:$0x1] %vm693_vm4, %v692_v43   ;;  %vm803_vm4 = vcmask 236704  }
 0x12e   :  { %v698_v44 = vpop.permute.xlu0 %697   ;;  %v705_v45 = vpop.permute.xlu1 %704  }
 0x12f   :  { %701 = vst.msk [vmem:[#allocation2 + $0x28] sm:$0x1] %vm699_vm5, %v698_v44   ;;  %vm810_vm5 = vcmask 228504  }
 0x130   :  { %708 = vst.msk [vmem:[#allocation2 + $0x8] sm:$0x1] %vm706_vm6, %v705_v45   ;;  %vm817_vm6 = vcmask 220304  }
 0x132   :  { %v712_v46 = vpop.permute.xlu0 %711   ;;  %v719_v47 = vpop.permute.xlu1 %718  }
 0x133   :  { %715 = vst.msk [vmem:[#allocation2 + $0x30] sm:$0x1] %vm713_vm7, %v712_v46   ;;  %vm823_vm7 = vcmask 212104  }
 0x134   :  { %722 = vst.msk [vmem:[#allocation2 + $0x10] sm:$0x1] %vm720_vm8, %v719_v47   ;;  %vm830_vm8 = vcmask 203904  }
 0x136   :  { %v726_v48 = vpop.permute.xlu0 %725   ;;  %v733_v49 = vpop.permute.xlu1 %732  }
 0x137   :  { %729 = vst.msk [vmem:[#allocation2 + $0x38] sm:$0x1] %vm727_vm9, %v726_v48   ;;  %vm837_vm9 = vcmask 195704  }
 0x138   :  { %736 = vst.msk [vmem:[#allocation2 + $0x18] sm:$0x1] %vm734_vm10, %v733_v49   ;;  %vm844_vm10 = vcmask 187504  }
 0x13a   :  { %v740_v50 = vpop.permute.xlu0 %739   ;;  %v747_v51 = vpop.permute.xlu1 %746  }
 0x13b   :  { %743 = vst.msk [vmem:[#allocation2 + $0x40] sm:$0x1] %vm741_vm11, %v740_v50   ;;  %vm851_vm11 = vcmask 179304  }
 0x13c   :  { %750 = vst.msk [vmem:[#allocation2 + $0x20] sm:$0x1] %vm748_vm12, %v747_v51   ;;  %vm858_vm12 = vcmask 171104  }
 0x13e   :  { %v754_v52 = vpop.permute.xlu0 %753   ;;  %v760_v53 = vpop.permute.xlu1 %759  }
 0x13f   :  { %756 = vst.msk [vmem:[#allocation2] sm:$0x1] %vm755_vm13, %v754_v52   ;;  %vm865_vm13 = vcmask 162904  }
 0x140   :  { %763 = vst.msk [vmem:[#allocation2 + $0x28] sm:$0x1] %vm761_vm14, %v760_v53   ;;  %vm872_vm14 = vcmask 154704  }
 0x142   :  { %v767_v54 = vpop.permute.xlu0 %766   ;;  %v774_v55 = vpop.permute.xlu1 %773  }
 0x143   :  { %770 = vst.msk [vmem:[#allocation2 + $0x8] sm:$0x1] %vm768_vm15, %v767_v54   ;;  %vm879_vm15 = vcmask 146504  }
 0x144   :  { %777 = vst.msk [vmem:[#allocation2 + $0x30] sm:$0x1] %vm775_vm1, %v774_v55   ;;  %vm885_vm1 = vcmask 138304  }
 0x146   :  { %v781_v56 = vpop.permute.xlu0 %780   ;;  %v788_v57 = vpop.permute.xlu1 %787  }
 0x147   :  { %784 = vst.msk [vmem:[#allocation2 + $0x10] sm:$0x1] %vm782_vm0, %v781_v56   ;;  %vm892_vm0 = vcmask 130104  }
 0x148   :  { %791 = vst.msk [vmem:[#allocation2 + $0x38] sm:$0x1] %vm789_vm2, %v788_v57   ;;  %vm899_vm2 = vcmask 121904  }
 0x14a   :  { %v795_v58 = vpop.permute.xlu0 %794   ;;  %v802_v59 = vpop.permute.xlu1 %801  }
 0x14b   :  { %798 = vst.msk [vmem:[#allocation2 + $0x18] sm:$0x1] %vm796_vm3, %v795_v58   ;;  %vm906_vm3 = vcmask 113704  }
 0x14c   :  { %805 = vst.msk [vmem:[#allocation2 + $0x40] sm:$0x1] %vm803_vm4, %v802_v59   ;;  %vm913_vm4 = vcmask 105504  }
 0x14e   :  { %v809_v60 = vpop.permute.xlu0 %808   ;;  %v816_v61 = vpop.permute.xlu1 %815  }
 0x14f   :  { %812 = vst.msk [vmem:[#allocation2 + $0x20] sm:$0x1] %vm810_vm5, %v809_v60   ;;  %vm920_vm5 = vcmask 97304  }
 0x150   :  { %818 = vst.msk [vmem:[#allocation2] sm:$0x1] %vm817_vm6, %v816_v61   ;;  %vm927_vm6 = vcmask 89104  }
 0x152   :  { %v822_v62 = vpop.permute.xlu0 %821   ;;  %v829_v63 = vpop.permute.xlu1 %828  }
 0x153   :  { %825 = vst.msk [vmem:[#allocation2 + $0x28] sm:$0x1] %vm823_vm7, %v822_v62   ;;  %vm934_vm7 = vcmask 80904  }
 0x154   :  { %832 = vst.msk [vmem:[#allocation2 + $0x8] sm:$0x1] %vm830_vm8, %v829_v63  }
 0x156   :  { %v836_v0 = vpop.permute.xlu0 %835   ;;  %v843_v1 = vpop.permute.xlu1 %842  }
 0x157   :  { %839 = vst.msk [vmem:[#allocation2 + $0x30] sm:$0x1] %vm837_vm9, %v836_v0  }
 0x158   :  { %846 = vst.msk [vmem:[#allocation2 + $0x10] sm:$0x1] %vm844_vm10, %v843_v1  }
 0x15a   :  { %v850_v2 = vpop.permute.xlu0 %849   ;;  %v857_v3 = vpop.permute.xlu1 %856  }
 0x15b   :  { %853 = vst.msk [vmem:[#allocation2 + $0x38] sm:$0x1] %vm851_vm11, %v850_v2  }
 0x15c   :  { %860 = vst.msk [vmem:[#allocation2 + $0x18] sm:$0x1] %vm858_vm12, %v857_v3  }
 0x15e   :  { %v864_v4 = vpop.permute.xlu0 %863   ;;  %v871_v5 = vpop.permute.xlu1 %870  }
 0x15f   :  { %867 = vst.msk [vmem:[#allocation2 + $0x40] sm:$0x1] %vm865_vm13, %v864_v4  }
 0x160   :  { %874 = vst.msk [vmem:[#allocation2 + $0x20] sm:$0x1] %vm872_vm14, %v871_v5  }
 0x162   :  { %v878_v6 = vpop.permute.xlu0 %877   ;;  %v884_v7 = vpop.permute.xlu1 %883  }
 0x163   :  { %880 = vst.msk [vmem:[#allocation2] sm:$0x1] %vm879_vm15, %v878_v6  }
 0x164   :  { %887 = vst.msk [vmem:[#allocation2 + $0x28] sm:$0x1] %vm885_vm1, %v884_v7  }
 0x166   :  { %v891_v8 = vpop.permute.xlu0 %890   ;;  %v898_v9 = vpop.permute.xlu1 %897  }
 0x167   :  { %894 = vst.msk [vmem:[#allocation2 + $0x8] sm:$0x1] %vm892_vm0, %v891_v8  }
 0x168   :  { %901 = vst.msk [vmem:[#allocation2 + $0x30] sm:$0x1] %vm899_vm2, %v898_v9  }
 0x16a   :  { %v940_v10 = vld [vmem:[#allocation2] sm:$0x1]  ;;  %v905_v11 = vpop.permute.xlu0 %904   ;;  %v912_v13 = vpop.permute.xlu1 %911  }
 0x16b   :  { %942 = vst [vmem:[#allocation0] sm:$0x1] %v940_v10  ;;  %v967_v12 = vld [vmem:[#allocation2 + $0x28] sm:$0x1]  ;;  %908 = vst.msk [vmem:[#allocation2 + $0x10] sm:$0x1] %vm906_vm3, %v905_v11  }
 0x16c   :  { %971 = vst [vmem:[#allocation0 + $0x5] sm:$0x1] %v967_v12  ;;  %915 = vst.msk [vmem:[#allocation2 + $0x38] sm:$0x1] %vm913_vm4, %v912_v13  }
 0x16e   :  { %v944_v14 = vld [vmem:[#allocation2 + $0x8] sm:$0x1]  ;;  %v919_v15 = vpop.permute.xlu0 %918   ;;  %v926_v17 = vpop.permute.xlu1 %925  }
 0x16f   :  { %947 = vst [vmem:[#allocation0 + $0x1] sm:$0x1] %v944_v14  ;;  %v973_v16 = vld [vmem:[#allocation2 + $0x30] sm:$0x1]  ;;  %922 = vst.msk [vmem:[#allocation2 + $0x18] sm:$0x1] %vm920_vm5, %v919_v15  }
 0x170   :  { %977 = vst [vmem:[#allocation0 + $0x6] sm:$0x1] %v973_v16  ;;  %929 = vst.msk [vmem:[#allocation2 + $0x40] sm:$0x1] %vm927_vm6, %v926_v17  }
 0x172   :  { %v949_v18 = vld [vmem:[#allocation2 + $0x10] sm:$0x1]  ;;  %v933_v19 = vpop.permute.xlu0 %932  }
 0x173   :  { %953 = vst [vmem:[#allocation0 + $0x2] sm:$0x1] %v949_v18  ;;  %v979_v20 = vld [vmem:[#allocation2 + $0x38] sm:$0x1]  ;;  %936 = vst.msk [vmem:[#allocation2 + $0x20] sm:$0x1] %vm934_vm7, %v933_v19  }
 0x174   :  { %983 = vst [vmem:[#allocation0 + $0x7] sm:$0x1] %v979_v20 }
 0x176   :  { %v955_v21 = vld [vmem:[#allocation2 + $0x18] sm:$0x1] }
 0x177   :  { %959 = vst [vmem:[#allocation0 + $0x3] sm:$0x1] %v955_v21  ;;  %v985_v22 = vld [vmem:[#allocation2 + $0x40] sm:$0x1] }
 0x178   :  { %989 = vst [vmem:[#allocation0 + $0x8] sm:$0x1] %v985_v22 }
 0x17a   :  { %v961_v23 = vld [vmem:[#allocation2 + $0x20] sm:$0x1] }
 0x17b   :  { %965 = vst [vmem:[#allocation0 + $0x4] sm:$0x1] %v961_v23 }
 0x17c   :  { %1281 = shalt.err (!%p1278_p4)
}
 0x17d   :  { %s1282_s4 = scalar_lea.hbm %s1869_s1, 144 }
 0x17e   :  { %p1283_p5 = scmp.ne.s32.totalorder %s1869_s1, %s1282_s4  ;;  %p1286_p6 = scmp.lt.u32.totalorder %s1282_s4, %s1869_s1 }
 0x180   :  { %p1288_p7 = pnand %p1286_p6, %p1283_p5 }
 0x182   :  { %1291 = shalt.err (!%p1288_p7)
}
 0x183   :  { %997 = dma.vmem_to_hbm [thread:$0]  %s995_s28, 144, %s1869_s1, [#allocation1]  }
 0x184   :  { %1292 = dma.done.wait [#allocation1], 144  }
 0x185   :  { %1293 = vsyncadd [#allocation1], 4294967152 }
 0x186   :  { %999 = vsyncpa [#allocation1], 1 }

// kernel: split.2
= control target key start
LH: loop header
LB: loop body
LE: loop exit
PB: predicated region body
PF: predicated region fallthrough
CT: control target
= control target key end

     0   :  { %v3_v0 = vlaneseq  ;;  %s767_s14 = smov 121   ;;  %s1453_s0 = inlined_call_operand.vmem [shape: f32[2,256,9], index: 0, kind: input, shape index: {}]   ;;  %s1454_s1 = inlined_call_operand.vmem [shape: f32[2,256,2], index: 1, kind: output, shape index: {}]  }
   0x1   :  { %v642_v2 = vld [vmem:[%s1453_s0 + $0x8] sm:$0xff]  ;;  %v2_v3 = vld [vmem:[%s1453_s0] sm:$0xff]  ;;  %v648_v10 = vld [vmem:[%s1453_s0 + $0x110] sm:$0xff] }
   0x2   :  { %v778_v1 = vand.u32 127, %v3_v0  ;;  %v644_v4 = vld [vmem:[%s1453_s0 + $0x108] sm:$0xff]  ;;  %v640_v5 = vld [vmem:[%s1453_s0 + $0x100] sm:$0xff]  ;;  %v646_v11 = vld [vmem:[%s1453_s0 + $0x10] sm:$0xff] }
   0x3   :  { %v652_v14 = vld [vmem:[%s1453_s0 + $0x118] sm:$0xff]  ;;  %v656_v16 = vld [vmem:[%s1453_s0 + $0x120] sm:$0xff]  ;;  %v708_v22 = vld [vmem:[%s1453_s0 + $0x188] sm:$0xff] }
   0x4   :  { %vm5_vm0 = vcmp.lt.s32.totalorder %v778_v1, 7  ;;  %v650_v15 = vld [vmem:[%s1453_s0 + $0x18] sm:$0xff]  ;;  %v704_v17 = vld [vmem:[%s1453_s0 + $0x180] sm:$0xff]  ;;  %v706_v26 = vld [vmem:[%s1453_s0 + $0x88] sm:$0xff] }
   0x5   :  { %v25_v6 = vsel %vm5_vm0, 0, %v642_v2  ;;  %v6_v7 = vsel %vm5_vm0, 0, %v2_v3  ;;  %v35_v8 = vsel %vm5_vm0, 0, %v644_v4  ;;  %v15_v9 = vsel %vm5_vm0, 0, %v640_v5  ;;  %v654_v19 = vld [vmem:[%s1453_s0 + $0x20] sm:$0xff]  ;;  %v712_v27 = vld [vmem:[%s1453_s0 + $0x190] sm:$0xff] }
   0x6   :  { %26 = vrot.lane.b32.xlu1 %v25_v6, %s767_s14  ;;  %7 = vrot.lane.b32.xlu0 %v6_v7, %s767_s14  ;;  %v55_v12 = vsel %vm5_vm0, 0, %v648_v10  ;;  %v45_v13 = vsel %vm5_vm0, 0, %v646_v11  ;;  %v75_v18 = vsel %vm5_vm0, 0, %v652_v14  ;;  %v836_v20 = vsel %vm5_vm0, 0, %v704_v17  ;;  %v702_v21 = vld [vmem:[%s1453_s0 + $0x80] sm:$0xff]  ;;  %v710_v28 = vld [vmem:[%s1453_s0 + $0x90] sm:$0xff] }
   0x7   :  { %v65_v23 = vsel %vm5_vm0, 0, %v650_v15  ;;  %v848_v24 = vsel %vm5_vm0, 0, %v702_v21  ;;  %v852_v25 = vsel %vm5_vm0, 0, %v708_v22  ;;  %v865_v29 = vsel %vm5_vm0, 0, %v706_v26  ;;  %v716_v32 = vld [vmem:[%s1453_s0 + $0x198] sm:$0xff]  ;;  %v720_v34 = vld [vmem:[%s1453_s0 + $0x1a0] sm:$0xff] }
   0x8   :  { %v869_v30 = vsel %vm5_vm0, 0, %v712_v27  ;;  %v873_v31 = vsel %vm5_vm0, 0, %v710_v28  ;;  %v714_v33 = vld [vmem:[%s1453_s0 + $0x98] sm:$0xff]  ;;  %v660_v35 = vld [vmem:[%s1453_s0 + $0x128] sm:$0xff]  ;;  %v889_v36 = vsel %vm5_vm0, 0, %v716_v32  ;;  %v897_v38 = vsel %vm5_vm0, 0, %v720_v34 }
   0x9   :  { %v893_v37 = vsel %vm5_vm0, 0, %v714_v33  ;;  %v718_v39 = vld [vmem:[%s1453_s0 + $0xa0] sm:$0xff]  ;;  %v724_v40 = vld [vmem:[%s1453_s0 + $0x1a8] sm:$0xff]  ;;  %v95_v42 = vsel %vm5_vm0, 0, %v656_v16  ;;  %v728_v47 = vld [vmem:[%s1453_s0 + $0x1b0] sm:$0xff]  ;;  %v85_v49 = vsel %vm5_vm0, 0, %v654_v19 }
   0xa   :  { %36 = vrot.lane.b32.xlu1 %v35_v8, %s767_s14  ;;  %16 = vrot.lane.b32.xlu0 %v15_v9, %s767_s14  ;;  %v722_v41 = vld [vmem:[%s1453_s0 + $0xa8] sm:$0xff]  ;;  %v917_v44 = vsel %vm5_vm0, 0, %v718_v39  ;;  %v921_v45 = vsel %vm5_vm0, 0, %v724_v40  ;;  %v726_v48 = vld [vmem:[%s1453_s0 + $0xb0] sm:$0xff]  ;;  %v937_v50 = vsel %vm5_vm0, 0, %v728_v47  ;;  %v115_v4 = vsel %vm5_vm0, 0, %v660_v35 }
   0xb   :  { %v658_v43 = vld [vmem:[%s1453_s0 + $0x28] sm:$0xff]  ;;  %v925_v46 = vsel %vm5_vm0, 0, %v722_v41  ;;  %v941_v51 = vsel %vm5_vm0, 0, %v726_v48  ;;  %v732_v52 = vld [vmem:[%s1453_s0 + $0x1b8] sm:$0xff]  ;;  %v736_v54 = vld [vmem:[%s1453_s0 + $0x1c0] sm:$0xff] }
   0xc   :  { %v730_v53 = vld [vmem:[%s1453_s0 + $0xb8] sm:$0xff]  ;;  %v954_v55 = vsel %vm5_vm0, 0, %v732_v52  ;;  %v962_v57 = vsel %vm5_vm0, 0, %v736_v54  ;;  %v734_v58 = vld [vmem:[%s1453_s0 + $0xc0] sm:$0xff]  ;;  %v740_v59 = vld [vmem:[%s1453_s0 + $0x1c8] sm:$0xff] }
   0xd   :  { %v958_v56 = vsel %vm5_vm0, 0, %v730_v53  ;;  %v738_v60 = vld [vmem:[%s1453_s0 + $0xc8] sm:$0xff]  ;;  %v975_v61 = vsel %vm5_vm0, 0, %v734_v58  ;;  %v979_v62 = vsel %vm5_vm0, 0, %v740_v59  ;;  %v744_v0 = vld [vmem:[%s1453_s0 + $0x1d0] sm:$0xff]  ;;  %v748_v3 = vld [vmem:[%s1453_s0 + $0x1d8] sm:$0xff] }
   0xe   :  { %56 = vrot.lane.b32.xlu1 %v55_v12, %s767_s14  ;;  %46 = vrot.lane.b32.xlu0 %v45_v13, %s767_s14  ;;  %v983_v63 = vsel %vm5_vm0, 0, %v738_v60  ;;  %v742_v2 = vld [vmem:[%s1453_s0 + $0xd0] sm:$0xff]  ;;  %v1006_v7 = vsel %vm5_vm0, 0, %v744_v0  ;;  %v1014_v9 = vsel %vm5_vm0, 0, %v748_v3  ;;  %v746_v10 = vld [vmem:[%s1453_s0 + $0xd8] sm:$0xff]  ;;  %v105_v12 = vsel %vm5_vm0, 0, %v658_v43 }
   0xf   :  { %v664_v5 = vld [vmem:[%s1453_s0 + $0x130] sm:$0xff]  ;;  %v1010_v8 = vsel %vm5_vm0, 0, %v742_v2  ;;  %v752_v11 = vld [vmem:[%s1453_s0 + $0x1e0] sm:$0xff]  ;;  %v1026_v13 = vsel %vm5_vm0, 0, %v746_v10  ;;  %v756_v16 = vld [vmem:[%s1453_s0 + $0x1e8] sm:$0xff] }
  0x10   :  { %v662_v6 = vld [vmem:[%s1453_s0 + $0x30] sm:$0xff]  ;;  %v1030_v14 = vsel %vm5_vm0, 0, %v752_v11  ;;  %v750_v15 = vld [vmem:[%s1453_s0 + $0xe0] sm:$0xff]  ;;  %v754_v17 = vld [vmem:[%s1453_s0 + $0xe8] sm:$0xff]  ;;  %v1047_v19 = vsel %vm5_vm0, 0, %v756_v16  ;;  %v135_v35 = vsel %vm5_vm0, 0, %v664_v5 }
  0x11   :  { %v1051_v21 = vsel %vm5_vm0, 0, %v754_v17  ;;  %v760_v22 = vld [vmem:[%s1453_s0 + $0x1f0] sm:$0xff]  ;;  %v764_v26 = vld [vmem:[%s1453_s0 + $0x1f8] sm:$0xff]  ;;  %v125_v39 = vsel %vm5_vm0, 0, %v662_v6  ;;  %v672_v47 = vld [vmem:[%s1453_s0 + $0x140] sm:$0xff] }
  0x12   :  { %76 = vrot.lane.b32.xlu1 %v75_v18, %s767_s14  ;;  %66 = vrot.lane.b32.xlu0 %v65_v23, %s767_s14  ;;  %v1043_v18 = vsel %vm5_vm0, 0, %v750_v15  ;;  %v758_v23 = vld [vmem:[%s1453_s0 + $0xf0] sm:$0xff]  ;;  %v1064_v27 = vsel %vm5_vm0, 0, %v760_v22  ;;  %v1072_v32 = vsel %vm5_vm0, 0, %v764_v26  ;;  %v762_v33 = vld [vmem:[%s1453_s0 + $0xf8] sm:$0xff] }
  0x13   :  { %v1068_v28 = vsel %vm5_vm0, 0, %v758_v23  ;;  %v1081_v34 = vsel %vm5_vm0, 0, %v762_v33  ;;  %v668_v40 = vld [vmem:[%s1453_s0 + $0x138] sm:$0xff]  ;;  %v670_v48 = vld [vmem:[%s1453_s0 + $0x40] sm:$0xff]  ;;  %v676_v53 = vld [vmem:[%s1453_s0 + $0x148] sm:$0xff] }
  0x14   :  { %v666_v41 = vld [vmem:[%s1453_s0 + $0x38] sm:$0xff]  ;;  %v165_v52 = vsel %vm5_vm0, 0, %v670_v48  ;;  %v674_v54 = vld [vmem:[%s1453_s0 + $0x48] sm:$0xff]  ;;  %v195_v58 = vsel %vm5_vm0, 0, %v676_v53  ;;  %v680_v60 = vld [vmem:[%s1453_s0 + $0x150] sm:$0xff] }
  0x15   :  { %v145_v43 = vsel %vm5_vm0, 0, %v666_v41  ;;  %v185_v59 = vsel %vm5_vm0, 0, %v674_v54  ;;  %v678_v0 = vld [vmem:[%s1453_s0 + $0x50] sm:$0xff]  ;;  %v215_v2 = vsel %vm5_vm0, 0, %v680_v60  ;;  %v682_v5 = vld [vmem:[%s1453_s0 + $0x58] sm:$0xff]  ;;  %v688_v11 = vld [vmem:[%s1453_s0 + $0x160] sm:$0xff] }
  0x16   :  { %96 = vrot.lane.b32.xlu1 %v95_v42, %s767_s14  ;;  %86 = vrot.lane.b32.xlu0 %v85_v49, %s767_s14  ;;  %v155_v42 = vsel %vm5_vm0, 0, %v668_v40  ;;  %v175_v49 = vsel %vm5_vm0, 0, %v672_v47  ;;  %v205_v3 = vsel %vm5_vm0, 0, %v678_v0  ;;  %v225_v10 = vsel %vm5_vm0, 0, %v682_v5  ;;  %v692_v17 = vld [vmem:[%s1453_s0 + $0x168] sm:$0xff]  ;;  %v696_v33 = vld [vmem:[%s1453_s0 + $0x170] sm:$0xff] }
  0x17   :  { %v255_v15 = vsel %vm5_vm0, 0, %v688_v11  ;;  %v690_v22 = vld [vmem:[%s1453_s0 + $0x68] sm:$0xff]  ;;  %v275_v23 = vsel %vm5_vm0, 0, %v692_v17  ;;  %v700_v41 = vld [vmem:[%s1453_s0 + $0x178] sm:$0xff] }
  0x18   :  { %v265_v26 = vsel %vm5_vm0, 0, %v690_v22 }
  0x1a   :  { %116 = vrot.lane.b32.xlu1 %v115_v4, %s767_s14  ;;  %106 = vrot.lane.b32.xlu0 %v105_v12, %s767_s14  ;;  %v684_v4 = vld [vmem:[%s1453_s0 + $0x158] sm:$0xff]  ;;  %v686_v12 = vld [vmem:[%s1453_s0 + $0x60] sm:$0xff] }
  0x1b   :  { %v235_v6 = vsel %vm5_vm0, 0, %v684_v4  ;;  %v245_v16 = vsel %vm5_vm0, 0, %v686_v12 }
  0x1e   :  { %136 = vrot.lane.b32.xlu1 %v135_v35, %s767_s14  ;;  %126 = vrot.lane.b32.xlu0 %v125_v39, %s767_s14  ;;  %v694_v35 = vld [vmem:[%s1453_s0 + $0x70] sm:$0xff]  ;;  %v295_v39 = vsel %vm5_vm0, 0, %v696_v33 }
  0x1f   :  { %v285_v40 = vsel %vm5_vm0, 0, %v694_v35 }
  0x22   :  { %156 = vrot.lane.b32.xlu1 %v155_v42, %s767_s14  ;;  %146 = vrot.lane.b32.xlu0 %v145_v43, %s767_s14  ;;  %v698_v42 = vld [vmem:[%s1453_s0 + $0x78] sm:$0xff]  ;;  %v315_v43 = vsel %vm5_vm0, 0, %v700_v41 }
  0x23   :  { %v305_v1 = vsel %vm5_vm0, 0, %v698_v42 }
  0x26   :  { %176 = vrot.lane.b32.xlu1 %v175_v49, %s767_s14  ;;  %166 = vrot.lane.b32.xlu0 %v165_v52, %s767_s14 }
  0x2a   :  { %196 = vrot.lane.b32.xlu1 %v195_v58, %s767_s14  ;;  %186 = vrot.lane.b32.xlu0 %v185_v59, %s767_s14 }
  0x2e   :  { %216 = vrot.lane.b32.xlu1 %v215_v2, %s767_s14  ;;  %206 = vrot.lane.b32.xlu0 %v205_v3, %s767_s14 }
  0x32   :  { %236 = vrot.lane.b32.xlu1 %v235_v6, %s767_s14  ;;  %226 = vrot.lane.b32.xlu0 %v225_v10, %s767_s14 }
  0x36   :  { %256 = vrot.lane.b32.xlu1 %v255_v15, %s767_s14  ;;  %246 = vrot.lane.b32.xlu0 %v245_v16, %s767_s14 }
  0x3a   :  { %276 = vrot.lane.b32.xlu1 %v275_v23, %s767_s14  ;;  %266 = vrot.lane.b32.xlu0 %v265_v26, %s767_s14 }
  0x3e   :  { %296 = vrot.lane.b32.xlu1 %v295_v39, %s767_s14  ;;  %286 = vrot.lane.b32.xlu0 %v285_v40, %s767_s14 }
  0x42   :  { %316 = vrot.lane.b32.xlu1 %v315_v43, %s767_s14  ;;  %306 = vrot.lane.b32.xlu0 %v305_v1, %s767_s14 }
  0x46   :  { %336 = vrot.lane.b32.xlu1 %v836_v20, %s767_s14  ;;  %326 = vrot.lane.b32.xlu0 %v848_v24, %s767_s14 }
  0x4a   :  { %356 = vrot.lane.b32.xlu1 %v852_v25, %s767_s14  ;;  %346 = vrot.lane.b32.xlu0 %v865_v29, %s767_s14 }
  0x4e   :  { %376 = vrot.lane.b32.xlu1 %v869_v30, %s767_s14  ;;  %366 = vrot.lane.b32.xlu0 %v873_v31, %s767_s14 }
  0x52   :  { %396 = vrot.lane.b32.xlu1 %v889_v36, %s767_s14  ;;  %386 = vrot.lane.b32.xlu0 %v893_v37, %s767_s14 }
  0x56   :  { %416 = vrot.lane.b32.xlu1 %v897_v38, %s767_s14  ;;  %406 = vrot.lane.b32.xlu0 %v917_v44, %s767_s14 }
  0x5a   :  { %436 = vrot.lane.b32.xlu1 %v921_v45, %s767_s14  ;;  %426 = vrot.lane.b32.xlu0 %v925_v46, %s767_s14 }
  0x5e   :  { %456 = vrot.lane.b32.xlu1 %v937_v50, %s767_s14  ;;  %446 = vrot.lane.b32.xlu0 %v941_v51, %s767_s14 }
  0x62   :  { %476 = vrot.lane.b32.xlu1 %v954_v55, %s767_s14  ;;  %466 = vrot.lane.b32.xlu0 %v958_v56, %s767_s14 }
  0x66   :  { %496 = vrot.lane.b32.xlu1 %v962_v57, %s767_s14  ;;  %486 = vrot.lane.b32.xlu0 %v975_v61, %s767_s14 }
  0x6a   :  { %516 = vrot.lane.b32.xlu1 %v979_v62, %s767_s14  ;;  %506 = vrot.lane.b32.xlu0 %v983_v63, %s767_s14 }
  0x6e   :  { %536 = vrot.lane.b32.xlu1 %v1006_v7, %s767_s14  ;;  %526 = vrot.lane.b32.xlu0 %v1010_v8, %s767_s14 }
  0x72   :  { %556 = vrot.lane.b32.xlu1 %v1014_v9, %s767_s14  ;;  %546 = vrot.lane.b32.xlu0 %v1026_v13, %s767_s14 }
  0x76   :  { %576 = vrot.lane.b32.xlu1 %v1030_v14, %s767_s14  ;;  %566 = vrot.lane.b32.xlu0 %v1043_v18, %s767_s14 }
  0x78   :  { %v27_v20 = vpop.permute.xlu1 %26  ;;  %v8_v24 = vpop.permute.xlu0 %7 }
  0x79   :  { %643 = vst [vmem:[%s1454_s1 + $0x8] sm:$0xff] %v27_v20  ;;  %9 = vst [vmem:[%s1454_s1] sm:$0xff] %v8_v24 }
  0x7a   :  { %596 = vrot.lane.b32.xlu1 %v1047_v19, %s767_s14  ;;  %586 = vrot.lane.b32.xlu0 %v1051_v21, %s767_s14 }
  0x7c   :  { %v37_v25 = vpop.permute.xlu1 %36  ;;  %v17_v29 = vpop.permute.xlu0 %16 }
  0x7d   :  { %645 = vst [vmem:[%s1454_s1 + $0x108] sm:$0xff] %v37_v25  ;;  %641 = vst [vmem:[%s1454_s1 + $0x100] sm:$0xff] %v17_v29 }
  0x7e   :  { %616 = vrot.lane.b32.xlu1 %v1064_v27, %s767_s14  ;;  %606 = vrot.lane.b32.xlu0 %v1068_v28, %s767_s14 }
  0x80   :  { %v57_v30 = vpop.permute.xlu1 %56  ;;  %v47_v31 = vpop.permute.xlu0 %46 }
  0x81   :  { %649 = vst [vmem:[%s1454_s1 + $0x110] sm:$0xff] %v57_v30  ;;  %647 = vst [vmem:[%s1454_s1 + $0x10] sm:$0xff] %v47_v31 }
  0x82   :  { %636 = vrot.lane.b32.xlu1 %v1072_v32, %s767_s14  ;;  %626 = vrot.lane.b32.xlu0 %v1081_v34, %s767_s14 }
  0x84   :  { %v77_v36 = vpop.permute.xlu1 %76  ;;  %v67_v37 = vpop.permute.xlu0 %66 }
  0x85   :  { %653 = vst [vmem:[%s1454_s1 + $0x118] sm:$0xff] %v77_v36  ;;  %651 = vst [vmem:[%s1454_s1 + $0x18] sm:$0xff] %v67_v37 }
  0x88   :  { %v97_v38 = vpop.permute.xlu1 %96  ;;  %v87_v44 = vpop.permute.xlu0 %86 }
  0x89   :  { %657 = vst [vmem:[%s1454_s1 + $0x120] sm:$0xff] %v97_v38  ;;  %655 = vst [vmem:[%s1454_s1 + $0x20] sm:$0xff] %v87_v44 }
  0x8c   :  { %v117_v45 = vpop.permute.xlu1 %116  ;;  %v107_v46 = vpop.permute.xlu0 %106 }
  0x8d   :  { %661 = vst [vmem:[%s1454_s1 + $0x128] sm:$0xff] %v117_v45  ;;  %659 = vst [vmem:[%s1454_s1 + $0x28] sm:$0xff] %v107_v46 }
  0x90   :  { %v137_v50 = vpop.permute.xlu1 %136  ;;  %v127_v51 = vpop.permute.xlu0 %126 }
  0x91   :  { %665 = vst [vmem:[%s1454_s1 + $0x130] sm:$0xff] %v137_v50  ;;  %663 = vst [vmem:[%s1454_s1 + $0x30] sm:$0xff] %v127_v51 }
  0x94   :  { %v157_v55 = vpop.permute.xlu1 %156  ;;  %v147_v56 = vpop.permute.xlu0 %146 }
  0x95   :  { %669 = vst [vmem:[%s1454_s1 + $0x138] sm:$0xff] %v157_v55  ;;  %667 = vst [vmem:[%s1454_s1 + $0x38] sm:$0xff] %v147_v56 }
  0x98   :  { %v177_v57 = vpop.permute.xlu1 %176  ;;  %v167_v61 = vpop.permute.xlu0 %166 }
  0x99   :  { %673 = vst [vmem:[%s1454_s1 + $0x140] sm:$0xff] %v177_v57  ;;  %671 = vst [vmem:[%s1454_s1 + $0x40] sm:$0xff] %v167_v61 }
  0x9c   :  { %v197_v62 = vpop.permute.xlu1 %196  ;;  %v187_v63 = vpop.permute.xlu0 %186 }
  0x9d   :  { %677 = vst [vmem:[%s1454_s1 + $0x148] sm:$0xff] %v197_v62  ;;  %675 = vst [vmem:[%s1454_s1 + $0x48] sm:$0xff] %v187_v63 }
  0xa0   :  { %v217_v7 = vpop.permute.xlu1 %216  ;;  %v207_v8 = vpop.permute.xlu0 %206 }
  0xa1   :  { %681 = vst [vmem:[%s1454_s1 + $0x150] sm:$0xff] %v217_v7  ;;  %679 = vst [vmem:[%s1454_s1 + $0x50] sm:$0xff] %v207_v8 }
  0xa4   :  { %v237_v9 = vpop.permute.xlu1 %236  ;;  %v227_v13 = vpop.permute.xlu0 %226 }
  0xa5   :  { %685 = vst [vmem:[%s1454_s1 + $0x158] sm:$0xff] %v237_v9  ;;  %683 = vst [vmem:[%s1454_s1 + $0x58] sm:$0xff] %v227_v13 }
  0xa8   :  { %v257_v14 = vpop.permute.xlu1 %256  ;;  %v247_v18 = vpop.permute.xlu0 %246 }
  0xa9   :  { %689 = vst [vmem:[%s1454_s1 + $0x160] sm:$0xff] %v257_v14  ;;  %687 = vst [vmem:[%s1454_s1 + $0x60] sm:$0xff] %v247_v18 }
  0xac   :  { %v277_v19 = vpop.permute.xlu1 %276  ;;  %v267_v21 = vpop.permute.xlu0 %266 }
  0xad   :  { %693 = vst [vmem:[%s1454_s1 + $0x168] sm:$0xff] %v277_v19  ;;  %691 = vst [vmem:[%s1454_s1 + $0x68] sm:$0xff] %v267_v21 }
  0xb0   :  { %v297_v27 = vpop.permute.xlu1 %296  ;;  %v287_v28 = vpop.permute.xlu0 %286 }
  0xb1   :  { %697 = vst [vmem:[%s1454_s1 + $0x170] sm:$0xff] %v297_v27  ;;  %695 = vst [vmem:[%s1454_s1 + $0x70] sm:$0xff] %v287_v28 }
  0xb4   :  { %v317_v32 = vpop.permute.xlu1 %316  ;;  %v307_v34 = vpop.permute.xlu0 %306 }
  0xb5   :  { %701 = vst [vmem:[%s1454_s1 + $0x178] sm:$0xff] %v317_v32  ;;  %699 = vst [vmem:[%s1454_s1 + $0x78] sm:$0xff] %v307_v34 }
  0xb8   :  { %v337_v47 = vpop.permute.xlu1 %336  ;;  %v327_v48 = vpop.permute.xlu0 %326 }
  0xb9   :  { %705 = vst [vmem:[%s1454_s1 + $0x180] sm:$0xff] %v337_v47  ;;  %703 = vst [vmem:[%s1454_s1 + $0x80] sm:$0xff] %v327_v48 }
  0xbc   :  { %v357_v49 = vpop.permute.xlu1 %356  ;;  %v347_v52 = vpop.permute.xlu0 %346 }
  0xbd   :  { %709 = vst [vmem:[%s1454_s1 + $0x188] sm:$0xff] %v357_v49  ;;  %707 = vst [vmem:[%s1454_s1 + $0x88] sm:$0xff] %v347_v52 }
  0xc0   :  { %v377_v53 = vpop.permute.xlu1 %376  ;;  %v367_v54 = vpop.permute.xlu0 %366 }
  0xc1   :  { %713 = vst [vmem:[%s1454_s1 + $0x190] sm:$0xff] %v377_v53  ;;  %711 = vst [vmem:[%s1454_s1 + $0x90] sm:$0xff] %v367_v54 }
  0xc4   :  { %v397_v58 = vpop.permute.xlu1 %396  ;;  %v387_v59 = vpop.permute.xlu0 %386 }
  0xc5   :  { %717 = vst [vmem:[%s1454_s1 + $0x198] sm:$0xff] %v397_v58  ;;  %715 = vst [vmem:[%s1454_s1 + $0x98] sm:$0xff] %v387_v59 }
  0xc8   :  { %v417_v60 = vpop.permute.xlu1 %416  ;;  %v407_v0 = vpop.permute.xlu0 %406 }
  0xc9   :  { %721 = vst [vmem:[%s1454_s1 + $0x1a0] sm:$0xff] %v417_v60  ;;  %719 = vst [vmem:[%s1454_s1 + $0xa0] sm:$0xff] %v407_v0 }
  0xcc   :  { %v437_v2 = vpop.permute.xlu1 %436  ;;  %v427_v3 = vpop.permute.xlu0 %426 }
  0xcd   :  { %725 = vst [vmem:[%s1454_s1 + $0x1a8] sm:$0xff] %v437_v2  ;;  %723 = vst [vmem:[%s1454_s1 + $0xa8] sm:$0xff] %v427_v3 }
  0xd0   :  { %v457_v4 = vpop.permute.xlu1 %456  ;;  %v447_v5 = vpop.permute.xlu0 %446 }
  0xd1   :  { %729 = vst [vmem:[%s1454_s1 + $0x1b0] sm:$0xff] %v457_v4  ;;  %727 = vst [vmem:[%s1454_s1 + $0xb0] sm:$0xff] %v447_v5 }
  0xd4   :  { %v477_v6 = vpop.permute.xlu1 %476  ;;  %v467_v10 = vpop.permute.xlu0 %466 }
  0xd5   :  { %733 = vst [vmem:[%s1454_s1 + $0x1b8] sm:$0xff] %v477_v6  ;;  %731 = vst [vmem:[%s1454_s1 + $0xb8] sm:$0xff] %v467_v10 }
  0xd8   :  { %v497_v11 = vpop.permute.xlu1 %496  ;;  %v487_v12 = vpop.permute.xlu0 %486 }
  0xd9   :  { %737 = vst [vmem:[%s1454_s1 + $0x1c0] sm:$0xff] %v497_v11  ;;  %735 = vst [vmem:[%s1454_s1 + $0xc0] sm:$0xff] %v487_v12 }
  0xdc   :  { %v517_v15 = vpop.permute.xlu1 %516  ;;  %v507_v16 = vpop.permute.xlu0 %506 }
  0xdd   :  { %741 = vst [vmem:[%s1454_s1 + $0x1c8] sm:$0xff] %v517_v15  ;;  %739 = vst [vmem:[%s1454_s1 + $0xc8] sm:$0xff] %v507_v16 }
  0xe0   :  { %v537_v17 = vpop.permute.xlu1 %536  ;;  %v527_v22 = vpop.permute.xlu0 %526 }
  0xe1   :  { %745 = vst [vmem:[%s1454_s1 + $0x1d0] sm:$0xff] %v537_v17  ;;  %743 = vst [vmem:[%s1454_s1 + $0xd0] sm:$0xff] %v527_v22 }
  0xe4   :  { %v557_v23 = vpop.permute.xlu1 %556  ;;  %v547_v26 = vpop.permute.xlu0 %546 }
  0xe5   :  { %749 = vst [vmem:[%s1454_s1 + $0x1d8] sm:$0xff] %v557_v23  ;;  %747 = vst [vmem:[%s1454_s1 + $0xd8] sm:$0xff] %v547_v26 }
  0xe8   :  { %v577_v33 = vpop.permute.xlu1 %576  ;;  %v567_v35 = vpop.permute.xlu0 %566 }
  0xe9   :  { %753 = vst [vmem:[%s1454_s1 + $0x1e0] sm:$0xff] %v577_v33  ;;  %751 = vst [vmem:[%s1454_s1 + $0xe0] sm:$0xff] %v567_v35 }
  0xec   :  { %v597_v39 = vpop.permute.xlu1 %596  ;;  %v587_v40 = vpop.permute.xlu0 %586 }
  0xed   :  { %757 = vst [vmem:[%s1454_s1 + $0x1e8] sm:$0xff] %v597_v39  ;;  %755 = vst [vmem:[%s1454_s1 + $0xe8] sm:$0xff] %v587_v40 }
  0xf0   :  { %v617_v41 = vpop.permute.xlu1 %616  ;;  %v607_v42 = vpop.permute.xlu0 %606 }
  0xf1   :  { %761 = vst [vmem:[%s1454_s1 + $0x1f0] sm:$0xff] %v617_v41  ;;  %759 = vst [vmem:[%s1454_s1 + $0xf0] sm:$0xff] %v607_v42 }
  0xf4   :  { %v637_v43 = vpop.permute.xlu1 %636  ;;  %v627_v1 = vpop.permute.xlu0 %626 }
  0xf5   :  { %765 = vst [vmem:[%s1454_s1 + $0x1f8] sm:$0xff] %v637_v43  ;;  %763 = vst [vmem:[%s1454_s1 + $0xf8] sm:$0xff] %v627_v1 }

// kernel: split.1
= control target key start
LH: loop header
LB: loop body
LE: loop exit
PB: predicated region body
PF: predicated region fallthrough
CT: control target
= control target key end

     0   :  { %v3_v0 = vlaneseq  ;;  %s767_s14 = smov 125   ;;  %s1453_s0 = inlined_call_operand.vmem [shape: f32[2,256,9], index: 0, kind: input, shape index: {}]   ;;  %s1454_s1 = inlined_call_operand.vmem [shape: f32[2,256,4], index: 1, kind: output, shape index: {}]  }
   0x1   :  { %v642_v2 = vld [vmem:[%s1453_s0 + $0x8] sm:$0xff]  ;;  %v2_v3 = vld [vmem:[%s1453_s0] sm:$0xff]  ;;  %v648_v10 = vld [vmem:[%s1453_s0 + $0x110] sm:$0xff] }
   0x2   :  { %v778_v1 = vand.u32 127, %v3_v0  ;;  %v644_v4 = vld [vmem:[%s1453_s0 + $0x108] sm:$0xff]  ;;  %v640_v5 = vld [vmem:[%s1453_s0 + $0x100] sm:$0xff]  ;;  %v646_v11 = vld [vmem:[%s1453_s0 + $0x10] sm:$0xff] }
   0x3   :  { %v652_v14 = vld [vmem:[%s1453_s0 + $0x118] sm:$0xff]  ;;  %v656_v16 = vld [vmem:[%s1453_s0 + $0x120] sm:$0xff]  ;;  %v708_v22 = vld [vmem:[%s1453_s0 + $0x188] sm:$0xff] }
   0x4   :  { %vm5_vm0 = vcmp.lt.s32.totalorder %v778_v1, 3  ;;  %v650_v15 = vld [vmem:[%s1453_s0 + $0x18] sm:$0xff]  ;;  %v704_v17 = vld [vmem:[%s1453_s0 + $0x180] sm:$0xff]  ;;  %v706_v26 = vld [vmem:[%s1453_s0 + $0x88] sm:$0xff] }
   0x5   :  { %v25_v6 = vsel %vm5_vm0, 0, %v642_v2  ;;  %v6_v7 = vsel %vm5_vm0, 0, %v2_v3  ;;  %v35_v8 = vsel %vm5_vm0, 0, %v644_v4  ;;  %v15_v9 = vsel %vm5_vm0, 0, %v640_v5  ;;  %v654_v19 = vld [vmem:[%s1453_s0 + $0x20] sm:$0xff]  ;;  %v712_v27 = vld [vmem:[%s1453_s0 + $0x190] sm:$0xff] }
   0x6   :  { %26 = vrot.lane.b32.xlu1 %v25_v6, %s767_s14  ;;  %7 = vrot.lane.b32.xlu0 %v6_v7, %s767_s14  ;;  %v55_v12 = vsel %vm5_vm0, 0, %v648_v10  ;;  %v45_v13 = vsel %vm5_vm0, 0, %v646_v11  ;;  %v75_v18 = vsel %vm5_vm0, 0, %v652_v14  ;;  %v836_v20 = vsel %vm5_vm0, 0, %v704_v17  ;;  %v702_v21 = vld [vmem:[%s1453_s0 + $0x80] sm:$0xff]  ;;  %v710_v28 = vld [vmem:[%s1453_s0 + $0x90] sm:$0xff] }
   0x7   :  { %v65_v23 = vsel %vm5_vm0, 0, %v650_v15  ;;  %v848_v24 = vsel %vm5_vm0, 0, %v702_v21  ;;  %v852_v25 = vsel %vm5_vm0, 0, %v708_v22  ;;  %v865_v29 = vsel %vm5_vm0, 0, %v706_v26  ;;  %v716_v32 = vld [vmem:[%s1453_s0 + $0x198] sm:$0xff]  ;;  %v720_v34 = vld [vmem:[%s1453_s0 + $0x1a0] sm:$0xff] }
   0x8   :  { %v869_v30 = vsel %vm5_vm0, 0, %v712_v27  ;;  %v873_v31 = vsel %vm5_vm0, 0, %v710_v28  ;;  %v714_v33 = vld [vmem:[%s1453_s0 + $0x98] sm:$0xff]  ;;  %v660_v35 = vld [vmem:[%s1453_s0 + $0x128] sm:$0xff]  ;;  %v889_v36 = vsel %vm5_vm0, 0, %v716_v32  ;;  %v897_v38 = vsel %vm5_vm0, 0, %v720_v34 }
   0x9   :  { %v893_v37 = vsel %vm5_vm0, 0, %v714_v33  ;;  %v718_v39 = vld [vmem:[%s1453_s0 + $0xa0] sm:$0xff]  ;;  %v724_v40 = vld [vmem:[%s1453_s0 + $0x1a8] sm:$0xff]  ;;  %v95_v42 = vsel %vm5_vm0, 0, %v656_v16  ;;  %v728_v47 = vld [vmem:[%s1453_s0 + $0x1b0] sm:$0xff]  ;;  %v85_v49 = vsel %vm5_vm0, 0, %v654_v19 }
   0xa   :  { %36 = vrot.lane.b32.xlu1 %v35_v8, %s767_s14  ;;  %16 = vrot.lane.b32.xlu0 %v15_v9, %s767_s14  ;;  %v722_v41 = vld [vmem:[%s1453_s0 + $0xa8] sm:$0xff]  ;;  %v917_v44 = vsel %vm5_vm0, 0, %v718_v39  ;;  %v921_v45 = vsel %vm5_vm0, 0, %v724_v40  ;;  %v726_v48 = vld [vmem:[%s1453_s0 + $0xb0] sm:$0xff]  ;;  %v937_v50 = vsel %vm5_vm0, 0, %v728_v47  ;;  %v115_v4 = vsel %vm5_vm0, 0, %v660_v35 }
   0xb   :  { %v658_v43 = vld [vmem:[%s1453_s0 + $0x28] sm:$0xff]  ;;  %v925_v46 = vsel %vm5_vm0, 0, %v722_v41  ;;  %v941_v51 = vsel %vm5_vm0, 0, %v726_v48  ;;  %v732_v52 = vld [vmem:[%s1453_s0 + $0x1b8] sm:$0xff]  ;;  %v736_v54 = vld [vmem:[%s1453_s0 + $0x1c0] sm:$0xff] }
   0xc   :  { %v730_v53 = vld [vmem:[%s1453_s0 + $0xb8] sm:$0xff]  ;;  %v954_v55 = vsel %vm5_vm0, 0, %v732_v52  ;;  %v962_v57 = vsel %vm5_vm0, 0, %v736_v54  ;;  %v734_v58 = vld [vmem:[%s1453_s0 + $0xc0] sm:$0xff]  ;;  %v740_v59 = vld [vmem:[%s1453_s0 + $0x1c8] sm:$0xff] }
   0xd   :  { %v958_v56 = vsel %vm5_vm0, 0, %v730_v53  ;;  %v738_v60 = vld [vmem:[%s1453_s0 + $0xc8] sm:$0xff]  ;;  %v975_v61 = vsel %vm5_vm0, 0, %v734_v58  ;;  %v979_v62 = vsel %vm5_vm0, 0, %v740_v59  ;;  %v744_v0 = vld [vmem:[%s1453_s0 + $0x1d0] sm:$0xff]  ;;  %v748_v3 = vld [vmem:[%s1453_s0 + $0x1d8] sm:$0xff] }
   0xe   :  { %56 = vrot.lane.b32.xlu1 %v55_v12, %s767_s14  ;;  %46 = vrot.lane.b32.xlu0 %v45_v13, %s767_s14  ;;  %v983_v63 = vsel %vm5_vm0, 0, %v738_v60  ;;  %v742_v2 = vld [vmem:[%s1453_s0 + $0xd0] sm:$0xff]  ;;  %v1006_v7 = vsel %vm5_vm0, 0, %v744_v0  ;;  %v1014_v9 = vsel %vm5_vm0, 0, %v748_v3  ;;  %v746_v10 = vld [vmem:[%s1453_s0 + $0xd8] sm:$0xff]  ;;  %v105_v12 = vsel %vm5_vm0, 0, %v658_v43 }
   0xf   :  { %v664_v5 = vld [vmem:[%s1453_s0 + $0x130] sm:$0xff]  ;;  %v1010_v8 = vsel %vm5_vm0, 0, %v742_v2  ;;  %v752_v11 = vld [vmem:[%s1453_s0 + $0x1e0] sm:$0xff]  ;;  %v1026_v13 = vsel %vm5_vm0, 0, %v746_v10  ;;  %v756_v16 = vld [vmem:[%s1453_s0 + $0x1e8] sm:$0xff] }
  0x10   :  { %v662_v6 = vld [vmem:[%s1453_s0 + $0x30] sm:$0xff]  ;;  %v1030_v14 = vsel %vm5_vm0, 0, %v752_v11  ;;  %v750_v15 = vld [vmem:[%s1453_s0 + $0xe0] sm:$0xff]  ;;  %v754_v17 = vld [vmem:[%s1453_s0 + $0xe8] sm:$0xff]  ;;  %v1047_v19 = vsel %vm5_vm0, 0, %v756_v16  ;;  %v135_v35 = vsel %vm5_vm0, 0, %v664_v5 }
  0x11   :  { %v1051_v21 = vsel %vm5_vm0, 0, %v754_v17  ;;  %v760_v22 = vld [vmem:[%s1453_s0 + $0x1f0] sm:$0xff]  ;;  %v764_v26 = vld [vmem:[%s1453_s0 + $0x1f8] sm:$0xff]  ;;  %v125_v39 = vsel %vm5_vm0, 0, %v662_v6  ;;  %v672_v47 = vld [vmem:[%s1453_s0 + $0x140] sm:$0xff] }
  0x12   :  { %76 = vrot.lane.b32.xlu1 %v75_v18, %s767_s14  ;;  %66 = vrot.lane.b32.xlu0 %v65_v23, %s767_s14  ;;  %v1043_v18 = vsel %vm5_vm0, 0, %v750_v15  ;;  %v758_v23 = vld [vmem:[%s1453_s0 + $0xf0] sm:$0xff]  ;;  %v1064_v27 = vsel %vm5_vm0, 0, %v760_v22  ;;  %v1072_v32 = vsel %vm5_vm0, 0, %v764_v26  ;;  %v762_v33 = vld [vmem:[%s1453_s0 + $0xf8] sm:$0xff] }
  0x13   :  { %v1068_v28 = vsel %vm5_vm0, 0, %v758_v23  ;;  %v1081_v34 = vsel %vm5_vm0, 0, %v762_v33  ;;  %v668_v40 = vld [vmem:[%s1453_s0 + $0x138] sm:$0xff]  ;;  %v670_v48 = vld [vmem:[%s1453_s0 + $0x40] sm:$0xff]  ;;  %v676_v53 = vld [vmem:[%s1453_s0 + $0x148] sm:$0xff] }
  0x14   :  { %v666_v41 = vld [vmem:[%s1453_s0 + $0x38] sm:$0xff]  ;;  %v165_v52 = vsel %vm5_vm0, 0, %v670_v48  ;;  %v674_v54 = vld [vmem:[%s1453_s0 + $0x48] sm:$0xff]  ;;  %v195_v58 = vsel %vm5_vm0, 0, %v676_v53  ;;  %v680_v60 = vld [vmem:[%s1453_s0 + $0x150] sm:$0xff] }
  0x15   :  { %v145_v43 = vsel %vm5_vm0, 0, %v666_v41  ;;  %v185_v59 = vsel %vm5_vm0, 0, %v674_v54  ;;  %v678_v0 = vld [vmem:[%s1453_s0 + $0x50] sm:$0xff]  ;;  %v215_v2 = vsel %vm5_vm0, 0, %v680_v60  ;;  %v682_v5 = vld [vmem:[%s1453_s0 + $0x58] sm:$0xff]  ;;  %v688_v11 = vld [vmem:[%s1453_s0 + $0x160] sm:$0xff] }
  0x16   :  { %96 = vrot.lane.b32.xlu1 %v95_v42, %s767_s14  ;;  %86 = vrot.lane.b32.xlu0 %v85_v49, %s767_s14  ;;  %v155_v42 = vsel %vm5_vm0, 0, %v668_v40  ;;  %v175_v49 = vsel %vm5_vm0, 0, %v672_v47  ;;  %v205_v3 = vsel %vm5_vm0, 0, %v678_v0  ;;  %v225_v10 = vsel %vm5_vm0, 0, %v682_v5  ;;  %v692_v17 = vld [vmem:[%s1453_s0 + $0x168] sm:$0xff]  ;;  %v696_v33 = vld [vmem:[%s1453_s0 + $0x170] sm:$0xff] }
  0x17   :  { %v255_v15 = vsel %vm5_vm0, 0, %v688_v11  ;;  %v690_v22 = vld [vmem:[%s1453_s0 + $0x68] sm:$0xff]  ;;  %v275_v23 = vsel %vm5_vm0, 0, %v692_v17  ;;  %v700_v41 = vld [vmem:[%s1453_s0 + $0x178] sm:$0xff] }
  0x18   :  { %v265_v26 = vsel %vm5_vm0, 0, %v690_v22 }
  0x1a   :  { %116 = vrot.lane.b32.xlu1 %v115_v4, %s767_s14  ;;  %106 = vrot.lane.b32.xlu0 %v105_v12, %s767_s14  ;;  %v684_v4 = vld [vmem:[%s1453_s0 + $0x158] sm:$0xff]  ;;  %v686_v12 = vld [vmem:[%s1453_s0 + $0x60] sm:$0xff] }
  0x1b   :  { %v235_v6 = vsel %vm5_vm0, 0, %v684_v4  ;;  %v245_v16 = vsel %vm5_vm0, 0, %v686_v12 }
  0x1e   :  { %136 = vrot.lane.b32.xlu1 %v135_v35, %s767_s14  ;;  %126 = vrot.lane.b32.xlu0 %v125_v39, %s767_s14  ;;  %v694_v35 = vld [vmem:[%s1453_s0 + $0x70] sm:$0xff]  ;;  %v295_v39 = vsel %vm5_vm0, 0, %v696_v33 }
  0x1f   :  { %v285_v40 = vsel %vm5_vm0, 0, %v694_v35 }
  0x22   :  { %156 = vrot.lane.b32.xlu1 %v155_v42, %s767_s14  ;;  %146 = vrot.lane.b32.xlu0 %v145_v43, %s767_s14  ;;  %v698_v42 = vld [vmem:[%s1453_s0 + $0x78] sm:$0xff]  ;;  %v315_v43 = vsel %vm5_vm0, 0, %v700_v41 }
  0x23   :  { %v305_v1 = vsel %vm5_vm0, 0, %v698_v42 }
  0x26   :  { %176 = vrot.lane.b32.xlu1 %v175_v49, %s767_s14  ;;  %166 = vrot.lane.b32.xlu0 %v165_v52, %s767_s14 }
  0x2a   :  { %196 = vrot.lane.b32.xlu1 %v195_v58, %s767_s14  ;;  %186 = vrot.lane.b32.xlu0 %v185_v59, %s767_s14 }
  0x2e   :  { %216 = vrot.lane.b32.xlu1 %v215_v2, %s767_s14  ;;  %206 = vrot.lane.b32.xlu0 %v205_v3, %s767_s14 }
  0x32   :  { %236 = vrot.lane.b32.xlu1 %v235_v6, %s767_s14  ;;  %226 = vrot.lane.b32.xlu0 %v225_v10, %s767_s14 }
  0x36   :  { %256 = vrot.lane.b32.xlu1 %v255_v15, %s767_s14  ;;  %246 = vrot.lane.b32.xlu0 %v245_v16, %s767_s14 }
  0x3a   :  { %276 = vrot.lane.b32.xlu1 %v275_v23, %s767_s14  ;;  %266 = vrot.lane.b32.xlu0 %v265_v26, %s767_s14 }
  0x3e   :  { %296 = vrot.lane.b32.xlu1 %v295_v39, %s767_s14  ;;  %286 = vrot.lane.b32.xlu0 %v285_v40, %s767_s14 }
  0x42   :  { %316 = vrot.lane.b32.xlu1 %v315_v43, %s767_s14  ;;  %306 = vrot.lane.b32.xlu0 %v305_v1, %s767_s14 }
  0x46   :  { %336 = vrot.lane.b32.xlu1 %v836_v20, %s767_s14  ;;  %326 = vrot.lane.b32.xlu0 %v848_v24, %s767_s14 }
  0x4a   :  { %356 = vrot.lane.b32.xlu1 %v852_v25, %s767_s14  ;;  %346 = vrot.lane.b32.xlu0 %v865_v29, %s767_s14 }
  0x4e   :  { %376 = vrot.lane.b32.xlu1 %v869_v30, %s767_s14  ;;  %366 = vrot.lane.b32.xlu0 %v873_v31, %s767_s14 }
  0x52   :  { %396 = vrot.lane.b32.xlu1 %v889_v36, %s767_s14  ;;  %386 = vrot.lane.b32.xlu0 %v893_v37, %s767_s14 }
  0x56   :  { %416 = vrot.lane.b32.xlu1 %v897_v38, %s767_s14  ;;  %406 = vrot.lane.b32.xlu0 %v917_v44, %s767_s14 }
  0x5a   :  { %436 = vrot.lane.b32.xlu1 %v921_v45, %s767_s14  ;;  %426 = vrot.lane.b32.xlu0 %v925_v46, %s767_s14 }
  0x5e   :  { %456 = vrot.lane.b32.xlu1 %v937_v50, %s767_s14  ;;  %446 = vrot.lane.b32.xlu0 %v941_v51, %s767_s14 }
  0x62   :  { %476 = vrot.lane.b32.xlu1 %v954_v55, %s767_s14  ;;  %466 = vrot.lane.b32.xlu0 %v958_v56, %s767_s14 }
  0x66   :  { %496 = vrot.lane.b32.xlu1 %v962_v57, %s767_s14  ;;  %486 = vrot.lane.b32.xlu0 %v975_v61, %s767_s14 }
  0x6a   :  { %516 = vrot.lane.b32.xlu1 %v979_v62, %s767_s14  ;;  %506 = vrot.lane.b32.xlu0 %v983_v63, %s767_s14 }
  0x6e   :  { %536 = vrot.lane.b32.xlu1 %v1006_v7, %s767_s14  ;;  %526 = vrot.lane.b32.xlu0 %v1010_v8, %s767_s14 }
  0x72   :  { %556 = vrot.lane.b32.xlu1 %v1014_v9, %s767_s14  ;;  %546 = vrot.lane.b32.xlu0 %v1026_v13, %s767_s14 }
  0x76   :  { %576 = vrot.lane.b32.xlu1 %v1030_v14, %s767_s14  ;;  %566 = vrot.lane.b32.xlu0 %v1043_v18, %s767_s14 }
  0x78   :  { %v27_v20 = vpop.permute.xlu1 %26  ;;  %v8_v24 = vpop.permute.xlu0 %7 }
  0x79   :  { %643 = vst [vmem:[%s1454_s1 + $0x8] sm:$0xff] %v27_v20  ;;  %9 = vst [vmem:[%s1454_s1] sm:$0xff] %v8_v24 }
  0x7a   :  { %596 = vrot.lane.b32.xlu1 %v1047_v19, %s767_s14  ;;  %586 = vrot.lane.b32.xlu0 %v1051_v21, %s767_s14 }
  0x7c   :  { %v37_v25 = vpop.permute.xlu1 %36  ;;  %v17_v29 = vpop.permute.xlu0 %16 }
  0x7d   :  { %645 = vst [vmem:[%s1454_s1 + $0x108] sm:$0xff] %v37_v25  ;;  %641 = vst [vmem:[%s1454_s1 + $0x100] sm:$0xff] %v17_v29 }
  0x7e   :  { %616 = vrot.lane.b32.xlu1 %v1064_v27, %s767_s14  ;;  %606 = vrot.lane.b32.xlu0 %v1068_v28, %s767_s14 }
  0x80   :  { %v57_v30 = vpop.permute.xlu1 %56  ;;  %v47_v31 = vpop.permute.xlu0 %46 }
  0x81   :  { %649 = vst [vmem:[%s1454_s1 + $0x110] sm:$0xff] %v57_v30  ;;  %647 = vst [vmem:[%s1454_s1 + $0x10] sm:$0xff] %v47_v31 }
  0x82   :  { %636 = vrot.lane.b32.xlu1 %v1072_v32, %s767_s14  ;;  %626 = vrot.lane.b32.xlu0 %v1081_v34, %s767_s14 }
  0x84   :  { %v77_v36 = vpop.permute.xlu1 %76  ;;  %v67_v37 = vpop.permute.xlu0 %66 }
  0x85   :  { %653 = vst [vmem:[%s1454_s1 + $0x118] sm:$0xff] %v77_v36  ;;  %651 = vst [vmem:[%s1454_s1 + $0x18] sm:$0xff] %v67_v37 }
  0x88   :  { %v97_v38 = vpop.permute.xlu1 %96  ;;  %v87_v44 = vpop.permute.xlu0 %86 }
  0x89   :  { %657 = vst [vmem:[%s1454_s1 + $0x120] sm:$0xff] %v97_v38  ;;  %655 = vst [vmem:[%s1454_s1 + $0x20] sm:$0xff] %v87_v44 }
  0x8c   :  { %v117_v45 = vpop.permute.xlu1 %116  ;;  %v107_v46 = vpop.permute.xlu0 %106 }
  0x8d   :  { %661 = vst [vmem:[%s1454_s1 + $0x128] sm:$0xff] %v117_v45  ;;  %659 = vst [vmem:[%s1454_s1 + $0x28] sm:$0xff] %v107_v46 }
  0x90   :  { %v137_v50 = vpop.permute.xlu1 %136  ;;  %v127_v51 = vpop.permute.xlu0 %126 }
  0x91   :  { %665 = vst [vmem:[%s1454_s1 + $0x130] sm:$0xff] %v137_v50  ;;  %663 = vst [vmem:[%s1454_s1 + $0x30] sm:$0xff] %v127_v51 }
  0x94   :  { %v157_v55 = vpop.permute.xlu1 %156  ;;  %v147_v56 = vpop.permute.xlu0 %146 }
  0x95   :  { %669 = vst [vmem:[%s1454_s1 + $0x138] sm:$0xff] %v157_v55  ;;  %667 = vst [vmem:[%s1454_s1 + $0x38] sm:$0xff] %v147_v56 }
  0x98   :  { %v177_v57 = vpop.permute.xlu1 %176  ;;  %v167_v61 = vpop.permute.xlu0 %166 }
  0x99   :  { %673 = vst [vmem:[%s1454_s1 + $0x140] sm:$0xff] %v177_v57  ;;  %671 = vst [vmem:[%s1454_s1 + $0x40] sm:$0xff] %v167_v61 }
  0x9c   :  { %v197_v62 = vpop.permute.xlu1 %196  ;;  %v187_v63 = vpop.permute.xlu0 %186 }
  0x9d   :  { %677 = vst [vmem:[%s1454_s1 + $0x148] sm:$0xff] %v197_v62  ;;  %675 = vst [vmem:[%s1454_s1 + $0x48] sm:$0xff] %v187_v63 }
  0xa0   :  { %v217_v7 = vpop.permute.xlu1 %216  ;;  %v207_v8 = vpop.permute.xlu0 %206 }
  0xa1   :  { %681 = vst [vmem:[%s1454_s1 + $0x150] sm:$0xff] %v217_v7  ;;  %679 = vst [vmem:[%s1454_s1 + $0x50] sm:$0xff] %v207_v8 }
  0xa4   :  { %v237_v9 = vpop.permute.xlu1 %236  ;;  %v227_v13 = vpop.permute.xlu0 %226 }
  0xa5   :  { %685 = vst [vmem:[%s1454_s1 + $0x158] sm:$0xff] %v237_v9  ;;  %683 = vst [vmem:[%s1454_s1 + $0x58] sm:$0xff] %v227_v13 }
  0xa8   :  { %v257_v14 = vpop.permute.xlu1 %256  ;;  %v247_v18 = vpop.permute.xlu0 %246 }
  0xa9   :  { %689 = vst [vmem:[%s1454_s1 + $0x160] sm:$0xff] %v257_v14  ;;  %687 = vst [vmem:[%s1454_s1 + $0x60] sm:$0xff] %v247_v18 }
  0xac   :  { %v277_v19 = vpop.permute.xlu1 %276  ;;  %v267_v21 = vpop.permute.xlu0 %266 }
  0xad   :  { %693 = vst [vmem:[%s1454_s1 + $0x168] sm:$0xff] %v277_v19  ;;  %691 = vst [vmem:[%s1454_s1 + $0x68] sm:$0xff] %v267_v21 }
  0xb0   :  { %v297_v27 = vpop.permute.xlu1 %296  ;;  %v287_v28 = vpop.permute.xlu0 %286 }
  0xb1   :  { %697 = vst [vmem:[%s1454_s1 + $0x170] sm:$0xff] %v297_v27  ;;  %695 = vst [vmem:[%s1454_s1 + $0x70] sm:$0xff] %v287_v28 }
  0xb4   :  { %v317_v32 = vpop.permute.xlu1 %316  ;;  %v307_v34 = vpop.permute.xlu0 %306 }
  0xb5   :  { %701 = vst [vmem:[%s1454_s1 + $0x178] sm:$0xff] %v317_v32  ;;  %699 = vst [vmem:[%s1454_s1 + $0x78] sm:$0xff] %v307_v34 }
  0xb8   :  { %v337_v47 = vpop.permute.xlu1 %336  ;;  %v327_v48 = vpop.permute.xlu0 %326 }
  0xb9   :  { %705 = vst [vmem:[%s1454_s1 + $0x180] sm:$0xff] %v337_v47  ;;  %703 = vst [vmem:[%s1454_s1 + $0x80] sm:$0xff] %v327_v48 }
  0xbc   :  { %v357_v49 = vpop.permute.xlu1 %356  ;;  %v347_v52 = vpop.permute.xlu0 %346 }
  0xbd   :  { %709 = vst [vmem:[%s1454_s1 + $0x188] sm:$0xff] %v357_v49  ;;  %707 = vst [vmem:[%s1454_s1 + $0x88] sm:$0xff] %v347_v52 }
  0xc0   :  { %v377_v53 = vpop.permute.xlu1 %376  ;;  %v367_v54 = vpop.permute.xlu0 %366 }
  0xc1   :  { %713 = vst [vmem:[%s1454_s1 + $0x190] sm:$0xff] %v377_v53  ;;  %711 = vst [vmem:[%s1454_s1 + $0x90] sm:$0xff] %v367_v54 }
  0xc4   :  { %v397_v58 = vpop.permute.xlu1 %396  ;;  %v387_v59 = vpop.permute.xlu0 %386 }
  0xc5   :  { %717 = vst [vmem:[%s1454_s1 + $0x198] sm:$0xff] %v397_v58  ;;  %715 = vst [vmem:[%s1454_s1 + $0x98] sm:$0xff] %v387_v59 }
  0xc8   :  { %v417_v60 = vpop.permute.xlu1 %416  ;;  %v407_v0 = vpop.permute.xlu0 %406 }
  0xc9   :  { %721 = vst [vmem:[%s1454_s1 + $0x1a0] sm:$0xff] %v417_v60  ;;  %719 = vst [vmem:[%s1454_s1 + $0xa0] sm:$0xff] %v407_v0 }
  0xcc   :  { %v437_v2 = vpop.permute.xlu1 %436  ;;  %v427_v3 = vpop.permute.xlu0 %426 }
  0xcd   :  { %725 = vst [vmem:[%s1454_s1 + $0x1a8] sm:$0xff] %v437_v2  ;;  %723 = vst [vmem:[%s1454_s1 + $0xa8] sm:$0xff] %v427_v3 }
  0xd0   :  { %v457_v4 = vpop.permute.xlu1 %456  ;;  %v447_v5 = vpop.permute.xlu0 %446 }
  0xd1   :  { %729 = vst [vmem:[%s1454_s1 + $0x1b0] sm:$0xff] %v457_v4  ;;  %727 = vst [vmem:[%s1454_s1 + $0xb0] sm:$0xff] %v447_v5 }
  0xd4   :  { %v477_v6 = vpop.permute.xlu1 %476  ;;  %v467_v10 = vpop.permute.xlu0 %466 }
  0xd5   :  { %733 = vst [vmem:[%s1454_s1 + $0x1b8] sm:$0xff] %v477_v6  ;;  %731 = vst [vmem:[%s1454_s1 + $0xb8] sm:$0xff] %v467_v10 }
  0xd8   :  { %v497_v11 = vpop.permute.xlu1 %496  ;;  %v487_v12 = vpop.permute.xlu0 %486 }
  0xd9   :  { %737 = vst [vmem:[%s1454_s1 + $0x1c0] sm:$0xff] %v497_v11  ;;  %735 = vst [vmem:[%s1454_s1 + $0xc0] sm:$0xff] %v487_v12 }
  0xdc   :  { %v517_v15 = vpop.permute.xlu1 %516  ;;  %v507_v16 = vpop.permute.xlu0 %506 }
  0xdd   :  { %741 = vst [vmem:[%s1454_s1 + $0x1c8] sm:$0xff] %v517_v15  ;;  %739 = vst [vmem:[%s1454_s1 + $0xc8] sm:$0xff] %v507_v16 }
  0xe0   :  { %v537_v17 = vpop.permute.xlu1 %536  ;;  %v527_v22 = vpop.permute.xlu0 %526 }
  0xe1   :  { %745 = vst [vmem:[%s1454_s1 + $0x1d0] sm:$0xff] %v537_v17  ;;  %743 = vst [vmem:[%s1454_s1 + $0xd0] sm:$0xff] %v527_v22 }
  0xe4   :  { %v557_v23 = vpop.permute.xlu1 %556  ;;  %v547_v26 = vpop.permute.xlu0 %546 }
  0xe5   :  { %749 = vst [vmem:[%s1454_s1 + $0x1d8] sm:$0xff] %v557_v23  ;;  %747 = vst [vmem:[%s1454_s1 + $0xd8] sm:$0xff] %v547_v26 }
  0xe8   :  { %v577_v33 = vpop.permute.xlu1 %576  ;;  %v567_v35 = vpop.permute.xlu0 %566 }
  0xe9   :  { %753 = vst [vmem:[%s1454_s1 + $0x1e0] sm:$0xff] %v577_v33  ;;  %751 = vst [vmem:[%s1454_s1 + $0xe0] sm:$0xff] %v567_v35 }
  0xec   :  { %v597_v39 = vpop.permute.xlu1 %596  ;;  %v587_v40 = vpop.permute.xlu0 %586 }
  0xed   :  { %757 = vst [vmem:[%s1454_s1 + $0x1e8] sm:$0xff] %v597_v39  ;;  %755 = vst [vmem:[%s1454_s1 + $0xe8] sm:$0xff] %v587_v40 }
  0xf0   :  { %v617_v41 = vpop.permute.xlu1 %616  ;;  %v607_v42 = vpop.permute.xlu0 %606 }
  0xf1   :  { %761 = vst [vmem:[%s1454_s1 + $0x1f0] sm:$0xff] %v617_v41  ;;  %759 = vst [vmem:[%s1454_s1 + $0xf0] sm:$0xff] %v607_v42 }
  0xf4   :  { %v637_v43 = vpop.permute.xlu1 %636  ;;  %v627_v1 = vpop.permute.xlu0 %626 }
  0xf5   :  { %765 = vst [vmem:[%s1454_s1 + $0x1f8] sm:$0xff] %v637_v43  ;;  %763 = vst [vmem:[%s1454_s1 + $0xf8] sm:$0xff] %v627_v1 }

// kernel: _lambda_.1
= control target key start
LH: loop header
LB: loop body
LE: loop exit
PB: predicated region body
PF: predicated region fallthrough
CT: control target
= control target key end

     0   :  { %9 = vsyncpa [#allocation3], 0  ;;  %s4423_s0 = inlined_call_operand.hbm [shape: f32[4,1152], index: 0, kind: input, shape index: {}]   ;;  %s4424_s1 = inlined_call_operand.hbm [shape: f32[4,1152], index: 1, kind: input, shape index: {}]   ;;  %s4425_s2 = inlined_call_operand.hbm [shape: f32[4,128], index: 2, kind: input, shape index: {}]   ;;  %s4426_s3 = inlined_call_operand.hbm [shape: f32[1,1152], index: 3, kind: input, shape index: {}]   ;;  %s4427_s4 = inlined_call_operand.hbm [shape: f32[4,1152], index: 4, kind: output, shape index: {}]  }
   0x1   :  { %10 = vsyncpa [#allocation6], 0 }
   0x2   :  { %11 = vsyncpa [#allocation9], 0 }
   0x3   :  { %12 = vsyncpa [#allocation4], 0  ;;  %s2548_s15 = smov [#allocation5]   ;;  %s2549_s17 = smov [#allocation2]  }
   0x4   :  { %s29_s16 = sshll.u32 %s2548_s15, 4  ;;  %s19_s18 = sshll.u32 %s2549_s17, 4  ;;  %s30_s16 = int_to_ptr.vmem [resolvable:$true] %s29_s16  ;;  %s20_s18 = int_to_ptr.vmem [resolvable:$true] %s19_s18 }
   0x5   :  { %s2430_s21 = scalar_lea.hbm %s4424_s1, 576 }
   0x6   :  { %p2431_p0 = scmp.ne.s32.totalorder %s4424_s1, %s2430_s21  ;;  %p2434_p1 = scmp.lt.u32.totalorder %s2430_s21, %s4424_s1 }
   0x8   :  { %p2436_p2 = pnand %p2434_p1, %p2431_p0 }
   0xa   :  { %2439 = shalt.err (!%p2436_p2)
}
   0xb   :  { %s2440_s26 = scalar_lea.vmem %s30_s16, 576  ;;  %p2445_p4 = scmp.lt.s32.totalorder %s30_s16, %s30_s16 }
   0xc   :  { %p2441_p3 = scmp.ne.s32.totalorder %s30_s16, %s2440_s26  ;;  %p2446_p5 = scmp.lt.s32.totalorder %s2440_s26, %s2440_s26 }
   0xe   :  { %p2447_p6 = por %p2446_p5, %p2445_p4 }
  0x10   :  { %p2448_p7 = pnand %p2447_p6, %p2441_p3 }
  0x12   :  { %2451 = shalt.err (!%p2448_p7)
}
  0x13   :  { %32 = dma.hbm_to_vmem [thread:$0]  %s4424_s1, 576, %s30_s16, [#allocation6]  }
  0x14   :  { %s2452_s5 = scalar_lea.hbm %s4423_s0, 576 }
  0x15   :  { %p2453_p8 = scmp.ne.s32.totalorder %s4423_s0, %s2452_s5  ;;  %p2456_p9 = scmp.lt.u32.totalorder %s2452_s5, %s4423_s0 }
  0x17   :  { %p2458_p10 = pnand %p2456_p9, %p2453_p8 }
  0x19   :  { %2461 = shalt.err (!%p2458_p10)
}
  0x1a   :  { %s2462_s10 = scalar_lea.vmem %s20_s18, 576  ;;  %p2467_p12 = scmp.lt.s32.totalorder %s20_s18, %s20_s18 }
  0x1b   :  { %p2463_p11 = scmp.ne.s32.totalorder %s20_s18, %s2462_s10  ;;  %p2468_p13 = scmp.lt.s32.totalorder %s2462_s10, %s2462_s10 }
  0x1d   :  { %p2469_p0 = por %p2468_p13, %p2467_p12 }
  0x1f   :  { %p2470_p1 = pnand %p2469_p0, %p2463_p11 }
  0x21   :  { %2473 = shalt.err (!%p2470_p1)
}
  0x22   :  { %22 = dma.hbm_to_vmem [thread:$0]  %s4423_s0, 576, %s20_s18, [#allocation3]  }
  0x23   :  { %s2550_s12 = smov [#allocation7]   ;;  %s2551_s14 = smov [#allocation8]  }
  0x24   :  { %s39_s13 = sshll.u32 %s2550_s12, 4  ;;  %s49_s15 = sshll.u32 %s2551_s14, 4  ;;  %s40_s13 = int_to_ptr.vmem [resolvable:$true] %s39_s13  ;;  %s50_s15 = int_to_ptr.vmem [resolvable:$true] %s49_s15 }
  0x25   :  { %s2474_s19 = scalar_lea.hbm %s4425_s2, 64 }
  0x26   :  { %p2475_p2 = scmp.ne.s32.totalorder %s4425_s2, %s2474_s19  ;;  %p2478_p3 = scmp.lt.u32.totalorder %s2474_s19, %s4425_s2 }
  0x28   :  { %p2480_p4 = pnand %p2478_p3, %p2475_p2 }
  0x2a   :  { %2483 = shalt.err (!%p2480_p4)
}
  0x2b   :  { %s2484_s0 = scalar_lea.vmem %s40_s13, 64  ;;  %p2489_p6 = scmp.lt.s32.totalorder %s40_s13, %s40_s13 }
  0x2c   :  { %p2485_p5 = scmp.ne.s32.totalorder %s40_s13, %s2484_s0  ;;  %p2490_p7 = scmp.lt.s32.totalorder %s2484_s0, %s2484_s0 }
  0x2e   :  { %p2491_p8 = por %p2490_p7, %p2489_p6 }
  0x30   :  { %p2492_p9 = pnand %p2491_p8, %p2485_p5 }
  0x32   :  { %2495 = shalt.err (!%p2492_p9)
}
  0x33   :  { %42 = dma.hbm_to_vmem [thread:$0]  %s4425_s2, 64, %s40_s13, [#allocation6]  }
  0x34   :  { %s2496_s27 = scalar_lea.hbm %s4426_s3, 144 }
  0x35   :  { %p2497_p10 = scmp.ne.s32.totalorder %s4426_s3, %s2496_s27  ;;  %p2500_p11 = scmp.lt.u32.totalorder %s2496_s27, %s4426_s3 }
  0x37   :  { %p2502_p12 = pnand %p2500_p11, %p2497_p10 }
  0x39   :  { %2505 = shalt.err (!%p2502_p12)
}
  0x3a   :  { %s2506_s6 = scalar_lea.vmem %s50_s15, 144  ;;  %s2510_s7 = scalar_lea.vmem %s50_s15, 160 }
  0x3b   :  { %p2507_p13 = scmp.ne.s32.totalorder %s50_s15, %s2506_s6  ;;  %p2511_p0 = scmp.lt.s32.totalorder %s50_s15, %s50_s15 }
  0x3c   :  { %p2512_p1 = scmp.lt.s32.totalorder %s2510_s7, %s2506_s6 }
  0x3e   :  { %p2513_p2 = por %p2512_p1, %p2511_p0 }
  0x40   :  { %p2514_p3 = pnand %p2513_p2, %p2507_p13 }
  0x42   :  { %2517 = shalt.err (!%p2514_p3)
}
  0x43   :  { %52 = dma.hbm_to_vmem [thread:$0]  %s4426_s3, 144, %s50_s15, [#allocation9]  }
  0x44   :  { %2540 = dma.done.wait [#allocation3], 576  }
  0x45   :  { %2541 = vsyncadd [#allocation3], 4294966720 }
  0x46   :  { %2542 = dma.done.wait [#allocation6], 640  }
  0x47   :  { %2543 = vsyncadd [#allocation6], 4294966656  ;;  %v95_v0 = vlaneseq }
  0x48   :  { %2544 = dma.done.wait [#allocation9], 144  }
  0x49   :  { %2545 = vsyncadd [#allocation9], 4294967152  ;;  %v4458_v1 = vmov 0   ;;  %v2632_v2 = vshrl.u32 %v95_v0, 7  ;;  %v2634_v3 = vand.u32 127, %v95_v0  ;;  %v4636_v17 = vmov 0 }
  0x4a   :  { %1082 = vmatprep.mubr.bf16.mxu1 %v4458_v1  ;;  %1164 = vmatprep.mubr.bf16.mxu0 %v4458_v1  ;;  %v4460_v19 = vmov 1.0|1.0   ;;  %v4638_v20 = vmov 0  ;;  %v4640_v25 = vmov 0  ;;  %v4642_v28 = vmov 0  ;;  %s2556_s3 = smov [#allocation10]  }
  0x4b   :  { %4635 = vst [vmem:[#allocation15_spill] sm:$0xff] %v2632_v2  ;;  %v2637_v4 = vadd.s32 128, %v2634_v3  ;;  %v187_v5 = vadd.s32 8, %v2632_v2  ;;  %v2641_v6 = vmul.u32 9, %v2632_v2  ;;  %v362_v7 = vadd.s32 1, %v2632_v2  ;;  %s1703_s9 = sshll.u32 %s2556_s3, 4  ;;  %s1704_s9 = int_to_ptr.vmem [resolvable:$true] %s1703_s9 }
  0x4c   :  { %v2645_v8 = vadd.s32 640, %v2634_v3  ;;  %v188_v12 = vadd.s32 16, %v2632_v2  ;;  %v189_v14 = vadd.s32 24, %v2632_v2  ;;  %v2672_v15 = vadd.s32 512, %v2634_v3  ;;  %s2518_s10 = scalar_lea.vmem %s1704_s9, 576  ;;  %p2523_p5 = scmp.lt.s32.totalorder %s1704_s9, %s1704_s9 }
  0x4d   :  { %v2647_v9 = vmul.u32 9, %v187_v5  ;;  %vm219_vm0 = vcmp.ge.s32.totalorder %v2637_v4, %v2641_v6  ;;  %v363_v10 = vadd.s32 1, %v187_v5  ;;  %v2651_v11 = vmul.u32 9, %v362_v7  ;;  %p2519_p4 = scmp.ne.s32.totalorder %s1704_s9, %s2518_s10  ;;  %p2524_p6 = scmp.lt.s32.totalorder %s2518_s10, %s2518_s10 }
  0x4e   :  { %vm223_vm1 = vcmp.ge.s32.totalorder %v2645_v8, %v2641_v6  ;;  %v364_v16 = vadd.s32 1, %v188_v12  ;;  %vm218_vm12 = vcmp.ge.s32.totalorder %v2634_v3, %v2641_v6  ;;  %v365_v18 = vadd.s32 1, %v189_v14 }
  0x4f   :  { %vm228_vm2 = vcmp.ge.s32.totalorder %v2637_v4, %v2647_v9  ;;  %v2658_v13 = vmul.u32 9, %v363_v10  ;;  %vm395_vm3 = vcmp.lt.s32.totalorder %v2637_v4, %v2651_v11  ;;  %vm399_vm5 = vcmp.lt.s32.totalorder %v2645_v8, %v2651_v11  ;;  %p2525_p7 = por %p2524_p6, %p2523_p5 }
  0x50   :  { %vm539_vm4 = vmand %vm219_vm0, %vm395_vm3  ;;  %vm232_vm7 = vcmp.ge.s32.totalorder %v2645_v8, %v2647_v9  ;;  %vm394_vm13 = vcmp.lt.s32.totalorder %v2634_v3, %v2651_v11  ;;  %vm227_vm15 = vcmp.ge.s32.totalorder %v2634_v3, %v2647_v9  ;;  %v2693_v21 = vmul.u32 9, %v188_v12 }
  0x51   :  { %vm404_vm6 = vcmp.lt.s32.totalorder %v2637_v4, %v2658_v13  ;;  %vm408_vm8 = vcmp.lt.s32.totalorder %v2645_v8, %v2658_v13  ;;  %vm543_vm9 = vmand %vm223_vm1, %vm399_vm5  ;;  %vm403_vm0 = vcmp.lt.s32.totalorder %v2634_v3, %v2658_v13  ;;  %v2695_v22 = vmul.u32 9, %v364_v16  ;;  %p2526_p8 = pnand %p2525_p7, %p2519_p4 }
  0x52   :  { %vm548_vm10 = vmand %vm228_vm2, %vm404_vm6  ;;  %vm222_vm3 = vcmp.ge.s32.totalorder %v2672_v15, %v2641_v6  ;;  %v2704_v23 = vmul.u32 9, %v189_v14  ;;  %v2706_v24 = vmul.u32 9, %v365_v18  ;;  %vm231_vm6 = vcmp.ge.s32.totalorder %v2672_v15, %v2647_v9 }
  0x53   :  { %vm2674_vm11 = vmpackc.low %vm548_vm10, %vm539_vm4  ;;  %vm398_vm4 = vcmp.lt.s32.totalorder %v2672_v15, %v2651_v11  ;;  %vm237_vm10 = vcmp.ge.s32.totalorder %v2637_v4, %v2693_v21  ;;  %v190_v26 = vadd.s32 32, %v2632_v2  ;;  %v191_v27 = vadd.s32 40, %v2632_v2 }
  0x54   :  { %v4637_v17 = vsel %vm2674_vm11, 4294967295, %v4636_v17  ;;  %1865 = vmatprep.subr.msk.bf16.mxu1 %vm2674_vm11, %v4460_v19  ;;  %vm552_vm14 = vmand %vm232_vm7, %vm408_vm8  ;;  %vm407_vm7 = vcmp.lt.s32.totalorder %v2672_v15, %v2658_v13  ;;  %v4644_v30 = vmov 0  ;;  %v4646_v32 = vmov 0 }
  0x55   :  { %vm2689_vm1 = vmpackc.low %vm552_vm14, %vm543_vm9  ;;  %vm246_vm14 = vcmp.ge.s32.totalorder %v2637_v4, %v2704_v23  ;;  %v366_v29 = vadd.s32 1, %v190_v26  ;;  %v367_v31 = vadd.s32 1, %v191_v27  ;;  %v2763_v33 = vmul.u32 9, %v190_v26 }
  0x56   :  { %v4639_v20 = vsel %vm2689_vm1, 4294967295, %v4638_v20  ;;  %1929 = vmatprep.subr.msk.bf16.mxu0 %vm2689_vm1, %v4460_v19  ;;  %vm538_vm2 = vmand %vm218_vm12, %vm394_vm13  ;;  %vm413_vm12 = vcmp.lt.s32.totalorder %v2637_v4, %v2695_v22  ;;  %v2774_v35 = vmul.u32 9, %v191_v27  ;;  %v4648_v37 = vmov 0 }
  0x57   :  { %vm547_vm5 = vmand %vm227_vm15, %vm403_vm0  ;;  %vm422_vm15 = vcmp.lt.s32.totalorder %v2637_v4, %v2706_v24  ;;  %v2765_v34 = vmul.u32 9, %v366_v29  ;;  %v2776_v36 = vmul.u32 9, %v367_v31  ;;  %v192_v38 = vadd.s32 48, %v2632_v2 }
  0x58   :  { %vm2712_vm8 = vmpackc.low %vm547_vm5, %vm538_vm2  ;;  %v193_v39 = vadd.s32 56, %v2632_v2  ;;  %v4650_v40 = vmov 0  ;;  %vm268_vm1 = vcmp.ge.s32.totalorder %v2645_v8, %v2774_v35  ;;  %v4652_v42 = vmov 0 }
  0x59   :  { %v4641_v25 = vsel %vm2712_vm8, 4294967295, %v4640_v25  ;;  %1867 = vmatpush1.bf16.msk.msra.mxu1 %vm2712_vm8, %v4460_v19  ;;  %vm542_vm9 = vmand %vm222_vm3, %vm398_vm4  ;;  %vm241_vm3 = vcmp.ge.s32.totalorder %v2645_v8, %v2693_v21  ;;  %vm417_vm4 = vcmp.lt.s32.totalorder %v2645_v8, %v2695_v22  ;;  %v368_v41 = vadd.s32 1, %v192_v38 }
  0x5a   :  { %vm551_vm13 = vmand %vm231_vm6, %vm407_vm7  ;;  %vm250_vm6 = vcmp.ge.s32.totalorder %v2645_v8, %v2704_v23  ;;  %vm426_vm7 = vcmp.lt.s32.totalorder %v2645_v8, %v2706_v24  ;;  %v369_v43 = vadd.s32 1, %v193_v39  ;;  %v4654_v44 = vmov 0 }
  0x5b   :  { %vm2729_vm0 = vmpackc.low %vm551_vm13, %vm542_vm9  ;;  %vm412_vm13 = vcmp.lt.s32.totalorder %v2634_v3, %v2695_v22  ;;  %v2833_v45 = vmul.u32 9, %v192_v38  ;;  %v2835_v46 = vmul.u32 9, %v368_v41  ;;  %v4656_v49 = vmov 0 }
  0x5c   :  { %v4643_v28 = vsel %vm2729_vm0, 4294967295, %v4642_v28  ;;  %1931 = vmatpush1.bf16.msk.msra.mxu0 %vm2729_vm0, %v4460_v19  ;;  %vm557_vm2 = vmand %vm237_vm10, %vm413_vm12  ;;  %vm236_vm12 = vcmp.ge.s32.totalorder %v2634_v3, %v2693_v21  ;;  %v2844_v47 = vmul.u32 9, %v193_v39  ;;  %v2846_v48 = vmul.u32 9, %v369_v43 }
  0x5d   :  { %vm566_vm5 = vmand %vm246_vm14, %vm422_vm15  ;;  %vm245_vm15 = vcmp.ge.s32.totalorder %v2634_v3, %v2704_v23  ;;  %v194_v50 = vadd.s32 64, %v2632_v2  ;;  %v195_v51 = vadd.s32 72, %v2632_v2  ;;  %v4658_v52 = vmov 0 }
  0x5e   :  { %vm2744_vm9 = vmpackc.low %vm566_vm5, %vm557_vm2  ;;  %vm421_vm2 = vcmp.lt.s32.totalorder %v2634_v3, %v2706_v24  ;;  %v4661_v54 = vmov 0  ;;  %v4663_v56 = vmov 0  ;;  %v4666_v61 = vmov 0 }
  0x5f   :  { %v4645_v30 = vsel %vm2744_vm9, 4294967295, %v4644_v30  ;;  %1869 = vmatprep.subr.msk.bf16.mxu1 %vm2744_vm9, %v4460_v19  ;;  %vm561_vm10 = vmand %vm241_vm3, %vm417_vm4  ;;  %vm240_vm4 = vcmp.ge.s32.totalorder %v2672_v15, %v2693_v21  ;;  %v370_v53 = vadd.s32 1, %v194_v50  ;;  %v371_v55 = vadd.s32 1, %v195_v51 }
  0x60   :  { %vm570_vm14 = vmand %vm250_vm6, %vm426_vm7  ;;  %vm416_vm6 = vcmp.lt.s32.totalorder %v2672_v15, %v2695_v22  ;;  %v2903_v57 = vmul.u32 9, %v194_v50  ;;  %v2914_v59 = vmul.u32 9, %v195_v51  ;;  %v196_v62 = vadd.s32 80, %v2632_v2 }
  0x61   :  { %vm2759_vm5 = vmpackc.low %vm570_vm14, %vm561_vm10  ;;  %vm249_vm10 = vcmp.ge.s32.totalorder %v2672_v15, %v2704_v23  ;;  %vm425_vm14 = vcmp.lt.s32.totalorder %v2672_v15, %v2706_v24  ;;  %v2905_v58 = vmul.u32 9, %v370_v53  ;;  %v2916_v60 = vmul.u32 9, %v371_v55 }
  0x62   :  { %v4647_v32 = vsel %vm2759_vm5, 4294967295, %v4646_v32  ;;  %1933 = vmatprep.subr.msk.bf16.mxu0 %vm2759_vm5, %v4460_v19  ;;  %vm556_vm3 = vmand %vm236_vm12, %vm412_vm13  ;;  %vm255_vm13 = vcmp.ge.s32.totalorder %v2637_v4, %v2763_v33  ;;  %v197_v63 = vadd.s32 88, %v2632_v2  ;;  %v4668_v0 = vmov 0 }
  0x63   :  { %vm565_vm7 = vmand %vm245_vm15, %vm421_vm2  ;;  %vm431_vm15 = vcmp.lt.s32.totalorder %v2637_v4, %v2765_v34  ;;  %v372_v5 = vadd.s32 1, %v196_v62  ;;  %v4671_v7 = vmov 0  ;;  %v4673_v12 = vmov 0 }
  0x64   :  { %vm2782_vm0 = vmpackc.low %vm565_vm7, %vm556_vm3  ;;  %vm264_vm3 = vcmp.ge.s32.totalorder %v2637_v4, %v2774_v35  ;;  %vm440_vm7 = vcmp.lt.s32.totalorder %v2637_v4, %v2776_v36  ;;  %v373_v10 = vadd.s32 1, %v197_v63  ;;  %v2973_v14 = vmul.u32 9, %v196_v62 }
  0x65   :  { %v4649_v37 = vsel %vm2782_vm0, 4294967295, %v4648_v37  ;;  %1871 = vmatpush1.bf16.msk.msra.mxu1 %vm2782_vm0, %v4460_v19  ;;  %vm560_vm12 = vmand %vm240_vm4, %vm416_vm6  ;;  %vm259_vm6 = vcmp.ge.s32.totalorder %v2645_v8, %v2763_v33  ;;  %v2975_v16 = vmul.u32 9, %v372_v5  ;;  %v2984_v18 = vmul.u32 9, %v197_v63 }
  0x66   :  { %vm569_vm2 = vmand %vm249_vm10, %vm425_vm14  ;;  %vm435_vm10 = vcmp.lt.s32.totalorder %v2645_v8, %v2765_v34  ;;  %v2986_v26 = vmul.u32 9, %v373_v10  ;;  %v198_v27 = vadd.s32 96, %v2632_v2  ;;  %v4676_v29 = vmov 0 }
  0x67   :  { %vm2799_vm5 = vmpackc.low %vm569_vm2, %vm560_vm12  ;;  %vm444_vm12 = vcmp.lt.s32.totalorder %v2645_v8, %v2776_v36  ;;  %v200_v31 = vadd.s32 112, %v2632_v2  ;;  %v199_v38 = vadd.s32 104, %v2632_v2  ;;  %v201_v39 = vadd.s32 120, %v2632_v2 }
  0x68   :  { %v4651_v40 = vsel %vm2799_vm5, 4294967295, %v4650_v40  ;;  %1935 = vmatpush1.bf16.msk.msra.mxu0 %vm2799_vm5, %v4460_v19  ;;  %vm575_vm4 = vmand %vm255_vm13, %vm431_vm15  ;;  %vm254_vm15 = vcmp.ge.s32.totalorder %v2634_v3, %v2763_v33  ;;  %vm263_vm5 = vcmp.ge.s32.totalorder %v2634_v3, %v2774_v35  ;;  %v4678_v41 = vmov 0 }
  0x69   :  { %vm584_vm14 = vmand %vm264_vm3, %vm440_vm7  ;;  %vm430_vm3 = vcmp.lt.s32.totalorder %v2634_v3, %v2765_v34  ;;  %v3015_v43 = vmul.u32 9, %v198_v27  ;;  %v374_v50 = vadd.s32 1, %v198_v27  ;;  %v3024_v51 = vmul.u32 9, %v199_v38 }
  0x6a   :  { %vm2814_vm2 = vmpackc.low %vm584_vm14, %vm575_vm4  ;;  %vm439_vm4 = vcmp.lt.s32.totalorder %v2634_v3, %v2776_v36  ;;  %v376_v53 = vadd.s32 1, %v200_v31  ;;  %v375_v55 = vadd.s32 1, %v199_v38  ;;  %v377_v62 = vadd.s32 1, %v201_v39 }
  0x6b   :  { %v4653_v42 = vsel %vm2814_vm2, 4294967295, %v4652_v42  ;;  %1873 = vmatprep.subr.msk.bf16.mxu1 %vm2814_vm2, %v4460_v19  ;;  %vm579_vm13 = vmand %vm259_vm6, %vm435_vm10  ;;  %vm434_vm10 = vcmp.lt.s32.totalorder %v2672_v15, %v2765_v34  ;;  %v4681_v63 = vmov 0  ;;  %v3052_v5 = vmul.u32 9, %v374_v50 }
  0x6c   :  { %vm588_vm7 = vmand %vm268_vm1, %vm444_vm12  ;;  %vm258_vm1 = vcmp.ge.s32.totalorder %v2672_v15, %v2763_v33  ;;  %v3054_v10 = vmul.u32 9, %v200_v31  ;;  %v3061_v27 = vmul.u32 9, %v201_v39  ;;  %v3066_v1 = vadd.s32 384, %v2634_v3 }
  0x6d   :  { %vm2829_vm14 = vmpackc.low %vm588_vm7, %vm579_vm13  ;;  %vm267_vm13 = vcmp.ge.s32.totalorder %v2672_v15, %v2774_v35  ;;  %vm443_vm7 = vcmp.lt.s32.totalorder %v2672_v15, %v2776_v36  ;;  %v3063_v38 = vmul.u32 9, %v376_v53  ;;  %v3074_v31 = vmul.u32 9, %v375_v55 }
  0x6e   :  { %v4655_v44 = vsel %vm2829_vm14, 4294967295, %v4654_v44  ;;  %1937 = vmatprep.subr.msk.bf16.mxu0 %vm2829_vm14, %v4460_v19  ;;  %vm574_vm6 = vmand %vm254_vm15, %vm430_vm3  ;;  %vm273_vm3 = vcmp.ge.s32.totalorder %v2637_v4, %v2833_v45  ;;  %v3076_v50 = vmul.u32 9, %v377_v62  ;;  %v3079_v2 = vadd.s32 256, %v2634_v3 }
  0x6f   :  { %vm583_vm12 = vmand %vm263_vm5, %vm439_vm4  ;;  %vm449_vm5 = vcmp.lt.s32.totalorder %v2637_v4, %v2835_v46  ;;  %v4686_v39 = vmov 1.0|1.0   ;;  %v3091_v53 = vadd.s32 1024, %v2634_v3  ;;  %v4690_v55 = vmov 0 }
  0x70   :  { %vm2852_vm2 = vmpackc.low %vm583_vm12, %vm574_vm6  ;;  %vm282_vm6 = vcmp.ge.s32.totalorder %v2637_v4, %v2844_v47  ;;  %vm458_vm12 = vcmp.lt.s32.totalorder %v2637_v4, %v2846_v48  ;;  %v4696_v62 = vmov 0  ;;  %vm248_vm0 = vcmp.ge.s32.totalorder %v3066_v1, %v2704_v23 }
  0x71   :  { %v4657_v49 = vsel %vm2852_vm2, 4294967295, %v4656_v49  ;;  %1875 = vmatpush1.bf16.msk.msra.mxu1 %vm2852_vm2, %v4460_v19  ;;  %vm578_vm15 = vmand %vm258_vm1, %vm434_vm10  ;;  %vm277_vm10 = vcmp.ge.s32.totalorder %v2645_v8, %v2833_v45  ;;  %vm286_vm2 = vcmp.ge.s32.totalorder %v2645_v8, %v2844_v47 }
  0x72   :  { %vm587_vm4 = vmand %vm267_vm13, %vm443_vm7  ;;  %vm453_vm13 = vcmp.lt.s32.totalorder %v2645_v8, %v2835_v46 }
  0x73   :  { %vm2869_vm14 = vmpackc.low %vm587_vm4, %vm578_vm15  ;;  %vm462_vm15 = vcmp.lt.s32.totalorder %v2645_v8, %v2846_v48 }
  0x74   :  { %v4659_v52 = vsel %vm2869_vm14, 4294967295, %v4658_v52  ;;  %1939 = vmatpush1.bf16.msk.msra.mxu0 %vm2869_vm14, %v4460_v19  ;;  %vm593_vm1 = vmand %vm273_vm3, %vm449_vm5  ;;  %vm272_vm5 = vcmp.ge.s32.totalorder %v2634_v3, %v2833_v45  ;;  %vm281_vm14 = vcmp.ge.s32.totalorder %v2634_v3, %v2844_v47 }
  0x75   :  { %4660 = vst [vmem:[#allocation16_spill] sm:$0xff] %v4659_v52  ;;  %vm602_vm7 = vmand %vm282_vm6, %vm458_vm12  ;;  %vm448_vm6 = vcmp.lt.s32.totalorder %v2634_v3, %v2835_v46  ;;  %v4731_v52 = vmov 0 }
  0x76   :  { %vm2884_vm4 = vmpackc.low %vm602_vm7, %vm593_vm1  ;;  %vm457_vm1 = vcmp.lt.s32.totalorder %v2634_v3, %v2846_v48 }
  0x77   :  { %v4662_v54 = vsel %vm2884_vm4, 4294967295, %v4661_v54  ;;  %1877 = vmatprep.subr.msk.bf16.mxu1 %vm2884_vm4, %v4460_v19  ;;  %vm597_vm3 = vmand %vm277_vm10, %vm453_vm13  ;;  %vm452_vm13 = vcmp.lt.s32.totalorder %v2672_v15, %v2835_v46 }
  0x78   :  { %vm606_vm12 = vmand %vm286_vm2, %vm462_vm15  ;;  %vm276_vm2 = vcmp.ge.s32.totalorder %v2672_v15, %v2833_v45 }
  0x79   :  { %vm2899_vm7 = vmpackc.low %vm606_vm12, %vm597_vm3  ;;  %vm285_vm3 = vcmp.ge.s32.totalorder %v2672_v15, %v2844_v47  ;;  %vm461_vm12 = vcmp.lt.s32.totalorder %v2672_v15, %v2846_v48 }
  0x7a   :  { %v4664_v56 = vsel %vm2899_vm7, 4294967295, %v4663_v56  ;;  %1941 = vmatprep.subr.msk.bf16.mxu0 %vm2899_vm7, %v4460_v19  ;;  %vm592_vm10 = vmand %vm272_vm5, %vm448_vm6  ;;  %vm291_vm6 = vcmp.ge.s32.totalorder %v2637_v4, %v2903_v57 }
  0x7b   :  { %4665 = vst [vmem:[#allocation17_spill] sm:$0xff] %v4664_v56  ;;  %vm601_vm15 = vmand %vm281_vm14, %vm457_vm1  ;;  %vm467_vm14 = vcmp.lt.s32.totalorder %v2637_v4, %v2905_v58 }
  0x7c   :  { %vm2922_vm4 = vmpackc.low %vm601_vm15, %vm592_vm10  ;;  %vm300_vm10 = vcmp.ge.s32.totalorder %v2637_v4, %v2914_v59  ;;  %vm476_vm15 = vcmp.lt.s32.totalorder %v2637_v4, %v2916_v60 }
  0x7d   :  { %v4667_v61 = vsel %vm2922_vm4, 4294967295, %v4666_v61  ;;  %1879 = vmatpush1.bf16.msk.msra.mxu1 %vm2922_vm4, %v4460_v19  ;;  %vm596_vm5 = vmand %vm276_vm2, %vm452_vm13  ;;  %vm295_vm13 = vcmp.ge.s32.totalorder %v2645_v8, %v2903_v57  ;;  %vm304_vm4 = vcmp.ge.s32.totalorder %v2645_v8, %v2914_v59 }
  0x7e   :  { %vm605_vm1 = vmand %vm285_vm3, %vm461_vm12  ;;  %vm471_vm3 = vcmp.lt.s32.totalorder %v2645_v8, %v2905_v58 }
  0x7f   :  { %vm2939_vm7 = vmpackc.low %vm605_vm1, %vm596_vm5  ;;  %vm480_vm5 = vcmp.lt.s32.totalorder %v2645_v8, %v2916_v60 }
  0x80   :  { %v4669_v0 = vsel %vm2939_vm7, 4294967295, %v4668_v0  ;;  %1943 = vmatpush1.bf16.msk.msra.mxu0 %vm2939_vm7, %v4460_v19  ;;  %vm611_vm2 = vmand %vm291_vm6, %vm467_vm14  ;;  %vm290_vm14 = vcmp.ge.s32.totalorder %v2634_v3, %v2903_v57  ;;  %vm299_vm7 = vcmp.ge.s32.totalorder %v2634_v3, %v2914_v59 }
  0x81   :  { %4670 = vst [vmem:[#allocation18_spill] sm:$0xff] %v4669_v0  ;;  %vm620_vm12 = vmand %vm300_vm10, %vm476_vm15  ;;  %vm466_vm10 = vcmp.lt.s32.totalorder %v2634_v3, %v2905_v58  ;;  %v4706_v0 = vmov 0 }
  0x82   :  { %vm2954_vm1 = vmpackc.low %vm620_vm12, %vm611_vm2  ;;  %vm475_vm2 = vcmp.lt.s32.totalorder %v2634_v3, %v2916_v60 }
  0x83   :  { %v4672_v7 = vsel %vm2954_vm1, 4294967295, %v4671_v7  ;;  %1881 = vmatprep.subr.msk.bf16.mxu1 %vm2954_vm1, %v4460_v19  ;;  %vm615_vm6 = vmand %vm295_vm13, %vm471_vm3  ;;  %vm470_vm3 = vcmp.lt.s32.totalorder %v2672_v15, %v2905_v58 }
  0x84   :  { %vm624_vm15 = vmand %vm304_vm4, %vm480_vm5  ;;  %vm294_vm4 = vcmp.ge.s32.totalorder %v2672_v15, %v2903_v57 }
  0x85   :  { %vm2969_vm12 = vmpackc.low %vm624_vm15, %vm615_vm6  ;;  %vm303_vm6 = vcmp.ge.s32.totalorder %v2672_v15, %v2914_v59  ;;  %vm479_vm15 = vcmp.lt.s32.totalorder %v2672_v15, %v2916_v60 }
  0x86   :  { %v4674_v12 = vsel %vm2969_vm12, 4294967295, %v4673_v12  ;;  %1945 = vmatprep.subr.msk.bf16.mxu0 %vm2969_vm12, %v4460_v19  ;;  %vm610_vm13 = vmand %vm290_vm14, %vm466_vm10  ;;  %vm494_vm12 = vcmp.lt.s32.totalorder %v2637_v4, %v2986_v26 }
  0x87   :  { %4675 = vst [vmem:[#allocation19_spill] sm:$0xff] %v4674_v12  ;;  %vm619_vm5 = vmand %vm299_vm7, %vm475_vm2  ;;  %vm309_vm7 = vcmp.ge.s32.totalorder %v2637_v4, %v2973_v14  ;;  %vm485_vm2 = vcmp.lt.s32.totalorder %v2637_v4, %v2975_v16  ;;  %v4704_v12 = vmov 0 }
  0x88   :  { %vm2993_vm14 = vmpackc.low %vm619_vm5, %vm610_vm13  ;;  %vm318_vm5 = vcmp.ge.s32.totalorder %v2637_v4, %v2984_v18 }
  0x89   :  { %v4677_v29 = vsel %vm2993_vm14, 4294967295, %v4676_v29  ;;  %1883 = vmatpush1.bf16.msk.msra.mxu1 %vm2993_vm14, %v4460_v19  ;;  %vm614_vm10 = vmand %vm294_vm4, %vm470_vm3  ;;  %vm313_vm3 = vcmp.ge.s32.totalorder %v2645_v8, %v2973_v14  ;;  %vm340_vm14 = vcmp.ge.s32.totalorder %v2645_v8, %v3024_v51 }
  0x8a   :  { %vm623_vm13 = vmand %vm303_vm6, %vm479_vm15  ;;  %vm489_vm6 = vcmp.lt.s32.totalorder %v2645_v8, %v2975_v16 }
  0x8b   :  { %vm3011_vm1 = vmpackc.low %vm623_vm13, %vm614_vm10  ;;  %vm322_vm10 = vcmp.ge.s32.totalorder %v2645_v8, %v2984_v18  ;;  %vm498_vm13 = vcmp.lt.s32.totalorder %v2645_v8, %v2986_v26 }
  0x8c   :  { %v4679_v41 = vsel %vm3011_vm1, 4294967295, %v4678_v41  ;;  %1947 = vmatpush1.bf16.msk.msra.mxu0 %vm3011_vm1, %v4460_v19  ;;  %vm629_vm4 = vmand %vm309_vm7, %vm485_vm2 }
  0x8d   :  { %4680 = vst [vmem:[#allocation20_spill] sm:$0xff] %v4679_v41  ;;  %vm638_vm15 = vmand %vm318_vm5, %vm494_vm12  ;;  %vm484_vm12 = vcmp.lt.s32.totalorder %v2634_v3, %v2975_v16  ;;  %v1042_v41 = vld [vmem:[#allocation7] sm:$0xf] }
  0x8e   :  { %vm3030_vm1 = vmpackc.low %vm638_vm15, %vm629_vm4  ;;  %vm4689_vm15 = vcmp.ge.s32.totalorder %v2634_v3, %v2984_v18 }
  0x8f   :  { %v4682_v63 = vsel %vm3030_vm1, 4294967295, %v4681_v63  ;;  %1885 = vmatprep.subr.msk.bf16.mxu1 %vm3030_vm1, %v4460_v19  ;;  %vm633_vm4 = vmand %vm313_vm3, %vm489_vm6  ;;  %v4683_v19 = vmov 0  ;;  %vm4688_vm6 = vcmp.lt.s32.totalorder %v2634_v3, %v2986_v26  ;;  %vm331_vm1 = vcmp.ge.s32.totalorder %v2645_v8, %v3015_v43 }
  0x90   :  { %vm642_vm5 = vmand %vm322_vm10, %vm498_vm13  ;;  %vm4687_vm10 = vcmp.ge.s32.totalorder %v2634_v3, %v2973_v14 }
  0x91   :  { %vm3068_vm3 = vmpackc.low %vm642_vm5, %vm633_vm4  ;;  %vm4695_vm4 = vcmp.ge.s32.totalorder %v2672_v15, %v2984_v18 }
  0x92   :  { %v4684_v19 = vsel %vm3068_vm3, 4294967295, %v4683_v19  ;;  %1949 = vmatprep.subr.msk.bf16.mxu0 %vm3068_vm3, %v4686_v39  ;;  %vm628_vm13 = vmand %vm4687_vm10, %vm484_vm12  ;;  %vm4694_vm3 = vcmp.lt.s32.totalorder %v2672_v15, %v2986_v26 }
  0x93   :  { %4685 = vst [vmem:[#allocation21_spill] sm:$0xff] %v4684_v19  ;;  %vm637_vm7 = vmand %vm4689_vm15, %vm4688_vm6  ;;  %vm327_vm15 = vcmp.ge.s32.totalorder %v2637_v4, %v3015_v43  ;;  %vm503_vm6 = vcmp.lt.s32.totalorder %v2637_v4, %v3052_v5  ;;  %v4699_v19 = vmov 0 }
  0x94   :  { %vm3113_vm2 = vmpackc.low %vm637_vm7, %vm628_vm13  ;;  %vm4692_vm7 = vcmp.lt.s32.totalorder %v2672_v15, %v2975_v16  ;;  %vm4693_vm13 = vcmp.ge.s32.totalorder %v2672_v15, %v2973_v14 }
  0x95   :  { %v4691_v55 = vsel %vm3113_vm2, 4294967295, %v4690_v55  ;;  %1887 = vmatpush1.bf16.msk.msra.mxu1 %vm3113_vm2, %v4686_v39  ;;  %vm632_vm5 = vmand %vm4693_vm13, %vm4692_vm7  ;;  %vm336_vm2 = vcmp.ge.s32.totalorder %v2637_v4, %v3024_v51  ;;  %vm512_vm7 = vcmp.lt.s32.totalorder %v2637_v4, %v3074_v31 }
  0x96   :  { %vm641_vm12 = vmand %vm4695_vm4, %vm4694_vm3  ;;  %vm507_vm3 = vcmp.lt.s32.totalorder %v2645_v8, %v3052_v5 }
  0x97   :  { %vm3150_vm13 = vmpackc.low %vm641_vm12, %vm632_vm5  ;;  %vm516_vm5 = vcmp.lt.s32.totalorder %v2645_v8, %v3074_v31 }
  0x98   :  { %v4697_v62 = vsel %vm3150_vm13, 4294967295, %v4696_v62  ;;  %1951 = vmatpush1.bf16.msk.msra.mxu0 %vm3150_vm13, %v4686_v39  ;;  %vm647_vm10 = vmand %vm327_vm15, %vm503_vm6  ;;  %vm326_vm6 = vcmp.ge.s32.totalorder %v2634_v3, %v3015_v43  ;;  %vm335_vm13 = vcmp.ge.s32.totalorder %v2634_v3, %v3024_v51 }
  0x99   :  { %4698 = vst [vmem:[#allocation22_spill] sm:$0xff] %v4697_v62  ;;  %vm656_vm4 = vmand %vm336_vm2, %vm512_vm7  ;;  %vm502_vm2 = vcmp.lt.s32.totalorder %v2634_v3, %v3052_v5  ;;  %v4701_v62 = vmov 0 }
  0x9a   :  { %vm3165_vm12 = vmpackc.low %vm656_vm4, %vm647_vm10  ;;  %vm511_vm10 = vcmp.lt.s32.totalorder %v2634_v3, %v3074_v31 }
  0x9b   :  { %v4700_v19 = vsel %vm3165_vm12, 4294967295, %v4699_v19  ;;  %1889 = vmatprep.subr.msk.bf16.mxu1 %vm3165_vm12, %v4686_v39  ;;  %vm651_vm15 = vmand %vm331_vm1, %vm507_vm3  ;;  %vm330_vm3 = vcmp.ge.s32.totalorder %v2672_v15, %v3015_v43  ;;  %vm339_vm12 = vcmp.ge.s32.totalorder %v2672_v15, %v3024_v51 }
  0x9c   :  { %vm660_vm7 = vmand %vm340_vm14, %vm516_vm5  ;;  %vm506_vm14 = vcmp.lt.s32.totalorder %v2672_v15, %v3052_v5 }
  0x9d   :  { %vm3180_vm4 = vmpackc.low %vm660_vm7, %vm651_vm15  ;;  %vm515_vm15 = vcmp.lt.s32.totalorder %v2672_v15, %v3074_v31 }
  0x9e   :  { %v4702_v62 = vsel %vm3180_vm4, 4294967295, %v4701_v62  ;;  %1953 = vmatprep.subr.msk.bf16.mxu0 %vm3180_vm4, %v4686_v39  ;;  %vm646_vm1 = vmand %vm326_vm6, %vm502_vm2  ;;  %vm521_vm2 = vcmp.lt.s32.totalorder %v2637_v4, %v3063_v38 }
  0x9f   :  { %4703 = vst [vmem:[#allocation23_spill] sm:$0xff] %v4702_v62  ;;  %vm655_vm5 = vmand %vm335_vm13, %vm511_vm10  ;;  %v3199_v62 = vpack.c.bf16 %v1042_v41, %v1042_v41  ;;  %vm345_vm13 = vcmp.ge.s32.totalorder %v2637_v4, %v3054_v10 }
  0xa0   :  { %vm3195_vm7 = vmpackc.low %vm655_vm5, %vm646_vm1  ;;  %vm354_vm1 = vcmp.ge.s32.totalorder %v2637_v4, %v3061_v27  ;;  %vm530_vm5 = vcmp.lt.s32.totalorder %v2637_v4, %v3076_v50  ;;  %v4709_v4 = vmov 0 }
  0xa1   :  { %v4705_v12 = vsel %vm3195_vm7, 4294967295, %v4704_v12  ;;  %1891 = vmatpush1.bf16.msk.msra.mxu1 %vm3195_vm7, %v4686_v39  ;;  %vm650_vm6 = vmand %vm330_vm3, %vm506_vm14  ;;  %vm349_vm14 = vcmp.ge.s32.totalorder %v2645_v8, %v3054_v10  ;;  %v1044_v56 = vunpack.c.l.bf16 %v3199_v62 }
  0xa2   :  { %vm659_vm10 = vmand %vm339_vm12, %vm515_vm15  ;;  %vm525_vm12 = vcmp.lt.s32.totalorder %v2645_v8, %v3063_v38 }
  0xa3   :  { %vm3212_vm4 = vmpackc.low %vm659_vm10, %vm650_vm6  ;;  %vm358_vm6 = vcmp.ge.s32.totalorder %v2645_v8, %v3061_v27  ;;  %vm534_vm10 = vcmp.lt.s32.totalorder %v2645_v8, %v3076_v50  ;;  %v3243_v8 = vsub.f32 %v1042_v41, %v1044_v56  ;;  %v4715_v56 = vmov 0 }
  0xa4   :  { %v4707_v0 = vsel %vm3212_vm4, 4294967295, %v4706_v0  ;;  %1955 = vmatpush1.bf16.msk.msra.mxu0 %vm3212_vm4, %v4686_v39  ;;  %vm665_vm3 = vmand %vm345_vm13, %vm521_vm2  ;;  %vm344_vm2 = vcmp.ge.s32.totalorder %v2634_v3, %v3054_v10  ;;  %vm353_vm4 = vcmp.ge.s32.totalorder %v2634_v3, %v3061_v27 }
  0xa5   :  { %4708 = vst [vmem:[#allocation24_spill] sm:$0xff] %v4707_v0  ;;  %vm674_vm15 = vmand %vm354_vm1, %vm530_vm5  ;;  %vm520_vm1 = vcmp.lt.s32.totalorder %v2634_v3, %v3063_v38  ;;  %v4712_v0 = vmov 0  ;;  %v3266_v41 = vpack.c.bf16 %v3243_v8, %v3243_v8 }
  0xa6   :  { %vm3228_vm7 = vmpackc.low %vm674_vm15, %vm665_vm3  ;;  %vm529_vm3 = vcmp.lt.s32.totalorder %v2634_v3, %v3076_v50  ;;  %4711 = vst [vmem:[#allocation25_spill] sm:$0xff] %v3243_v8  ;;  %v4517_v8 = vmov 0.0  }
  0xa7   :  { %v4710_v4 = vsel %vm3228_vm7, 4294967295, %v4709_v4  ;;  %1893 = vmatprep.subr.msk.bf16.mxu1 %vm3228_vm7, %v4686_v39  ;;  %vm669_vm13 = vmand %vm349_vm14, %vm525_vm12  ;;  %vm348_vm12 = vcmp.ge.s32.totalorder %v2672_v15, %v3054_v10  ;;  %vm357_vm7 = vcmp.ge.s32.totalorder %v2672_v15, %v3061_v27 }
  0xa8   :  { %vm678_vm5 = vmand %vm358_vm6, %vm534_vm10  ;;  %vm524_vm6 = vcmp.lt.s32.totalorder %v2672_v15, %v3063_v38 }
  0xa9   :  { %vm3245_vm15 = vmpackc.low %vm678_vm5, %vm669_vm13  ;;  %vm533_vm13 = vcmp.lt.s32.totalorder %v2672_v15, %v3076_v50  ;;  %v4717_v15 = vmov 0 }
  0xaa   :  { %v4713_v0 = vsel %vm3245_vm15, 4294967295, %v4712_v0  ;;  %1957 = vmatprep.subr.msk.bf16.mxu0 %vm3245_vm15, %v4686_v39  ;;  %vm664_vm14 = vmand %vm344_vm2, %vm520_vm1  ;;  %vm397_vm1 = vcmp.lt.s32.totalorder %v3066_v1, %v2651_v11 }
  0xab   :  { %4714 = vst [vmem:[#allocation26_spill] sm:$0xff] %v4713_v0  ;;  %vm673_vm10 = vmand %vm353_vm4, %vm529_vm3  ;;  %vm221_vm4 = vcmp.ge.s32.totalorder %v3066_v1, %v2641_v6  ;;  %v4721_v0 = vmov 0 }
  0xac   :  { %vm3260_vm5 = vmpackc.low %vm673_vm10, %vm664_vm14  ;;  %vm230_vm14 = vcmp.ge.s32.totalorder %v3066_v1, %v2647_v9  ;;  %vm406_vm10 = vcmp.lt.s32.totalorder %v3066_v1, %v2658_v13 }
  0xad   :  { %v4716_v56 = vsel %vm3260_vm5, 4294967295, %v4715_v56  ;;  %1895 = vmatpush1.bf16.msk.msra.mxu1 %vm3260_vm5, %v4686_v39  ;;  %vm668_vm2 = vmand %vm348_vm12, %vm524_vm6  ;;  %vm396_vm6 = vcmp.lt.s32.totalorder %v3079_v2, %v2651_v11  ;;  %vm4521_vm5 = vmmov 0  }
  0xae   :  { %vm677_vm3 = vmand %vm357_vm7, %vm533_vm13  ;;  %vm220_vm7 = vcmp.ge.s32.totalorder %v3079_v2, %v2641_v6 }
  0xaf   :  { %vm3279_vm15 = vmpackc.low %vm677_vm3, %vm668_vm2  ;;  %vm229_vm2 = vcmp.ge.s32.totalorder %v3079_v2, %v2647_v9  ;;  %vm405_vm3 = vcmp.lt.s32.totalorder %v3079_v2, %v2658_v13 }
  0xb0   :  { %v4718_v15 = vsel %vm3279_vm15, 4294967295, %v4717_v15  ;;  %1959 = vmatpush1.bf16.msk.msra.mxu0 %vm3279_vm15, %v4686_v39  ;;  %vm541_vm12 = vmand %vm221_vm4, %vm397_vm1  ;;  %1083 = vmatmul.mubr.bf16.vlgmr.msra.gmra.mrb[0].mxu1 %v3266_v41 }
  0xb1   :  { %4719 = vst [vmem:[#allocation27_spill] sm:$0xff] %v4718_v15  ;;  %vm550_vm13 = vmand %vm230_vm14, %vm406_vm10  ;;  %2323 = vmatprep.subr.bf16.mxu0 %v4517_v8  ;;  %v4720_v15 = vmov 0   ;;  %vm226_vm14 = vcmp.ge.s32.totalorder %v3091_v53, %v2641_v6  ;;  %vm402_vm10 = vcmp.lt.s32.totalorder %v3091_v53, %v2651_v11 }
  0xb2   :  { %1123 = vmatprep.mubr.bf16.mxu1 %v4720_v15  ;;  %vm3297_vm4 = vmpackc.low %vm550_vm13, %vm541_vm12  ;;  %vm235_vm12 = vcmp.ge.s32.totalorder %v3091_v53, %v2647_v9  ;;  %vm411_vm13 = vcmp.lt.s32.totalorder %v3091_v53, %v2658_v13 }
  0xb3   :  { %v4722_v0 = vsel %vm3297_vm4, 4294967295, %v4721_v0  ;;  %1897 = vmatprep.subr.msk.bf16.mxu1 %vm3297_vm4, %v4686_v39  ;;  %vm540_vm1 = vmand %vm220_vm7, %vm396_vm6  ;;  %1165 = vmatmul.mubr.bf16.vlgmr.msra.gmra.mrb[0].mxu0 %v3266_v41 }
  0xb4   :  { %4723 = vst [vmem:[#allocation28_spill] sm:$0xff] %v4722_v0  ;;  %vm549_vm15 = vmand %vm229_vm2, %vm405_vm3  ;;  %2339 = vmatprep.mubr.msk.bf16.mxu0 %vm4521_vm5, %v4517_v8  ;;  %v4724_v0 = vmov 0  ;;  %vm239_vm2 = vcmp.ge.s32.totalorder %v3066_v1, %v2693_v21  ;;  %vm415_vm3 = vcmp.lt.s32.totalorder %v3066_v1, %v2695_v22  ;;  %v4727_v8 = vmov 0 }
  0xb5   :  { %vm3315_vm7 = vmpackc.low %vm549_vm15, %vm540_vm1  ;;  %vm424_vm15 = vcmp.lt.s32.totalorder %v3066_v1, %v2706_v24 }
  0xb6   :  { %v4725_v0 = vsel %vm3315_vm7, 4294967295, %v4724_v0  ;;  %1899 = vmatpush1.bf16.msk.msra.mxu1 %vm3315_vm7, %v4686_v39  ;;  %vm546_vm6 = vmand %vm226_vm14, %vm402_vm10  ;;  %vm238_vm10 = vcmp.ge.s32.totalorder %v3079_v2, %v2693_v21 }
  0xb7   :  { %4726 = vst [vmem:[#allocation29_spill] sm:$0xff] %v4725_v0  ;;  %vm555_vm4 = vmand %vm235_vm12, %vm411_vm13  ;;  %vm414_vm12 = vcmp.lt.s32.totalorder %v3079_v2, %v2695_v22  ;;  %v4730_v0 = vmov 0.0  }
  0xb8   :  { %vm3330_vm1 = vmpackc.low %vm555_vm4, %vm546_vm6  ;;  %vm247_vm4 = vcmp.ge.s32.totalorder %v3079_v2, %v2704_v23  ;;  %vm423_vm6 = vcmp.lt.s32.totalorder %v3079_v2, %v2706_v24 }
  0xb9   :  { %v4728_v8 = vsel %vm3330_vm1, 4294967295, %v4727_v8  ;;  %2324 = vmatpush3.bf16.msk.msra.mxu0 %vm3330_vm1, %v4686_v39  ;;  %vm559_vm14 = vmand %vm239_vm2, %vm415_vm3  ;;  %vm420_vm3 = vcmp.lt.s32.totalorder %v3091_v53, %v2695_v22  ;;  %vm253_vm1 = vcmp.ge.s32.totalorder %v3091_v53, %v2704_v23 }
  0xba   :  { %4729 = vst [vmem:[#allocation30_spill] sm:$0xff] %v4728_v8  ;;  %vm568_vm13 = vmand %vm248_vm0, %vm424_vm15  ;;  %2325 = vmatprep.subr.bf16.mxu0 %v4730_v0  ;;  %vm244_vm0 = vcmp.ge.s32.totalorder %v3091_v53, %v2693_v21  ;;  %v4734_v8 = vmov 0 }
  0xbb   :  { %vm3346_vm5 = vmpackc.low %vm568_vm13, %vm559_vm14  ;;  %vm429_vm14 = vcmp.lt.s32.totalorder %v3091_v53, %v2706_v24 }
  0xbc   :  { %v4732_v52 = vsel %vm3346_vm5, 4294967295, %v4731_v52  ;;  %1901 = vmatprep.subr.msk.bf16.mxu1 %vm3346_vm5, %v4686_v39  ;;  %vm558_vm2 = vmand %vm238_vm10, %vm414_vm12  ;;  %vm257_vm12 = vcmp.ge.s32.totalorder %v3066_v1, %v2763_v33  ;;  %vm266_vm5 = vcmp.ge.s32.totalorder %v3066_v1, %v2774_v35 }
  0xbd   :  { %4733 = vst [vmem:[#allocation31_spill] sm:$0xff] %v4732_v52  ;;  %vm567_vm15 = vmand %vm247_vm4, %vm423_vm6  ;;  %vm433_vm4 = vcmp.lt.s32.totalorder %v3066_v1, %v2765_v34  ;;  %v4737_v52 = vmov 0 }
  0xbe   :  { %vm3361_vm13 = vmpackc.low %vm567_vm15, %vm558_vm2  ;;  %vm442_vm2 = vcmp.lt.s32.totalorder %v3066_v1, %v2776_v36 }
  0xbf   :  { %v4735_v8 = vsel %vm3361_vm13, 4294967295, %v4734_v8  ;;  %1903 = vmatpush1.bf16.msk.msra.mxu1 %vm3361_vm13, %v4686_v39  ;;  %vm564_vm10 = vmand %vm244_vm0, %vm420_vm3  ;;  %vm256_vm3 = vcmp.ge.s32.totalorder %v3079_v2, %v2763_v33 }
  0xc0   :  { %4736 = vst [vmem:[#allocation32_spill] sm:$0xff] %v4735_v8  ;;  %vm573_vm6 = vmand %vm253_vm1, %vm429_vm14  ;;  %vm432_vm1 = vcmp.lt.s32.totalorder %v3079_v2, %v2765_v34  ;;  %v4740_v8 = vmov 0 }
  0xc1   :  { %vm3376_vm15 = vmpackc.low %vm573_vm6, %vm564_vm10  ;;  %vm265_vm10 = vcmp.ge.s32.totalorder %v3079_v2, %v2774_v35  ;;  %vm441_vm6 = vcmp.lt.s32.totalorder %v3079_v2, %v2776_v36 }
  0xc2   :  { %v4738_v52 = vsel %vm3376_vm15, 4294967295, %v4737_v52  ;;  %2326 = vmatpush3.bf16.msk.msra.mxu0 %vm3376_vm15, %v4686_v39  ;;  %vm577_vm0 = vmand %vm257_vm12, %vm433_vm4  ;;  %vm438_vm4 = vcmp.lt.s32.totalorder %v3091_v53, %v2765_v34  ;;  %vm271_vm15 = vcmp.ge.s32.totalorder %v3091_v53, %v2774_v35 }
  0xc3   :  { %4739 = vst [vmem:[#allocation33_spill] sm:$0xff] %v4738_v52  ;;  %vm586_vm14 = vmand %vm266_vm5, %vm442_vm2  ;;  %2327 = vmatprep.subr.bf16.mxu0 %v4730_v0  ;;  %vm262_vm5 = vcmp.ge.s32.totalorder %v3091_v53, %v2763_v33  ;;  %v4743_v52 = vmov 0 }
  0xc4   :  { %vm3392_vm13 = vmpackc.low %vm586_vm14, %vm577_vm0  ;;  %vm447_vm0 = vcmp.lt.s32.totalorder %v3091_v53, %v2776_v36 }
  0xc5   :  { %v4741_v8 = vsel %vm3392_vm13, 4294967295, %v4740_v8  ;;  %1905 = vmatprep.subr.msk.bf16.mxu1 %vm3392_vm13, %v4686_v39  ;;  %vm576_vm12 = vmand %vm256_vm3, %vm432_vm1  ;;  %vm275_vm1 = vcmp.ge.s32.totalorder %v3066_v1, %v2833_v45  ;;  %vm284_vm13 = vcmp.ge.s32.totalorder %v3066_v1, %v2844_v47 }
  0xc6   :  { %4742 = vst [vmem:[#allocation34_spill] sm:$0xff] %v4741_v8  ;;  %vm585_vm2 = vmand %vm265_vm10, %vm441_vm6  ;;  %vm451_vm10 = vcmp.lt.s32.totalorder %v3066_v1, %v2835_v46  ;;  %v4746_v8 = vmov 0 }
  0xc7   :  { %vm3407_vm14 = vmpackc.low %vm585_vm2, %vm576_vm12  ;;  %vm460_vm12 = vcmp.lt.s32.totalorder %v3066_v1, %v2846_v48 }
  0xc8   :  { %v4744_v52 = vsel %vm3407_vm14, 4294967295, %v4743_v52  ;;  %1907 = vmatpush1.bf16.msk.msra.mxu1 %vm3407_vm14, %v4686_v39  ;;  %vm582_vm3 = vmand %vm262_vm5, %vm438_vm4  ;;  %vm274_vm4 = vcmp.ge.s32.totalorder %v3079_v2, %v2833_v45 }
  0xc9   :  { %4745 = vst [vmem:[#allocation35_spill] sm:$0xff] %v4744_v52  ;;  %vm591_vm6 = vmand %vm271_vm15, %vm447_vm0  ;;  %vm450_vm15 = vcmp.lt.s32.totalorder %v3079_v2, %v2835_v46  ;;  %v4749_v52 = vmov 0 }
  0xca   :  { %vm3422_vm2 = vmpackc.low %vm591_vm6, %vm582_vm3  ;;  %vm283_vm3 = vcmp.ge.s32.totalorder %v3079_v2, %v2844_v47  ;;  %vm459_vm6 = vcmp.lt.s32.totalorder %v3079_v2, %v2846_v48 }
  0xcb   :  { %v4747_v8 = vsel %vm3422_vm2, 4294967295, %v4746_v8  ;;  %2328 = vmatpush3.bf16.msk.msra.mxu0 %vm3422_vm2, %v4686_v39  ;;  %vm595_vm5 = vmand %vm275_vm1, %vm451_vm10  ;;  %vm456_vm10 = vcmp.lt.s32.totalorder %v3091_v53, %v2835_v46  ;;  %vm289_vm2 = vcmp.ge.s32.totalorder %v3091_v53, %v2844_v47 }
  0xcc   :  { %4748 = vst [vmem:[#allocation36_spill] sm:$0xff] %v4747_v8  ;;  %vm604_vm0 = vmand %vm284_vm13, %vm460_vm12  ;;  %2329 = vmatprep.subr.bf16.mxu0 %v4730_v0  ;;  %vm280_vm13 = vcmp.ge.s32.totalorder %v3091_v53, %v2833_v45  ;;  %v4752_v8 = vmov 0 }
  0xcd   :  { %vm3438_vm14 = vmpackc.low %vm604_vm0, %vm595_vm5  ;;  %vm465_vm5 = vcmp.lt.s32.totalorder %v3091_v53, %v2846_v48 }
  0xce   :  { %v4750_v52 = vsel %vm3438_vm14, 4294967295, %v4749_v52  ;;  %1909 = vmatprep.subr.msk.bf16.mxu1 %vm3438_vm14, %v4686_v39  ;;  %vm594_vm1 = vmand %vm274_vm4, %vm450_vm15  ;;  %vm293_vm15 = vcmp.ge.s32.totalorder %v3066_v1, %v2903_v57  ;;  %vm302_vm14 = vcmp.ge.s32.totalorder %v3066_v1, %v2914_v59 }
  0xcf   :  { %4751 = vst [vmem:[#allocation37_spill] sm:$0xff] %v4750_v52  ;;  %vm603_vm12 = vmand %vm283_vm3, %vm459_vm6  ;;  %vm469_vm3 = vcmp.lt.s32.totalorder %v3066_v1, %v2905_v58  ;;  %v4755_v52 = vmov 0 }
  0xd0   :  { %vm3453_vm0 = vmpackc.low %vm603_vm12, %vm594_vm1  ;;  %vm478_vm1 = vcmp.lt.s32.totalorder %v3066_v1, %v2916_v60 }
  0xd1   :  { %v4753_v8 = vsel %vm3453_vm0, 4294967295, %v4752_v8  ;;  %1911 = vmatpush1.bf16.msk.msra.mxu1 %vm3453_vm0, %v4686_v39  ;;  %vm600_vm4 = vmand %vm280_vm13, %vm456_vm10  ;;  %vm292_vm10 = vcmp.ge.s32.totalorder %v3079_v2, %v2903_v57 }
  0xd2   :  { %4754 = vst [vmem:[#allocation38_spill] sm:$0xff] %v4753_v8  ;;  %vm609_vm6 = vmand %vm289_vm2, %vm465_vm5  ;;  %vm468_vm2 = vcmp.lt.s32.totalorder %v3079_v2, %v2905_v58  ;;  %v4758_v8 = vmov 0 }
  0xd3   :  { %vm3468_vm12 = vmpackc.low %vm609_vm6, %vm600_vm4  ;;  %vm301_vm4 = vcmp.ge.s32.totalorder %v3079_v2, %v2914_v59  ;;  %vm477_vm6 = vcmp.lt.s32.totalorder %v3079_v2, %v2916_v60 }
  0xd4   :  { %v4756_v52 = vsel %vm3468_vm12, 4294967295, %v4755_v52  ;;  %2330 = vmatpush3.bf16.msk.msra.mxu0 %vm3468_vm12, %v4686_v39  ;;  %vm613_vm13 = vmand %vm293_vm15, %vm469_vm3  ;;  %vm474_vm3 = vcmp.lt.s32.totalorder %v3091_v53, %v2905_v58  ;;  %vm307_vm12 = vcmp.ge.s32.totalorder %v3091_v53, %v2914_v59 }
  0xd5   :  { %4757 = vst [vmem:[#allocation39_spill] sm:$0xff] %v4756_v52  ;;  %vm622_vm5 = vmand %vm302_vm14, %vm478_vm1  ;;  %2331 = vmatprep.subr.bf16.mxu0 %v4730_v0  ;;  %vm298_vm14 = vcmp.ge.s32.totalorder %v3091_v53, %v2903_v57  ;;  %v4761_v52 = vmov 0 }
  0xd6   :  { %vm3484_vm0 = vmpackc.low %vm622_vm5, %vm613_vm13  ;;  %vm483_vm13 = vcmp.lt.s32.totalorder %v3091_v53, %v2916_v60 }
  0xd7   :  { %v4759_v8 = vsel %vm3484_vm0, 4294967295, %v4758_v8  ;;  %1913 = vmatprep.subr.msk.bf16.mxu1 %vm3484_vm0, %v4686_v39  ;;  %vm612_vm15 = vmand %vm292_vm10, %vm468_vm2  ;;  %vm311_vm2 = vcmp.ge.s32.totalorder %v3066_v1, %v2973_v14  ;;  %vm320_vm0 = vcmp.ge.s32.totalorder %v3066_v1, %v2984_v18 }
  0xd8   :  { %4760 = vst [vmem:[#allocation40_spill] sm:$0xff] %v4759_v8  ;;  %vm621_vm1 = vmand %vm301_vm4, %vm477_vm6  ;;  %vm487_vm4 = vcmp.lt.s32.totalorder %v3066_v1, %v2975_v16  ;;  %v4764_v8 = vmov 0 }
  0xd9   :  { %vm3499_vm5 = vmpackc.low %vm621_vm1, %vm612_vm15  ;;  %vm496_vm15 = vcmp.lt.s32.totalorder %v3066_v1, %v2986_v26 }
  0xda   :  { %v4762_v52 = vsel %vm3499_vm5, 4294967295, %v4761_v52  ;;  %1915 = vmatpush1.bf16.msk.msra.mxu1 %vm3499_vm5, %v4686_v39  ;;  %vm618_vm10 = vmand %vm298_vm14, %vm474_vm3  ;;  %vm310_vm3 = vcmp.ge.s32.totalorder %v3079_v2, %v2973_v14 }
  0xdb   :  { %4763 = vst [vmem:[#allocation41_spill] sm:$0xff] %v4762_v52  ;;  %vm627_vm6 = vmand %vm307_vm12, %vm483_vm13  ;;  %vm486_vm12 = vcmp.lt.s32.totalorder %v3079_v2, %v2975_v16  ;;  %v4767_v52 = vmov 0 }
  0xdc   :  { %vm3514_vm1 = vmpackc.low %vm627_vm6, %vm618_vm10  ;;  %vm319_vm10 = vcmp.ge.s32.totalorder %v3079_v2, %v2984_v18  ;;  %vm495_vm6 = vcmp.lt.s32.totalorder %v3079_v2, %v2986_v26 }
  0xdd   :  { %v4765_v8 = vsel %vm3514_vm1, 4294967295, %v4764_v8  ;;  %2332 = vmatpush3.bf16.msk.msra.mxu0 %vm3514_vm1, %v4686_v39  ;;  %vm631_vm14 = vmand %vm311_vm2, %vm487_vm4  ;;  %vm492_vm4 = vcmp.lt.s32.totalorder %v3091_v53, %v2975_v16  ;;  %vm325_vm1 = vcmp.ge.s32.totalorder %v3091_v53, %v2984_v18 }
  0xde   :  { %4766 = vst [vmem:[#allocation42_spill] sm:$0xff] %v4765_v8  ;;  %vm640_vm13 = vmand %vm320_vm0, %vm496_vm15  ;;  %2333 = vmatprep.subr.bf16.mxu0 %v4730_v0  ;;  %vm316_vm0 = vcmp.ge.s32.totalorder %v3091_v53, %v2973_v14  ;;  %v4770_v8 = vmov 0 }
  0xdf   :  { %vm3530_vm5 = vmpackc.low %vm640_vm13, %vm631_vm14  ;;  %vm501_vm14 = vcmp.lt.s32.totalorder %v3091_v53, %v2986_v26 }
  0xe0   :  { %v4768_v52 = vsel %vm3530_vm5, 4294967295, %v4767_v52  ;;  %1917 = vmatprep.subr.msk.bf16.mxu1 %vm3530_vm5, %v4686_v39  ;;  %vm630_vm2 = vmand %vm310_vm3, %vm486_vm12  ;;  %vm329_vm12 = vcmp.ge.s32.totalorder %v3066_v1, %v3015_v43  ;;  %vm338_vm5 = vcmp.ge.s32.totalorder %v3066_v1, %v3024_v51 }
  0xe1   :  { %4769 = vst [vmem:[#allocation43_spill] sm:$0xff] %v4768_v52  ;;  %vm639_vm15 = vmand %vm319_vm10, %vm495_vm6  ;;  %vm505_vm10 = vcmp.lt.s32.totalorder %v3066_v1, %v3052_v5  ;;  %v4773_v52 = vmov 0 }
  0xe2   :  { %vm3545_vm13 = vmpackc.low %vm639_vm15, %vm630_vm2  ;;  %vm514_vm2 = vcmp.lt.s32.totalorder %v3066_v1, %v3074_v31 }
  0xe3   :  { %v4771_v8 = vsel %vm3545_vm13, 4294967295, %v4770_v8  ;;  %1919 = vmatpush1.bf16.msk.msra.mxu1 %vm3545_vm13, %v4686_v39  ;;  %vm636_vm3 = vmand %vm316_vm0, %vm492_vm4  ;;  %vm328_vm4 = vcmp.ge.s32.totalorder %v3079_v2, %v3015_v43 }
  0xe4   :  { %4772 = vst [vmem:[#allocation44_spill] sm:$0xff] %v4771_v8  ;;  %vm645_vm6 = vmand %vm325_vm1, %vm501_vm14  ;;  %vm504_vm1 = vcmp.lt.s32.totalorder %v3079_v2, %v3052_v5  ;;  %v4776_v8 = vmov 0 }
  0xe5   :  { %vm3560_vm15 = vmpackc.low %vm645_vm6, %vm636_vm3  ;;  %vm337_vm3 = vcmp.ge.s32.totalorder %v3079_v2, %v3024_v51  ;;  %vm513_vm6 = vcmp.lt.s32.totalorder %v3079_v2, %v3074_v31 }
  0xe6   :  { %v4774_v52 = vsel %vm3560_vm15, 4294967295, %v4773_v52  ;;  %2334 = vmatpush3.bf16.msk.msra.mxu0 %vm3560_vm15, %v4686_v39  ;;  %vm649_vm0 = vmand %vm329_vm12, %vm505_vm10  ;;  %vm510_vm10 = vcmp.lt.s32.totalorder %v3091_v53, %v3052_v5  ;;  %vm343_vm15 = vcmp.ge.s32.totalorder %v3091_v53, %v3024_v51 }
  0xe7   :  { %4775 = vst [vmem:[#allocation45_spill] sm:$0xff] %v4774_v52  ;;  %vm658_vm14 = vmand %vm338_vm5, %vm514_vm2  ;;  %2335 = vmatprep.subr.bf16.mxu0 %v4730_v0  ;;  %vm334_vm5 = vcmp.ge.s32.totalorder %v3091_v53, %v3015_v43  ;;  %v4779_v52 = vmov 0 }
  0xe8   :  { %vm3576_vm13 = vmpackc.low %vm658_vm14, %vm649_vm0  ;;  %vm519_vm0 = vcmp.lt.s32.totalorder %v3091_v53, %v3074_v31 }
  0xe9   :  { %v4777_v8 = vsel %vm3576_vm13, 4294967295, %v4776_v8  ;;  %1921 = vmatprep.subr.msk.bf16.mxu1 %vm3576_vm13, %v4686_v39  ;;  %vm648_vm12 = vmand %vm328_vm4, %vm504_vm1 }
  0xea   :  { %4778 = vst [vmem:[#allocation46_spill] sm:$0xff] %v4777_v8  ;;  %vm657_vm2 = vmand %vm337_vm3, %vm513_vm6  ;;  %v4782_v8 = vmov 0  ;;  %vm4785_vm3 = vcmp.lt.s32.totalorder %v3066_v1, %v3063_v38  ;;  %vm4786_vm6 = vcmp.ge.s32.totalorder %v3066_v1, %v3054_v10 }
  0xeb   :  { %vm3591_vm14 = vmpackc.low %vm657_vm2, %vm648_vm12  ;;  %vm4787_vm2 = vcmp.lt.s32.totalorder %v3066_v1, %v3076_v50 }
  0xec   :  { %v4780_v52 = vsel %vm3591_vm14, 4294967295, %v4779_v52  ;;  %1923 = vmatpush1.bf16.msk.msra.mxu1 %vm3591_vm14, %v4686_v39  ;;  %vm654_vm4 = vmand %vm334_vm5, %vm510_vm10 }
  0xed   :  { %4781 = vst [vmem:[#allocation47_spill] sm:$0xff] %v4780_v52  ;;  %vm663_vm1 = vmand %vm343_vm15, %vm519_vm0  ;;  %vm4788_vm15 = vcmp.ge.s32.totalorder %v3066_v1, %v3061_v27  ;;  %v4789_v52 = vmov 0  ;;  %vm4792_vm0 = vcmp.lt.s32.totalorder %v3079_v2, %v3063_v38  ;;  %v4796_v1 = vmov 0 }
  0xee   :  { %vm3598_vm13 = vmpackc.low %vm663_vm1, %vm654_vm4  ;;  %vm4793_vm4 = vcmp.ge.s32.totalorder %v3079_v2, %v3054_v10 }
  0xef   :  { %v4783_v8 = vsel %vm3598_vm13, 4294967295, %v4782_v8  ;;  %2336 = vmatpush3.bf16.msk.msra.mxu0 %vm3598_vm13, %v4686_v39  ;;  %vm667_vm12 = vmand %vm4786_vm6, %vm4785_vm3  ;;  %vm4794_vm3 = vcmp.lt.s32.totalorder %v3079_v2, %v3076_v50  ;;  %vm4795_vm6 = vcmp.ge.s32.totalorder %v3079_v2, %v3061_v27  ;;  %v4802_v2 = vmov 0 }
  0xf0   :  { %4784 = vst [vmem:[#allocation48_spill] sm:$0xff] %v4783_v8  ;;  %vm676_vm5 = vmand %vm4788_vm15, %vm4787_vm2  ;;  %2337 = vmatprep.subr.bf16.mxu0 %v4730_v0  ;;  %v3623_v8 = vadd.s32 896, %v2634_v3  ;;  %vm4798_vm15 = vcmp.lt.s32.totalorder %v3091_v53, %v3063_v38 }
  0xf1   :  { %vm3618_vm10 = vmpackc.low %vm676_vm5, %vm667_vm12  ;;  %vm4799_vm5 = vcmp.ge.s32.totalorder %v3091_v53, %v3054_v10 }
  0xf2   :  { %v4790_v52 = vsel %vm3618_vm10, 4294967295, %v4789_v52  ;;  %1925 = vmatprep.subr.msk.bf16.mxu1 %vm3618_vm10, %v4686_v39  ;;  %vm666_vm1 = vmand %vm4793_vm4, %vm4792_vm0  ;;  %vm225_vm4 = vcmp.ge.s32.totalorder %v3623_v8, %v2641_v6  ;;  %vm234_vm13 = vcmp.ge.s32.totalorder %v3623_v8, %v2647_v9 }
  0xf3   :  { %4791 = vst [vmem:[#allocation49_spill] sm:$0xff] %v4790_v52  ;;  %vm675_vm12 = vmand %vm4795_vm6, %vm4794_vm3  ;;  %v3645_v52 = vadd.s32 768, %v2634_v3  ;;  %vm4800_vm3 = vcmp.lt.s32.totalorder %v3091_v53, %v3076_v50  ;;  %vm4801_vm6 = vcmp.ge.s32.totalorder %v3091_v53, %v3061_v27  ;;  %v4804_v3 = vmov 0  ;;  %v4889_v53 = vld [vmem:[#allocation27_spill] sm:$0xff] }
  0xf4   :  { %vm3640_vm2 = vmpackc.low %vm675_vm12, %vm666_vm1  ;;  %vm401_vm1 = vcmp.lt.s32.totalorder %v3623_v8, %v2651_v11 }
  0xf5   :  { %v4797_v1 = vsel %vm3640_vm2, 4294967295, %v4796_v1  ;;  %1927 = vmatpush1.bf16.msk.msra.mxu1 %vm3640_vm2, %v4686_v39  ;;  %vm672_vm0 = vmand %vm4799_vm5, %vm4798_vm15  ;;  %vm410_vm2 = vcmp.lt.s32.totalorder %v3623_v8, %v2658_v13 }
  0xf6   :  { %vm681_vm12 = vmand %vm4801_vm6, %vm4800_vm3  ;;  %vm224_vm3 = vcmp.ge.s32.totalorder %v3645_v52, %v2641_v6  ;;  %vm400_vm6 = vcmp.lt.s32.totalorder %v3645_v52, %v2651_v11  ;;  %v4806_v6 = vmov 0  ;;  %v4812_v11 = vmov 0 }
  0xf7   :  { %vm3670_vm15 = vmpackc.low %vm681_vm12, %vm672_vm0  ;;  %vm233_vm0 = vcmp.ge.s32.totalorder %v3645_v52, %v2647_v9  ;;  %vm409_vm12 = vcmp.lt.s32.totalorder %v3645_v52, %v2658_v13  ;;  %v4808_v9 = vmov 0  ;;  %v4816_v13 = vmov 0 }
  0xf8   :  { %v4803_v2 = vsel %vm3670_vm15, 4294967295, %v4802_v2  ;;  %2338 = vmatpush3.bf16.msk.msra.mxu0 %vm3670_vm15, %v4686_v39  ;;  %vm545_vm5 = vmand %vm225_vm4, %vm401_vm1  ;;  %1124 = vmatmul.mubr.bf16.vlgmr.msra.gmra.mrb[4].mxu1 %v3266_v41  ;;  %vm419_vm1 = vcmp.lt.s32.totalorder %v3623_v8, %v2695_v22 }
  0xf9   :  { %vm554_vm10 = vmand %vm234_vm13, %vm410_vm2  ;;  %2009 = vmatprep.subr.msk.bf16.mxu0 %vm2674_vm11, %v4686_v39  ;;  %1205 = vmatprep.mubr.bf16.mxu1 %v4720_v15  ;;  %vm243_vm2 = vcmp.ge.s32.totalorder %v3623_v8, %v2693_v21 }
  0xfa   :  { %vm3690_vm4 = vmpackc.low %vm554_vm10, %vm545_vm5  ;;  %vm252_vm10 = vcmp.ge.s32.totalorder %v3623_v8, %v2704_v23  ;;  %vm428_vm5 = vcmp.lt.s32.totalorder %v3623_v8, %v2706_v24 }
  0xfb   :  { %v4805_v3 = vsel %vm3690_vm4, 4294967295, %v4804_v3  ;;  %1961 = vmatprep.subr.msk.bf16.mxu1 %vm3690_vm4, %v4686_v39  ;;  %vm544_vm13 = vmand %vm224_vm3, %vm400_vm6  ;;  %2340 = vmatmul.mubr.bf16.vlgmr.msra.gmra.mrb[4].mxu0 %v3266_v41 }
  0xfc   :  { %vm553_vm11 = vmand %vm233_vm0, %vm409_vm12  ;;  %2011 = vmatpush1.bf16.msk.msra.mxu0 %vm2712_vm8, %v4686_v39  ;;  %1286 = vmatprep.mubr.bf16.mxu0 %v4720_v15  ;;  %vm242_vm0 = vcmp.ge.s32.totalorder %v3645_v52, %v2693_v21  ;;  %vm418_vm12 = vcmp.lt.s32.totalorder %v3645_v52, %v2695_v22  ;;  %v4819_v21 = vmov 0  ;;  %v4822_v22 = vmov 0 }
  0xfd   :  { %vm3710_vm3 = vmpackc.low %vm553_vm11, %vm544_vm13  ;;  %2013 = vmatprep.subr.msk.bf16.mxu0 %vm2744_vm9, %v4686_v39  ;;  %vm251_vm11 = vcmp.ge.s32.totalorder %v3645_v52, %v2704_v23  ;;  %vm427_vm13 = vcmp.lt.s32.totalorder %v3645_v52, %v2706_v24  ;;  %vm270_vm9 = vcmp.ge.s32.totalorder %v3623_v8, %v2774_v35  ;;  %v4826_v23 = vmov 0 }
  0xfe   :  { %v4807_v6 = vsel %vm3710_vm3, 4294967295, %v4806_v6  ;;  %1963 = vmatpush1.bf16.msk.msra.mxu1 %vm3710_vm3, %v4686_v39  ;;  %vm563_vm6 = vmand %vm243_vm2, %vm419_vm1  ;;  %vm4810_vm2 = vnez %v4649_v37  ;;  %v4830_v24 = vmov 0 }
  0xff   :  { %vm572_vm8 = vmand %vm252_vm10, %vm428_vm5  ;;  %vm261_vm10 = vcmp.ge.s32.totalorder %v3623_v8, %v2763_v33  ;;  %vm437_vm5 = vcmp.lt.s32.totalorder %v3623_v8, %v2765_v34 }
 0x100   :  { %vm3728_vm15 = vmpackc.low %vm572_vm8, %vm563_vm6  ;;  %2015 = vmatpush1.bf16.msk.msra.mxu0 %vm4810_vm2, %v4686_v39  ;;  %vm4811_vm8 = vnez %v4653_v42  ;;  %vm446_vm2 = vcmp.lt.s32.totalorder %v3623_v8, %v2776_v36 }
 0x101   :  { %v4809_v9 = vsel %vm3728_vm15, 4294967295, %v4808_v9  ;;  %1965 = vmatprep.subr.msk.bf16.mxu1 %vm3728_vm15, %v4686_v39  ;;  %vm562_vm1 = vmand %vm242_vm0, %vm418_vm12  ;;  %2017 = vmatprep.subr.msk.bf16.mxu0 %vm4811_vm8, %v4686_v39  ;;  %vm260_vm12 = vcmp.ge.s32.totalorder %v3645_v52, %v2763_v33  ;;  %vm288_vm15 = vcmp.ge.s32.totalorder %v3623_v8, %v2844_v47  ;;  %v4833_v33 = vmov 0 }
 0x102   :  { %vm571_vm6 = vmand %vm251_vm11, %vm427_vm13  ;;  %vm436_vm11 = vcmp.lt.s32.totalorder %v3645_v52, %v2765_v34  ;;  %vm4814_vm13 = vnez %v4657_v49  ;;  %v4836_v34 = vmov 0 }
 0x103   :  { %vm3749_vm3 = vmpackc.low %vm571_vm6, %vm562_vm1  ;;  %vm269_vm1 = vcmp.ge.s32.totalorder %v3645_v52, %v2774_v35  ;;  %vm445_vm6 = vcmp.lt.s32.totalorder %v3645_v52, %v2776_v36  ;;  %v4840_v35 = vmov 0  ;;  %v4844_v36 = vmov 0 }
 0x104   :  { %v4813_v11 = vsel %vm3749_vm3, 4294967295, %v4812_v11  ;;  %1967 = vmatpush1.bf16.msk.msra.mxu1 %vm3749_vm3, %v4686_v39  ;;  %vm581_vm0 = vmand %vm261_vm10, %vm437_vm5  ;;  %2019 = vmatpush1.bf16.msk.msra.mxu0 %vm4814_vm13, %v4686_v39  ;;  %vm4815_vm10 = vnez %v4662_v54 }
 0x105   :  { %vm590_vm8 = vmand %vm270_vm9, %vm446_vm2  ;;  %2021 = vmatprep.subr.msk.bf16.mxu0 %vm4815_vm10, %v4686_v39  ;;  %vm279_vm9 = vcmp.ge.s32.totalorder %v3623_v8, %v2833_v45  ;;  %vm455_vm2 = vcmp.lt.s32.totalorder %v3623_v8, %v2835_v46 }
 0x106   :  { %vm3770_vm5 = vmpackc.low %vm590_vm8, %vm581_vm0  ;;  %vm464_vm8 = vcmp.lt.s32.totalorder %v3623_v8, %v2846_v48  ;;  %vm4818_vm0 = vnez %v4667_v61 }
 0x107   :  { %v4817_v13 = vsel %vm3770_vm5, 4294967295, %v4816_v13  ;;  %1969 = vmatprep.subr.msk.bf16.mxu1 %vm3770_vm5, %v4686_v39  ;;  %vm580_vm13 = vmand %vm260_vm12, %vm436_vm11  ;;  %vm4821_vm12 = vnez %v4672_v7 }
 0x108   :  { %vm589_vm3 = vmand %vm269_vm1, %vm445_vm6  ;;  %2023 = vmatpush1.bf16.msk.msra.mxu0 %vm4818_vm0, %v4686_v39  ;;  %vm278_vm1 = vcmp.ge.s32.totalorder %v3645_v52, %v2833_v45  ;;  %vm454_vm6 = vcmp.lt.s32.totalorder %v3645_v52, %v2835_v46 }
 0x109   :  { %vm3788_vm10 = vmpackc.low %vm589_vm3, %vm580_vm13  ;;  %2025 = vmatprep.subr.msk.bf16.mxu0 %vm4821_vm12, %v4686_v39  ;;  %vm287_vm3 = vcmp.ge.s32.totalorder %v3645_v52, %v2844_v47  ;;  %vm463_vm13 = vcmp.lt.s32.totalorder %v3645_v52, %v2846_v48  ;;  %vm306_vm12 = vcmp.ge.s32.totalorder %v3623_v8, %v2914_v59  ;;  %v4852_v47 = vld [vmem:[#allocation16_spill] sm:$0xff]  ;;  %v4854_v48 = vld [vmem:[#allocation17_spill] sm:$0xff] }
 0x10a   :  { %v4820_v21 = vsel %vm3788_vm10, 4294967295, %v4819_v21  ;;  %1971 = vmatpush1.bf16.msk.msra.mxu1 %vm3788_vm10, %v4686_v39  ;;  %vm599_vm11 = vmand %vm279_vm9, %vm455_vm2  ;;  %vm4824_vm9 = vnez %v4677_v29 }
 0x10b   :  { %vm608_vm0 = vmand %vm288_vm15, %vm464_vm8  ;;  %vm297_vm15 = vcmp.ge.s32.totalorder %v3623_v8, %v2903_v57  ;;  %vm473_vm8 = vcmp.lt.s32.totalorder %v3623_v8, %v2905_v58 }
 0x10c   :  { %vm3806_vm5 = vmpackc.low %vm608_vm0, %vm599_vm11  ;;  %2027 = vmatpush1.bf16.msk.msra.mxu0 %vm4824_vm9, %v4686_v39  ;;  %vm4825_vm0 = vnez %v4682_v63  ;;  %vm482_vm9 = vcmp.lt.s32.totalorder %v3623_v8, %v2916_v60 }
 0x10d   :  { %v4823_v22 = vsel %vm3806_vm5, 4294967295, %v4822_v22  ;;  %1973 = vmatprep.subr.msk.bf16.mxu1 %vm3806_vm5, %v4686_v39  ;;  %vm598_vm2 = vmand %vm278_vm1, %vm454_vm6  ;;  %2029 = vmatprep.subr.msk.bf16.mxu0 %vm4825_vm0, %v4686_v39  ;;  %vm296_vm6 = vcmp.ge.s32.totalorder %v3645_v52, %v2903_v57  ;;  %vm324_vm5 = vcmp.ge.s32.totalorder %v3623_v8, %v2984_v18  ;;  %v4858_v57 = vld [vmem:[#allocation18_spill] sm:$0xff] }
 0x10e   :  { %vm607_vm11 = vmand %vm287_vm3, %vm463_vm13  ;;  %vm472_vm3 = vcmp.lt.s32.totalorder %v3645_v52, %v2905_v58  ;;  %vm4828_vm13 = vnez %v4691_v55  ;;  %v4860_v58 = vld [vmem:[#allocation28_spill] sm:$0xff] }
 0x10f   :  { %vm3827_vm10 = vmpackc.low %vm607_vm11, %vm598_vm2  ;;  %vm305_vm2 = vcmp.ge.s32.totalorder %v3645_v52, %v2914_v59  ;;  %vm481_vm11 = vcmp.lt.s32.totalorder %v3645_v52, %v2916_v60  ;;  %v4862_v59 = vld [vmem:[#allocation19_spill] sm:$0xff] }
 0x110   :  { %v4827_v23 = vsel %vm3827_vm10, 4294967295, %v4826_v23  ;;  %1975 = vmatpush1.bf16.msk.msra.mxu1 %vm3827_vm10, %v4686_v39  ;;  %vm617_vm1 = vmand %vm297_vm15, %vm473_vm8  ;;  %2031 = vmatpush1.bf16.msk.msra.mxu0 %vm4828_vm13, %v4686_v39  ;;  %vm4829_vm15 = vnez %v4700_v19 }
 0x111   :  { %vm626_vm0 = vmand %vm306_vm12, %vm482_vm9  ;;  %2033 = vmatprep.subr.msk.bf16.mxu0 %vm4829_vm15, %v4686_v39  ;;  %vm315_vm12 = vcmp.ge.s32.totalorder %v3623_v8, %v2973_v14  ;;  %vm491_vm9 = vcmp.lt.s32.totalorder %v3623_v8, %v2975_v16 }
 0x112   :  { %vm3848_vm8 = vmpackc.low %vm626_vm0, %vm617_vm1  ;;  %vm500_vm0 = vcmp.lt.s32.totalorder %v3623_v8, %v2986_v26  ;;  %vm4832_vm1 = vnez %v4705_v12 }
 0x113   :  { %v4831_v24 = vsel %vm3848_vm8, 4294967295, %v4830_v24  ;;  %1977 = vmatprep.subr.msk.bf16.mxu1 %vm3848_vm8, %v4686_v39  ;;  %vm616_vm13 = vmand %vm296_vm6, %vm472_vm3  ;;  %vm4835_vm6 = vnez %v4710_v4 }
 0x114   :  { %vm625_vm10 = vmand %vm305_vm2, %vm481_vm11  ;;  %2035 = vmatpush1.bf16.msk.msra.mxu0 %vm4832_vm1, %v4686_v39  ;;  %vm314_vm2 = vcmp.ge.s32.totalorder %v3645_v52, %v2973_v14  ;;  %vm490_vm11 = vcmp.lt.s32.totalorder %v3645_v52, %v2975_v16  ;;  %v4865_v14 = vld [vmem:[#allocation20_spill] sm:$0xff]  ;;  %v4867_v16 = vld [vmem:[#allocation31_spill] sm:$0xff] }
 0x115   :  { %vm3866_vm15 = vmpackc.low %vm625_vm10, %vm616_vm13  ;;  %2037 = vmatprep.subr.msk.bf16.mxu0 %vm4835_vm6, %v4686_v39  ;;  %vm323_vm10 = vcmp.ge.s32.totalorder %v3645_v52, %v2984_v18  ;;  %vm499_vm13 = vcmp.lt.s32.totalorder %v3645_v52, %v2986_v26  ;;  %vm342_vm6 = vcmp.ge.s32.totalorder %v3623_v8, %v3024_v51  ;;  %v4869_v18 = vld [vmem:[#allocation21_spill] sm:$0xff]  ;;  %v4871_v26 = vld [vmem:[#allocation32_spill] sm:$0xff] }
 0x116   :  { %v4834_v33 = vsel %vm3866_vm15, 4294967295, %v4833_v33  ;;  %1979 = vmatpush1.bf16.msk.msra.mxu1 %vm3866_vm15, %v4686_v39  ;;  %vm635_vm3 = vmand %vm315_vm12, %vm491_vm9  ;;  %vm4838_vm12 = vnez %v4716_v56 }
 0x117   :  { %vm644_vm1 = vmand %vm324_vm5, %vm500_vm0  ;;  %vm333_vm5 = vcmp.ge.s32.totalorder %v3623_v8, %v3015_v43  ;;  %vm509_vm0 = vcmp.lt.s32.totalorder %v3623_v8, %v3052_v5 }
 0x118   :  { %vm3884_vm8 = vmpackc.low %vm644_vm1, %vm635_vm3  ;;  %2039 = vmatpush1.bf16.msk.msra.mxu0 %vm4838_vm12, %v4686_v39  ;;  %vm4839_vm1 = vnez %v4639_v20  ;;  %vm518_vm12 = vcmp.lt.s32.totalorder %v3623_v8, %v3074_v31 }
 0x119   :  { %v4837_v34 = vsel %vm3884_vm8, 4294967295, %v4836_v34  ;;  %1981 = vmatprep.subr.msk.bf16.mxu1 %vm3884_vm8, %v4686_v39  ;;  %vm634_vm9 = vmand %vm314_vm2, %vm490_vm11  ;;  %2073 = vmatprep.subr.msk.bf16.mxu0 %vm4839_vm1, %v4686_v39  ;;  %vm332_vm11 = vcmp.ge.s32.totalorder %v3645_v52, %v3015_v43  ;;  %vm517_vm1 = vcmp.lt.s32.totalorder %v3645_v52, %v3074_v31  ;;  %v4873_v43 = vld [vmem:[#allocation22_spill] sm:$0xff] }
 0x11a   :  { %vm643_vm3 = vmand %vm323_vm10, %vm499_vm13  ;;  %vm508_vm10 = vcmp.lt.s32.totalorder %v3645_v52, %v3052_v5  ;;  %vm4842_vm13 = vnez %v4643_v28  ;;  %v4877_v5 = vld [vmem:[#allocation23_spill] sm:$0xff]  ;;  %v4885_v31 = vld [vmem:[#allocation26_spill] sm:$0xff] }
 0x11b   :  { %vm3905_vm15 = vmpackc.low %vm643_vm3, %vm634_vm9  ;;  %1287 = vmatmul.mubr.bf16.vlgmr.msra.gmra.mrb[8].mxu0 %v3199_v62  ;;  %vm341_vm3 = vcmp.ge.s32.totalorder %v3645_v52, %v3024_v51  ;;  %v4875_v51 = vld [vmem:[#allocation34_spill] sm:$0xff] }
 0x11c   :  { %v4841_v35 = vsel %vm3905_vm15, 4294967295, %v4840_v35  ;;  %1983 = vmatpush1.bf16.msk.msra.mxu1 %vm3905_vm15, %v4686_v39  ;;  %vm653_vm2 = vmand %vm333_vm5, %vm509_vm0  ;;  %2075 = vmatpush1.bf16.msk.msra.mxu0 %vm4842_vm13, %v4686_v39  ;;  %vm4843_vm5 = vnez %v4647_v32  ;;  %vm527_vm13 = vcmp.lt.s32.totalorder %v3623_v8, %v3063_v38 }
 0x11d   :  { %vm662_vm9 = vmand %vm342_vm6, %vm518_vm12  ;;  %2077 = vmatprep.subr.msk.bf16.mxu0 %vm4843_vm5, %v4686_v39  ;;  %1368 = vmatprep.mubr.bf16.mxu0 %v4720_v15  ;;  %vm351_vm12 = vcmp.ge.s32.totalorder %v3623_v8, %v3054_v10  ;;  %vm360_vm5 = vcmp.ge.s32.totalorder %v3623_v8, %v3061_v27 }
 0x11e   :  { %vm3928_vm0 = vmpackc.low %vm662_vm9, %vm653_vm2  ;;  %vm536_vm2 = vcmp.lt.s32.totalorder %v3623_v8, %v3076_v50  ;;  %vm4846_vm9 = vnez %v4651_v40  ;;  %v4891_v8 = vld [vmem:[#allocation40_spill] sm:$0xff] }
 0x11f   :  { %v4845_v36 = vsel %vm3928_vm0, 4294967295, %v4844_v36  ;;  %1985 = vmatprep.subr.msk.bf16.mxu1 %vm3928_vm0, %v4686_v39  ;;  %vm652_vm6 = vmand %vm332_vm11, %vm508_vm10  ;;  %vm4849_vm11 = vnez %v4655_v44  ;;  %vm350_vm10 = vcmp.ge.s32.totalorder %v3645_v52, %v3054_v10  ;;  %v4879_v10 = vld [vmem:[#allocation35_spill] sm:$0xff] }
 0x120   :  { %vm661_vm15 = vmand %vm341_vm3, %vm517_vm1  ;;  %2079 = vmatpush1.bf16.msk.msra.mxu0 %vm4846_vm9, %v4686_v39  ;;  %vm526_vm3 = vcmp.lt.s32.totalorder %v3645_v52, %v3063_v38  ;;  %v4883_v38 = vld [vmem:[#allocation37_spill] sm:$0xff] }
 0x121   :  { %vm3946_vm8 = vmpackc.low %vm661_vm15, %vm652_vm6  ;;  %2081 = vmatprep.subr.msk.bf16.mxu0 %vm4849_vm11, %v4686_v39  ;;  %vm359_vm15 = vcmp.ge.s32.totalorder %v3645_v52, %v3061_v27  ;;  %vm535_vm6 = vcmp.lt.s32.totalorder %v3645_v52, %v3076_v50  ;;  %v4881_v27 = vld [vmem:[#allocation24_spill] sm:$0xff]  ;;  %v4887_v50 = vld [vmem:[#allocation38_spill] sm:$0xff] }
 0x122   :  { %1987 = vmatpush1.bf16.msk.msra.mxu1 %vm3946_vm8, %v4686_v39  ;;  %vm671_vm1 = vmand %vm351_vm12, %vm527_vm13  ;;  %vm4853_vm13 = vnez %v4852_v47 }
 0x123   :  { %vm680_vm9 = vmand %vm360_vm5, %vm536_vm2  ;;  %vm4855_vm5 = vnez %v4854_v48 }
 0x124   :  { %vm3964_vm0 = vmpackc.low %vm680_vm9, %vm671_vm1  ;;  %2083 = vmatpush1.bf16.msk.msra.mxu0 %vm4853_vm13, %v4686_v39  ;;  %vm4859_vm9 = vnez %v4858_v57  ;;  %vm4861_vm1 = vnez %v4860_v58  ;;  %vm4888_vm13 = vnez %v4887_v50 }
 0x125   :  { %1989 = vmatprep.subr.msk.bf16.mxu1 %vm3964_vm0, %v4686_v39  ;;  %vm670_vm12 = vmand %vm350_vm10, %vm526_vm3  ;;  %2085 = vmatprep.subr.msk.bf16.mxu0 %vm4855_vm5, %v4686_v39  ;;  %vm4863_vm10 = vnez %v4862_v59  ;;  %vm4866_vm3 = vnez %v4865_v14  ;;  %vm4884_vm5 = vnez %v4883_v38  ;;  %v4907_v14 = vld [vmem:[#allocation36_spill] sm:$0xff]  ;;  %v4909_v59 = vld [vmem:[#allocation49_spill] sm:$0xff] }
 0x126   :  { %vm679_vm2 = vmand %vm359_vm15, %vm535_vm6  ;;  %vm4868_vm15 = vnez %v4867_v16  ;;  %vm4870_vm6 = vnez %v4869_v18 }
 0x127   :  { %vm3977_vm11 = vmpackc.low %vm679_vm2, %vm670_vm12  ;;  %vm4872_vm12 = vnez %v4871_v26  ;;  %vm4874_vm2 = vnez %v4873_v43  ;;  %v4902_v43 = vld [vmem:[#allocation33_spill] sm:$0xff] }
 0x128   :  { %1991 = vmatpush1.bf16.msk.msra.mxu1 %vm3977_vm11, %v4686_v39  ;;  %2087 = vmatpush1.bf16.msk.msra.mxu0 %vm4859_vm9, %v4686_v39  ;;  %vm4882_vm9 = vnez %v4881_v27  ;;  %v4893_v27 = vld [vmem:[#allocation41_spill] sm:$0xff] }
 0x129   :  { %2041 = vmatprep.subr.msk.bf16.mxu1 %vm4861_vm1, %v4686_v39  ;;  %2089 = vmatprep.subr.msk.bf16.mxu0 %vm4863_vm10, %v4686_v39  ;;  %vm4878_vm10 = vnez %v4877_v5  ;;  %v4897_v5 = vld [vmem:[#allocation43_spill] sm:$0xff] }
 0x12b   :  { %1206 = vmatmul.mubr.bf16.vlgmr.msra.gmra.mrb[8].mxu1 %v3266_v41 }
 0x12c   :  { %2043 = vmatpush1.bf16.msk.msra.mxu1 %vm3315_vm7, %v4686_v39  ;;  %2091 = vmatpush1.bf16.msk.msra.mxu0 %vm4866_vm3, %v4686_v39  ;;  %vm4876_vm3 = vnez %v4875_v51  ;;  %v73_v51 = vld [vmem:[#allocation5 + $0x10] sm:$0xff] }
 0x12d   :  { %2045 = vmatprep.subr.msk.bf16.mxu1 %vm4868_vm15, %v4686_v39  ;;  %2093 = vmatprep.subr.msk.bf16.mxu0 %vm4870_vm6, %v4686_v39  ;;  %vm4880_vm6 = vnez %v4879_v10 }
 0x12e   :  { %1327 = vmatprep.mubr.bf16.mxu1 %v4720_v15 }
 0x130   :  { %2047 = vmatpush1.bf16.msk.msra.mxu1 %vm4872_vm12, %v4686_v39  ;;  %2095 = vmatpush1.bf16.msk.msra.mxu0 %vm4874_vm2, %v4686_v39  ;;  %vm4886_vm2 = vnez %v4885_v31  ;;  %v4895_v31 = vld [vmem:[#allocation30_spill] sm:$0xff] }
 0x131   :  { %2049 = vmatprep.subr.msk.bf16.mxu1 %vm4876_vm3, %v4686_v39  ;;  %2097 = vmatprep.subr.msk.bf16.mxu0 %vm4878_vm10, %v4686_v39  ;;  %vm4890_vm10 = vnez %v4889_v53  ;;  %v4900_v53 = vld [vmem:[#allocation44_spill] sm:$0xff] }
 0x134   :  { %2051 = vmatpush1.bf16.msk.msra.mxu1 %vm4880_vm6, %v4686_v39  ;;  %2099 = vmatpush1.bf16.msk.msra.mxu0 %vm4882_vm9, %v4686_v39  ;;  %vm4892_vm6 = vnez %v4891_v8  ;;  %vm4894_vm9 = vnez %v4893_v27 }
 0x135   :  { %2053 = vmatprep.subr.msk.bf16.mxu1 %vm4884_vm5, %v4686_v39  ;;  %2101 = vmatprep.subr.msk.bf16.mxu0 %vm4886_vm2, %v4686_v39  ;;  %vm4896_vm2 = vnez %v4895_v31  ;;  %v4904_v31 = vld [vmem:[#allocation46_spill] sm:$0xff] }
 0x138   :  { %2055 = vmatpush1.bf16.msk.msra.mxu1 %vm4888_vm13, %v4686_v39  ;;  %2103 = vmatpush1.bf16.msk.msra.mxu0 %vm4890_vm10, %v4686_v39  ;;  %vm4898_vm13 = vnez %v4897_v5  ;;  %vm4899_vm10 = vmmov 0  }
 0x139   :  { %2057 = vmatprep.subr.msk.bf16.mxu1 %vm4892_vm6, %v4686_v39  ;;  %2343 = vmatprep.subr.bf16.mxu0 %v4730_v0  ;;  %vm4901_vm6 = vnez %v4900_v53 }
 0x13b   :  { %1369 = vmatmul.mubr.bf16.vlgmr.msra.gmra.mrb[0].mxu0 %v3199_v62 }
 0x13c   :  { %2059 = vmatpush1.bf16.msk.msra.mxu1 %vm4894_vm9, %v4686_v39  ;;  %2344 = vmatpush3.bf16.msk.msra.mxu0 %vm4896_vm2, %v4686_v39  ;;  %vm4903_vm9 = vnez %v4902_v43  ;;  %vm4905_vm2 = vnez %v4904_v31  ;;  %v4912_v43 = vld [vmem:[#allocation39_spill] sm:$0xff] }
 0x13d   :  { %2061 = vmatprep.subr.msk.bf16.mxu1 %vm4898_vm13, %v4686_v39  ;;  %2345 = vmatprep.subr.bf16.mxu0 %v4730_v0 }
 0x13e   :  { %2359 = vmatprep.mubr.msk.bf16.mxu0 %vm4899_vm10, %v4730_v0  ;;  %vm4908_vm10 = vnez %v4907_v14  ;;  %v4915_v14 = vld [vmem:[#allocation42_spill] sm:$0xff] }
 0x140   :  { %2063 = vmatpush1.bf16.msk.msra.mxu1 %vm4901_vm6, %v4686_v39  ;;  %2346 = vmatpush3.bf16.msk.msra.mxu0 %vm4903_vm9, %v4686_v39  ;;  %vm4910_vm6 = vnez %v4909_v59  ;;  %vm4911_vm9 = vnez %v4797_v1 }
 0x141   :  { %2065 = vmatprep.subr.msk.bf16.mxu1 %vm4905_vm2, %v4686_v39  ;;  %2347 = vmatprep.subr.bf16.mxu0 %v4730_v0  ;;  %vm4913_vm2 = vnez %v4912_v43  ;;  %v4919_v43 = vld [vmem:[#allocation45_spill] sm:$0xff] }
 0x144   :  { %2067 = vmatpush1.bf16.msk.msra.mxu1 %vm3591_vm14, %v4686_v39  ;;  %2348 = vmatpush3.bf16.msk.msra.mxu0 %vm4908_vm10, %v4686_v39  ;;  %vm4914_vm10 = vnez %v4807_v6 }
 0x145   :  { %2069 = vmatprep.subr.msk.bf16.mxu1 %vm4910_vm6, %v4686_v39  ;;  %2349 = vmatprep.subr.bf16.mxu0 %v4730_v0  ;;  %vm4916_vm6 = vnez %v4915_v14  ;;  %v4923_v14 = vld [vmem:[#allocation48_spill] sm:$0xff] }
 0x148   :  { %2071 = vmatpush1.bf16.msk.msra.mxu1 %vm4911_vm9, %v4686_v39  ;;  %2350 = vmatpush3.bf16.msk.msra.mxu0 %vm4913_vm2, %v4686_v39  ;;  %vm4917_vm9 = vnez %v4809_v9  ;;  %vm4918_vm2 = vnez %v4813_v11 }
 0x149   :  { %2105 = vmatprep.subr.msk.bf16.mxu1 %vm3690_vm4, %v4686_v39  ;;  %2351 = vmatprep.subr.bf16.mxu0 %v4730_v0  ;;  %vm4920_vm4 = vnez %v4919_v43 }
 0x14b   :  { %1328 = vmatmul.mubr.bf16.vlgmr.msra.gmra.mrb[4].mxu1 %v3199_v62 }
 0x14c   :  { %2107 = vmatpush1.bf16.msk.msra.mxu1 %vm4914_vm10, %v4686_v39  ;;  %2352 = vmatpush3.bf16.msk.msra.mxu0 %vm4916_vm6, %v4686_v39  ;;  %vm4921_vm10 = vnez %v4817_v13  ;;  %vm4922_vm6 = vnez %v4820_v21 }
 0x14d   :  { %2109 = vmatprep.subr.msk.bf16.mxu1 %vm4917_vm9, %v4686_v39  ;;  %2353 = vmatprep.subr.bf16.mxu0 %v4730_v0  ;;  %vm4924_vm9 = vnez %v4923_v14 }
 0x14e   :  { %1409 = vmatprep.mubr.bf16.mxu1 %v4720_v15 }
 0x150   :  { %2111 = vmatpush1.bf16.msk.msra.mxu1 %vm4918_vm2, %v4686_v39  ;;  %2354 = vmatpush3.bf16.msk.msra.mxu0 %vm4920_vm4, %v4686_v39  ;;  %vm4925_vm2 = vnez %v4823_v22  ;;  %vm4926_vm4 = vnez %v4827_v23 }
 0x151   :  { %2113 = vmatprep.subr.msk.bf16.mxu1 %vm4921_vm10, %v4686_v39  ;;  %2355 = vmatprep.subr.bf16.mxu0 %v4730_v0  ;;  %vm4927_vm10 = vnez %v4803_v2 }
 0x154   :  { %2115 = vmatpush1.bf16.msk.msra.mxu1 %vm4922_vm6, %v4686_v39  ;;  %2356 = vmatpush3.bf16.msk.msra.mxu0 %vm4924_vm9, %v4686_v39  ;;  %vm4928_vm6 = vnez %v4831_v24  ;;  %vm4929_vm9 = vnez %v4637_v17  ;;  %v1047_v17 = vunpack.c.l.bf16 %v3266_v41  ;;  %v5007_v41 = vld [vmem:[#allocation15_spill] sm:$0xff] }
 0x155   :  { %2117 = vmatprep.subr.msk.bf16.mxu1 %vm4925_vm2, %v4686_v39  ;;  %2357 = vmatprep.subr.bf16.mxu0 %v4730_v0  ;;  %vm4930_vm2 = vnez %v4834_v33 }
 0x158   :  { %2119 = vmatpush1.bf16.msk.msra.mxu1 %vm4926_vm4, %v4686_v39  ;;  %2358 = vmatpush3.bf16.msk.msra.mxu0 %vm4927_vm10, %v4686_v39  ;;  %vm4931_vm4 = vnez %v4641_v25  ;;  %vm4932_vm10 = vnez %v4837_v34  ;;  %v4946_v25 = vld [vmem:[#allocation25_spill] sm:$0xff] }
 0x159   :  { %2121 = vmatprep.subr.msk.bf16.mxu1 %vm4928_vm6, %v4686_v39  ;;  %2153 = vmatprep.subr.msk.bf16.mxu0 %vm4929_vm9, %v4686_v39  ;;  %vm4933_vm6 = vnez %v4645_v30  ;;  %vm4934_vm9 = vnez %v4841_v35  ;;  %v1048_v30 = vsub.f32 %v4946_v25, %v1047_v17 }
 0x15b   :  { %2360 = vmatmul.mubr.bf16.vlgmr.msra.gmra.mrb[4].mxu0 %v3199_v62 }
 0x15c   :  { %2123 = vmatpush1.bf16.msk.msra.mxu1 %vm4930_vm2, %v4686_v39  ;;  %2155 = vmatpush1.bf16.msk.msra.mxu0 %vm4931_vm4, %v4686_v39  ;;  %vm4935_vm2 = vnez %v4649_v37  ;;  %vm4936_vm4 = vnez %v4845_v36 }
 0x15d   :  { %2125 = vmatprep.subr.msk.bf16.mxu1 %vm4932_vm10, %v4686_v39  ;;  %2157 = vmatprep.subr.msk.bf16.mxu0 %vm4933_vm6, %v4686_v39  ;;  %vm4937_vm10 = vnez %v4653_v42  ;;  %vm4938_vm6 = vnez %v4657_v49  ;;  %v4970_v42 = vld [vmem:[#allocation20_spill] sm:$0xff]  ;;  %v4976_v49 = vld [vmem:[#allocation22_spill] sm:$0xff] }
 0x15e   :  { %1490 = vmatprep.mubr.bf16.mxu0 %v4720_v15 }
 0x160   :  { %2127 = vmatpush1.bf16.msk.msra.mxu1 %vm4934_vm9, %v4686_v39  ;;  %2159 = vmatpush1.bf16.msk.msra.mxu0 %vm4935_vm2, %v4686_v39  ;;  %vm4939_vm2 = vnez %v4662_v54  ;;  %v4979_v54 = vld [vmem:[#allocation23_spill] sm:$0xff] }
 0x161   :  { %2129 = vmatprep.subr.msk.bf16.mxu1 %vm4936_vm4, %v4686_v39  ;;  %2161 = vmatprep.subr.msk.bf16.mxu0 %vm4937_vm10, %v4686_v39  ;;  %vm4940_vm10 = vnez %v4667_v61  ;;  %v4982_v61 = vld [vmem:[#allocation24_spill] sm:$0xff] }
 0x164   :  { %2131 = vmatpush1.bf16.msk.msra.mxu1 %vm3946_vm8, %v4686_v39  ;;  %2163 = vmatpush1.bf16.msk.msra.mxu0 %vm4938_vm6, %v4686_v39  ;;  %vm4941_vm6 = vnez %v4672_v7  ;;  %v4985_v7 = vld [vmem:[#allocation26_spill] sm:$0xff] }
 0x165   :  { %2133 = vmatprep.subr.msk.bf16.mxu1 %vm3964_vm0, %v4686_v39  ;;  %2165 = vmatprep.subr.msk.bf16.mxu0 %vm4939_vm2, %v4686_v39  ;;  %vm4942_vm2 = vnez %v4677_v29  ;;  %v4992_v29 = vld [vmem:[#allocation30_spill] sm:$0xff] }
 0x168   :  { %2135 = vmatpush1.bf16.msk.msra.mxu1 %vm3977_vm11, %v4686_v39  ;;  %2167 = vmatpush1.bf16.msk.msra.mxu0 %vm4940_vm10, %v4686_v39  ;;  %vm4947_vm10 = vnez %v4879_v10  ;;  %v113_v10 = vsub.s32 4, %v5007_v41 }
 0x169   :  { %2185 = vmatprep.subr.msk.bf16.mxu1 %vm4861_vm1, %v4686_v39  ;;  %2169 = vmatprep.subr.msk.bf16.mxu0 %vm4941_vm6, %v4686_v39  ;;  %vm4943_vm1 = vnez %v4682_v63  ;;  %vm4950_vm6 = vnez %v4887_v50  ;;  %v4996_v63 = vld [vmem:[#allocation33_spill] sm:$0xff] }
 0x16b   :  { %1410 = vmatmul.mubr.bf16.vlgmr.msra.gmra.mrb[8].mxu1 %v3199_v62  ;;  %v5000_v62 = vld [vmem:[#allocation39_spill] sm:$0xff] }
 0x16c   :  { %2187 = vmatpush1.bf16.msk.msra.mxu1 %vm3315_vm7, %v4686_v39  ;;  %2171 = vmatpush1.bf16.msk.msra.mxu0 %vm4942_vm2, %v4686_v39  ;;  %vm4944_vm7 = vnez %v4691_v55  ;;  %vm4951_vm2 = vnez %v4716_v56  ;;  %v4998_v55 = vld [vmem:[#allocation36_spill] sm:$0xff] }
 0x16d   :  { %2189 = vmatprep.subr.msk.bf16.mxu1 %vm4868_vm15, %v4686_v39  ;;  %2173 = vmatprep.subr.msk.bf16.mxu0 %vm4943_vm1, %v4686_v39  ;;  %vm4945_vm15 = vnez %v4700_v19  ;;  %v4218_v19 = vpack.c.bf16 %v1048_v30, %v1048_v30  ;;  %vm4952_vm1 = vnez %v4891_v8  ;;  %v71_v56 = vld [vmem:[#allocation5] sm:$0xff] }
 0x16e   :  { %1531 = vmatprep.mubr.bf16.mxu1 %v4720_v15 }
 0x170   :  { %2191 = vmatpush1.bf16.msk.msra.mxu1 %vm4872_vm12, %v4686_v39  ;;  %2175 = vmatpush1.bf16.msk.msra.mxu0 %vm4944_vm7, %v4686_v39  ;;  %vm4948_vm12 = vnez %v4705_v12  ;;  %vm4954_vm7 = vnez %v4893_v27  ;;  %v4988_v12 = vld [vmem:[#allocation27_spill] sm:$0xff]  ;;  %v117_v27 = vsub.s32 5, %v5007_v41 }
 0x171   :  { %2193 = vmatprep.subr.msk.bf16.mxu1 %vm4876_vm3, %v4686_v39  ;;  %2177 = vmatprep.subr.msk.bf16.mxu0 %vm4945_vm15, %v4686_v39  ;;  %vm4949_vm3 = vnez %v4710_v4  ;;  %vm4955_vm15 = vnez %v4643_v28  ;;  %v5002_v4 = vld [vmem:[#allocation42_spill] sm:$0xff] }
 0x174   :  { %2195 = vmatpush1.bf16.msk.msra.mxu1 %vm4947_vm10, %v4686_v39  ;;  %2179 = vmatpush1.bf16.msk.msra.mxu0 %vm4948_vm12, %v4686_v39  ;;  %vm4956_vm10 = vnez %v4647_v32  ;;  %vm4957_vm12 = vnez %v4900_v53 }
 0x175   :  { %2197 = vmatprep.subr.msk.bf16.mxu1 %vm4884_vm5, %v4686_v39  ;;  %2181 = vmatprep.subr.msk.bf16.mxu0 %vm4949_vm3, %v4686_v39  ;;  %vm4953_vm5 = vnez %v4639_v20  ;;  %vm4958_vm3 = vnez %v4651_v40  ;;  %v4967_v40 = vld [vmem:[#allocation19_spill] sm:$0xff] }
 0x178   :  { %2199 = vmatpush1.bf16.msk.msra.mxu1 %vm4950_vm6, %v4686_v39  ;;  %2183 = vmatpush1.bf16.msk.msra.mxu0 %vm4951_vm2, %v4686_v39  ;;  %vm4959_vm6 = vnez %v4904_v31  ;;  %vm4961_vm2 = vnez %v4852_v47  ;;  %v68_v31 = vld [vmem:[#allocation2 + $0x10] sm:$0xff] }
 0x179   :  { %2201 = vmatprep.subr.msk.bf16.mxu1 %vm4952_vm1, %v4686_v39  ;;  %2217 = vmatprep.subr.msk.bf16.mxu0 %vm4953_vm5, %v4686_v39  ;;  %vm4962_vm1 = vnez %v4909_v59  ;;  %vm4963_vm5 = vnez %v4854_v48 }
 0x17b   :  { %1491 = vmatmul.mubr.bf16.vlgmr.msra.gmra.mrb[8].mxu0 %v4218_v19 }
 0x17c   :  { %2203 = vmatpush1.bf16.msk.msra.mxu1 %vm4954_vm7, %v4686_v39  ;;  %2219 = vmatpush1.bf16.msk.msra.mxu0 %vm4955_vm15, %v4686_v39  ;;  %vm4964_vm7 = vnez %v4797_v1  ;;  %vm4966_vm15 = vnez %v4805_v3  ;;  %v101_v1 = vsub.s32 1, %v5007_v41  ;;  %v66_v3 = vld [vmem:[#allocation2] sm:$0xff] }
 0x17d   :  { %2205 = vmatprep.subr.msk.bf16.mxu1 %vm4898_vm13, %v4686_v39  ;;  %2221 = vmatprep.subr.msk.bf16.mxu0 %vm4956_vm10, %v4686_v39  ;;  %vm4960_vm13 = vnez %v4655_v44  ;;  %vm4968_vm10 = vnez %v4967_v40  ;;  %v4973_v44 = vld [vmem:[#allocation21_spill] sm:$0xff] }
 0x17e   :  { %1572 = vmatprep.mubr.bf16.mxu0 %v4720_v15 }
 0x180   :  { %2207 = vmatpush1.bf16.msk.msra.mxu1 %vm4957_vm12, %v4686_v39  ;;  %2223 = vmatpush1.bf16.msk.msra.mxu0 %vm4958_vm3, %v4686_v39  ;;  %vm4969_vm12 = vnez %v4807_v6  ;;  %vm4971_vm3 = vnez %v4970_v42  ;;  %v4393_v6 = vld [vmem:[#allocation8] sm:$0xff] }
 0x181   :  { %2209 = vmatprep.subr.msk.bf16.mxu1 %vm4959_vm6, %v4686_v39  ;;  %2225 = vmatprep.subr.msk.bf16.mxu0 %vm4960_vm13, %v4686_v39  ;;  %vm4972_vm6 = vnez %v4809_v9  ;;  %vm4974_vm13 = vnez %v4973_v44  ;;  %v114_v53 = vrot.slane %v4393_v6, %v113_v10  ;;  %v118_v8 = vrot.slane %v4393_v6, %v117_v27 }
 0x183   :  { %v4258_v20 = vpop.f32.mrb[0].mxu1 }
 0x184   :  { %2211 = vmatpush1.bf16.msk.msra.mxu1 %vm3591_vm14, %v4686_v39  ;;  %2227 = vmatpush1.bf16.msk.msra.mxu0 %vm4961_vm2, %v4686_v39  ;;  %v4266_v28 = vpop.f32.mrb[1].mxu1  ;;  %vm4965_vm14 = vnez %v4858_v57  ;;  %vm4975_vm2 = vnez %v4813_v11  ;;  %v102_v11 = vrot.slane %v4393_v6, %v101_v1 }
 0x185   :  { %2213 = vmatprep.subr.msk.bf16.mxu1 %vm4962_vm1, %v4686_v39  ;;  %2229 = vmatprep.subr.msk.bf16.mxu0 %vm4963_vm5, %v4686_v39  ;;  %v1088_v32 = vpop.f32.mrb[2].mxu1  ;;  %vm4977_vm1 = vnez %v4976_v49  ;;  %vm4978_vm5 = vnez %v4817_v13 }
 0x186   :  { %v1089_v37 = vpop.f32.mrb[3].mxu1 }
 0x188   :  { %2215 = vmatpush1.bf16.msk.msra.mxu1 %vm4964_vm7, %v4686_v39  ;;  %2231 = vmatpush1.bf16.msk.msra.mxu0 %vm4965_vm14, %v4686_v39  ;;  %vm4980_vm7 = vnez %v4979_v54  ;;  %vm4981_vm14 = vnez %v4820_v21 }
 0x189   :  { %2249 = vmatprep.subr.msk.bf16.mxu1 %vm4966_vm15, %v4686_v39  ;;  %2233 = vmatprep.subr.msk.bf16.mxu0 %vm4968_vm10, %v4686_v39  ;;  %vm4983_vm15 = vnez %v4982_v61  ;;  %vm4984_vm10 = vnez %v4823_v22  ;;  %v105_v22 = vsub.s32 2, %v5007_v41  ;;  %v74_v61 = vld [vmem:[#allocation5 + $0x18] sm:$0xff] }
 0x18b   :  { %1532 = vmatmul.mubr.bf16.vlgmr.msra.gmra.mrb[4].mxu1 %v4218_v19 }
 0x18c   :  { %2251 = vmatpush1.bf16.msk.msra.mxu1 %vm4969_vm12, %v4686_v39  ;;  %2235 = vmatpush1.bf16.msk.msra.mxu0 %vm4971_vm3, %v4686_v39  ;;  %vm4986_vm12 = vnez %v4985_v7  ;;  %vm4987_vm3 = vnez %v4827_v23  ;;  %v109_v23 = vsub.s32 3, %v5007_v41 }
 0x18d   :  { %2253 = vmatprep.subr.msk.bf16.mxu1 %vm4972_vm6, %v4686_v39  ;;  %2237 = vmatprep.subr.msk.bf16.mxu0 %vm4974_vm13, %v4686_v39  ;;  %vm4989_vm6 = vnez %v4988_v12  ;;  %vm4990_vm13 = vnez %v4831_v24  ;;  %v121_v12 = vsub.s32 6, %v5007_v41 }
 0x18e   :  { %1613 = vmatprep.mubr.bf16.mxu1 %v4720_v15  ;;  %v97_v15 = vsub.s32 0, %v5007_v41  ;;  %v110_v35 = vrot.slane %v4393_v6, %v109_v23 }
 0x190   :  { %2255 = vmatpush1.bf16.msk.msra.mxu1 %vm4975_vm2, %v4686_v39  ;;  %2239 = vmatpush1.bf16.msk.msra.mxu0 %vm4977_vm1, %v4686_v39  ;;  %vm4991_vm2 = vnez %v4834_v33  ;;  %vm4993_vm1 = vnez %v4992_v29  ;;  %v98_v9 = vrot.slane %v4393_v6, %v97_v15  ;;  %v67_v33 = vld [vmem:[#allocation2 + $0x8] sm:$0xff]  ;;  %v125_v29 = vsub.s32 7, %v5007_v41 }
 0x191   :  { %2257 = vmatprep.subr.msk.bf16.mxu1 %vm4978_vm5, %v4686_v39  ;;  %2241 = vmatprep.subr.msk.bf16.mxu0 %vm4980_vm7, %v4686_v39  ;;  %vm4994_vm5 = vnez %v4837_v34  ;;  %vm4995_vm7 = vmmov 0   ;;  %v106_v34 = vrot.slane %v4393_v6, %v105_v22 }
 0x192   :  { %v132_v21 = vcombine.low %v98_v9, %v102_v11 }
 0x193   :  { %v133_v47 = vcombine.low %v106_v34, %v110_v35 }
 0x194   :  { %2259 = vmatpush1.bf16.msk.msra.mxu1 %vm4981_vm14, %v4686_v39  ;;  %2243 = vmatpush1.bf16.msk.msra.mxu0 %vm4983_vm15, %v4686_v39  ;;  %vm4997_vm14 = vnez %v4996_v63  ;;  %vm4999_vm15 = vnez %v4998_v55  ;;  %v69_v63 = vld [vmem:[#allocation2 + $0x18] sm:$0xff] }
 0x195   :  { %2261 = vmatprep.subr.msk.bf16.mxu1 %vm4984_vm10, %v4686_v39  ;;  %2245 = vmatprep.subr.msk.bf16.mxu0 %vm4986_vm12, %v4686_v39  ;;  %vm76_vm10 = vcmp.ne.f32.partialorder %v71_v56, %v71_v56 }
 0x198   :  { %2263 = vmatpush1.bf16.msk.msra.mxu1 %vm4987_vm3, %v4686_v39  ;;  %2247 = vmatpush1.bf16.msk.msra.mxu0 %vm4989_vm6, %v4686_v39  ;;  %vm78_vm6 = vcmp.ne.f32.partialorder %v73_v51, %v73_v51 }
 0x199   :  { %2265 = vmatprep.subr.msk.bf16.mxu1 %vm4990_vm13, %v4686_v39  ;;  %2363 = vmatprep.subr.bf16.mxu0 %v4730_v0  ;;  %v83_v17 = vsel %vm78_vm6, %v68_v31, %v73_v51 }
 0x19b   :  { %1573 = vmatmul.mubr.bf16.vlgmr.msra.gmra.mrb[0].mxu0 %v4218_v19 }
 0x19c   :  { %2267 = vmatpush1.bf16.msk.msra.mxu1 %vm4991_vm2, %v4686_v39  ;;  %2364 = vmatpush3.bf16.msk.msra.mxu0 %vm4993_vm1, %v4686_v39  ;;  %vm79_vm2 = vcmp.ne.f32.partialorder %v74_v61, %v74_v61 }
 0x19d   :  { %2269 = vmatprep.subr.msk.bf16.mxu1 %vm4994_vm5, %v4686_v39  ;;  %2365 = vmatprep.subr.bf16.mxu0 %v4730_v0 }
 0x19e   :  { %2379 = vmatprep.mubr.msk.bf16.mxu0 %vm4995_vm7, %v4730_v0 }
 0x1a0   :  { %2271 = vmatpush1.bf16.msk.msra.mxu1 %vm4934_vm9, %v4686_v39  ;;  %2366 = vmatpush3.bf16.msk.msra.mxu0 %vm4997_vm14, %v4686_v39  ;;  %vm5001_vm9 = vnez %v5000_v62  ;;  %v122_v62 = vrot.slane %v4393_v6, %v121_v12 }
 0x1a1   :  { %2273 = vmatprep.subr.msk.bf16.mxu1 %vm4936_vm4, %v4686_v39  ;;  %2367 = vmatprep.subr.bf16.mxu0 %v4730_v0  ;;  %vm5006_vm4 = vnez %v4803_v2 }
 0x1a4   :  { %2275 = vmatpush1.bf16.msk.msra.mxu1 %vm3946_vm8, %v4686_v39  ;;  %2368 = vmatpush3.bf16.msk.msra.mxu0 %vm4999_vm15, %v4686_v39  ;;  %vm5003_vm8 = vnez %v5002_v4  ;;  %v126_v4 = vrot.slane %v4393_v6, %v125_v29 }
 0x1a5   :  { %2277 = vmatprep.subr.msk.bf16.mxu1 %vm3964_vm0, %v4686_v39  ;;  %2369 = vmatprep.subr.bf16.mxu0 %v4730_v0  ;;  %vm5004_vm0 = vnez %v4919_v43 }
 0x1a6   :  { %v135_v9 = vcombine.low %v122_v62, %v126_v4 }
 0x1a8   :  { %2279 = vmatpush1.bf16.msk.msra.mxu1 %vm3977_vm11, %v4686_v39  ;;  %2370 = vmatpush3.bf16.msk.msra.mxu0 %vm5001_vm9, %v4686_v39  ;;  %vm5005_vm11 = vnez %v4923_v14 }
 0x1a9   :  { %2371 = vmatprep.subr.bf16.mxu0 %v4730_v0 }
 0x1ab   :  { %1614 = vmatmul.mubr.bf16.vlgmr.msra.gmra.mrb[8].mxu1 %v4218_v19 }
 0x1ac   :  { %2372 = vmatpush3.bf16.msk.msra.mxu0 %vm5003_vm8, %v4686_v39 }
 0x1ad   :  { %2373 = vmatprep.subr.bf16.mxu0 %v4730_v0 }
 0x1b0   :  { %2374 = vmatpush3.bf16.msk.msra.mxu0 %vm5004_vm0, %v4686_v39 }
 0x1b1   :  { %2375 = vmatprep.subr.bf16.mxu0 %v4730_v0 }
 0x1b4   :  { %2376 = vmatpush3.bf16.msk.msra.mxu0 %vm5005_vm11, %v4686_v39 }
 0x1b5   :  { %2377 = vmatprep.subr.bf16.mxu0 %v4730_v0  ;;  %v81_v0 = vsel %vm76_vm10, %v66_v3, %v71_v56  ;;  %v84_v56 = vsel %vm79_vm2, %v69_v63, %v74_v61 }
 0x1b6   :  { %v86_v13 = vsub.f32 %v66_v3, %v81_v0  ;;  %v89_v3 = vsub.f32 %v69_v63, %v84_v56 }
 0x1b8   :  { %2378 = vmatpush3.bf16.msk.msra.mxu0 %vm5006_vm4, %v4686_v39  ;;  %v140_v2 = vmul.f32 %v132_v21, %v86_v13  ;;  %v72_v39 = vld [vmem:[#allocation5 + $0x8] sm:$0xff]  ;;  %v143_v21 = vmul.f32 %v135_v9, %v89_v3 }
 0x1b9   :  { %vm77_vm12 = vcmp.ne.f32.partialorder %v72_v39, %v72_v39 }
 0x1ba   :  { %v145_v24 = vand.u32 2147483647, %v140_v2  ;;  %v82_v36 = vsel %vm77_vm12, %v67_v33, %v72_v39  ;;  %v75_v2 = vld [vmem:[#allocation5 + $0x20] sm:$0xf] }
 0x1bb   :  { %2380 = vmatmul.mubr.bf16.vlgmr.msra.gmra.mrb[4].mxu0 %v4218_v19  ;;  %v87_v46 = vsub.f32 %v67_v33, %v82_v36  ;;  %v88_v19 = vsub.f32 %v68_v31, %v83_v17  ;;  %vm80_vm5 = vcmp.ne.f32.partialorder %v75_v2, %v75_v2  ;;  %v148_v33 = vand.u32 2147483647, %v143_v21  ;;  %v1714_v36 = vld [vmem:[#allocation8 + $0x8] ss:$0 sm:$0xff] }
 0x1bc   :  { %v155_v45 = vmul.f32 4.5, %v145_v24  ;;  %v1715_v52 = vadd.f32 -0.055555556, %v145_v24  ;;  %vm150_vm3 = vcmp.lt.f32.partialorder %v145_v24, 0.11111111 }
 0x1bd   :  { %v141_v60 = vmul.f32 %v133_v47, %v87_v46  ;;  %v158_v34 = vmul.f32 4.5, %v148_v33  ;;  %v1718_v46 = vadd.f32 -0.055555556, %v148_v33  ;;  %vm153_vm7 = vcmp.lt.f32.partialorder %v148_v33, 0.11111111 }
 0x1be   :  { %v160_v48 = vmul.f32 %v155_v45, %v145_v24  ;;  %v70_v24 = vld [vmem:[#allocation2 + $0x20] sm:$0xf] }
 0x1bf   :  { %v146_v5 = vand.u32 2147483647, %v141_v60  ;;  %v85_v6 = vsel %vm80_vm5, %v70_v24, %v75_v2  ;;  %v163_v45 = vmul.f32 %v158_v34, %v148_v33 }
 0x1c0   :  { %v170_v18 = vsel %vm150_vm3, %v160_v48, %v1715_v52  ;;  %v90_v35 = vsub.f32 %v70_v24, %v85_v6 }
 0x1c1   :  { %v156_v50 = vmul.f32 4.5, %v146_v5  ;;  %v1716_v30 = vadd.f32 -0.055555556, %v146_v5  ;;  %vm151_vm13 = vcmp.lt.f32.partialorder %v146_v5, 0.11111111  ;;  %v173_v52 = vsel %vm153_vm7, %v163_v45, %v1718_v46 }
 0x1c2   :  { %v144_v47 = vmul.f32 %v1714_v36, %v90_v35 }
 0x1c3   :  { %v161_v25 = vmul.f32 %v156_v50, %v146_v5 }
 0x1c4   :  { %v149_v60 = vand.u32 2147483647, %v144_v47 }
 0x1c5   :  { %v171_v32 = vsel %vm151_vm13, %v161_v25, %v1716_v30 }
 0x1c6   :  { %vm154_vm14 = vcmp.lt.f32.partialorder %v149_v60, 0.11111111 }
 0x24e   :  { %v1492_v57 = vpop.f32.mrb[8].mxu0 }
 0x24f   :  { %v2383_v58 = vadd.f32 %v1492_v57, %v4258_v20  ;;  %v1494_v59 = vpop.f32.mrb[9].mxu0  ;;  %v134_v20 = vcombine.low %v114_v53, %v118_v8 }
 0x250   :  { %v2384_v14 = vadd.f32 %v1494_v59, %v4266_v28  ;;  %v1496_v16 = vpop.f32.mrb[10].mxu0 }
 0x251   :  { %v1497_v26 = vpop.f32.mrb[11].mxu0  ;;  %v142_v40 = vmul.f32 %v134_v20, %v88_v19 }
 0x252   :  { %v1679_v43 = vcombine.low %v2383_v58, %v2384_v14 }
 0x253   :  { %v147_v7 = vand.u32 2147483647, %v142_v40 }
 0x254   :  { %v1687_v38 = vmul.f32 %v1679_v43, %v170_v18  ;;  %v159_v18 = vmul.f32 4.5, %v149_v60  ;;  %v1719_v43 = vadd.f32 -0.055555556, %v149_v60 }
 0x255   :  { %v157_v55 = vmul.f32 4.5, %v147_v7  ;;  %v1717_v1 = vadd.f32 -0.055555556, %v147_v7  ;;  %vm152_vm1 = vcmp.lt.f32.partialorder %v147_v7, 0.11111111 }
 0x256   :  { %1692 = vst [vmem:[#allocation10] sm:$0xff] %v1687_v38  ;;  %v164_v26 = vmul.f32 %v159_v18, %v149_v60 }
 0x257   :  { %v162_v15 = vmul.f32 %v157_v55, %v147_v7 }
 0x258   :  { %v174_v51 = vsel %vm154_vm14, %v164_v26, %v1719_v43 }
 0x259   :  { %v172_v0 = vsel %vm152_vm1, %v162_v15, %v1717_v1 }
 0x25e   :  { %v1533_v28 = vpop.f32.mrb[4].mxu1 }
 0x25f   :  { %v1535_v37 = vpop.f32.mrb[5].mxu1 }
 0x260   :  { %v1680_v42 = vcombine.low %v1533_v28, %v1535_v37  ;;  %v1537_v44 = vpop.f32.mrb[6].mxu1 }
 0x261   :  { %v1538_v49 = vpop.f32.mrb[7].mxu1 }
 0x262   :  { %v1688_v54 = vmul.f32 %v1680_v42, %v171_v32 }
 0x264   :  { %1693 = vst [vmem:[#allocation10 + $0x8] sm:$0xff] %v1688_v54 }
 0x26e   :  { %v1574_v11 = vpop.f32.mrb[0].mxu0 }
 0x26f   :  { %v1576_v13 = vpop.f32.mrb[1].mxu0 }
 0x270   :  { %v1681_v41 = vcombine.low %v1574_v11, %v1576_v13  ;;  %v1578_v39 = vpop.f32.mrb[2].mxu0 }
 0x271   :  { %v1579_v22 = vpop.f32.mrb[3].mxu0 }
 0x272   :  { %v1689_v23 = vmul.f32 %v1681_v41, %v172_v0 }
 0x274   :  { %1694 = vst [vmem:[#allocation10 + $0x10] sm:$0xff] %v1689_v23 }
 0x27e   :  { %v1615_v48 = vpop.f32.mrb[8].mxu1 }
 0x27f   :  { %v1617_v57 = vpop.f32.mrb[9].mxu1 }
 0x280   :  { %v1682_v58 = vcombine.low %v1615_v48, %v1617_v57  ;;  %v1619_v59 = vpop.f32.mrb[10].mxu1 }
 0x281   :  { %v1620_v14 = vpop.f32.mrb[11].mxu1 }
 0x282   :  { %v1690_v16 = vmul.f32 %v1682_v58, %v173_v52 }
 0x284   :  { %1695 = vst [vmem:[#allocation10 + $0x18] sm:$0xff] %v1690_v16 }
 0x28e   :  { %v1656_v5 = vpop.f32.mrb[4].mxu0 }
 0x28f   :  { %v1691_v10 = vmul.f32 %v1656_v5, %v174_v51  ;;  %v2381_v27 = vpop.f32.mrb[5].mxu0 }
 0x290   :  { %v1659_v38 = vpop.f32.mrb[6].mxu0 }
 0x291   :  { %1696 = vst [vmem:[#allocation10 + $0x20] sm:$0xf] %v1691_v10  ;;  %v2382_v31 = vpop.f32.mrb[7].mxu0 }
 0x292   :  { %2529 = shalt.err (!%p2526_p8)
}
 0x293   :  { %s2530_s12 = scalar_lea.hbm %s4427_s4, 576 }
 0x294   :  { %p2531_p9 = scmp.ne.s32.totalorder %s4427_s4, %s2530_s12  ;;  %p2534_p10 = scmp.lt.u32.totalorder %s2530_s12, %s4427_s4 }
 0x296   :  { %p2536_p11 = pnand %p2534_p10, %p2531_p9 }
 0x298   :  { %2539 = shalt.err (!%p2536_p11)
}
 0x299   :  { %1706 = dma.vmem_to_hbm [thread:$0]  %s1704_s9, 576, %s4427_s4, [#allocation4]  }
 0x29a   :  { %2546 = dma.done.wait [#allocation4], 576  }
 0x29b   :  { %2547 = vsyncadd [#allocation4], 4294966720 }
 0x29c   :  { %1710 = vsyncpa [#allocation3], 1 }
 0x29d   :  { %1711 = vsyncpa [#allocation6], 1 }
 0x29e   :  { %1712 = vsyncpa [#allocation9], 1 }
 0x29f   :  { %1713 = vsyncpa [#allocation4], 1 }

</bundles_post_ra>
